<compile_context>
chip_gen: v7x
topology: tpu7x:2x2x1
jax: 0.10.0
libtpu: 0.0.40
codegen_flags: <defaults>
</compile_context>

<pallas_src>
import jax
import jax.numpy as jnp
from jax.experimental import pallas as pl
from jax.experimental.pallas import tpu as pltpu

# ----- model sizes implied by DepthNet(...) constructor args -----------------
LIDAR = 60                     # lidar_point
FH, FW = 8, 10                 # f_size spatial
NTOK = FH * FW                 # 80 image tokens
FEAT0 = 320                    # f_size[0] / feat_ch[0]
DMODEL = 256                   # d_model
NBINS = 64                     # bin_size
PATCH = 32
PATCH_DIM = 3 * PATCH * PATCH  # 3072
OUT_LANES = 128                # lane-dense output slab width
DEPTH_MIN, DEPTH_MAX = 0.1, 10.0
WIDTH_EPS = 1e-4


# ----- single fused Pallas kernel ---------------------------------------------
def _depthnet_kernel(p_ref, w1_ref, b1_ref, w2_ref, b2_ref,
                     y_ref, wlidq_ref, posq_ref,
                     wkv_ref,
                     woreg_ref, breg_ref, wbin_ref, bbin_ref, tri_ref,
                     depth_ref, centers_ref):
    # ---- patch embed: bf16 operands, single-pass MXU, f32 accumulation ------
    feat = jnp.dot(p_ref[...], w1_ref[...],
                   preferred_element_type=jnp.float32)              # [NTOK, FEAT0]
    f = jnp.maximum(feat + b1_ref[...], 0.0)
    tokens = jnp.dot(f.astype(jnp.bfloat16), w2_ref[...],
                     preferred_element_type=jnp.float32) + b2_ref[...]  # [NTOK, D]
    tokens_bf = tokens.astype(jnp.bfloat16)

    # ---- lidar query embedding (wq folded on host: pure VPU broadcast) ------
    q = y_ref[...] * wlidq_ref[...] + posq_ref[...]                  # [LIDAR, D] f32
    q_bf = q.astype(jnp.bfloat16)

    # ---- fused K/V projection: one [NTOK,256]@[256,512] bf16 matmul ---------
    kv = jnp.dot(tokens_bf, wkv_ref[...],
                 preferred_element_type=jnp.float32)                 # [NTOK, 2D]
    k_mat = kv[:, :DMODEL].astype(jnp.bfloat16)
    v_mat = kv[:, DMODEL:].astype(jnp.bfloat16)

    # scores: contract axis 1 of both operands (no explicit transpose)
    s = jax.lax.dot_general(
        q_bf, k_mat, (((1,), (1,)), ((), ())),
        preferred_element_type=jnp.float32) * (1.0 / (DMODEL ** 0.5))
    s = s - jnp.max(s, axis=-1, keepdims=True)
    p = jnp.exp(s)
    p = p * pl.reciprocal(jnp.sum(p, axis=-1, keepdims=True), approx=True)
    ctx = jnp.dot(p.astype(jnp.bfloat16), v_mat,
                  preferred_element_type=jnp.float32)                # [LIDAR, D]

    # ---- adaptive-bin head (wo folded into woreg on host) -------------------
    pooled = jnp.mean(ctx, axis=0, keepdims=True)                    # [1, D]
    raw = jnp.dot(pooled.astype(jnp.bfloat16), woreg_ref[...],
                  preferred_element_type=jnp.float32) + breg_ref[...]   # [1, NBINS]
    logits = jnp.dot(tokens_bf, wbin_ref[...],
                     preferred_element_type=jnp.float32) + bbin_ref[...]  # [NTOK, NBINS]

    # stable softplus + EXACT normalization (feeds every depth value)
    widths = jnp.maximum(raw, 0.0) + jnp.log1p(jnp.exp(-jnp.abs(raw))) + WIDTH_EPS
    widths = widths / jnp.sum(widths, axis=-1, keepdims=True)
    # cumulative sum via precomputed upper-triangular matmul (MXU, f32 exact)
    csum = jnp.dot(widths, tri_ref[...], preferred_element_type=jnp.float32)
    centers = DEPTH_MIN + (DEPTH_MAX - DEPTH_MIN) * (csum - 0.5 * widths)  # [1, NBINS]
    # lane-dense [1,128] slab (sliced back to 64 outside)
    centers_ref[...] = jnp.concatenate([centers, centers], axis=-1)

    # per-token bin softmax -> depth expectation
    logits = logits - jnp.max(logits, axis=-1, keepdims=True)
    probs = jnp.exp(logits)
    probs = probs * pl.reciprocal(
        jnp.sum(probs, axis=-1, keepdims=True), approx=True)
    depth = jnp.sum(probs * centers, axis=-1, keepdims=True)         # [NTOK, 1]

    # lane-dense output slab: broadcast to full 128 lanes (unmasked stores)
    depth_ref[...] = jnp.broadcast_to(depth, (NTOK, OUT_LANES))


# ----- parameters -------------------------------------------------------------
def init_params(key):
    ks = jax.random.split(key, 11)
    sc = lambda fan: 1.0 / (fan ** 0.5)
    n = lambda k, shape, s: jax.random.normal(k, shape, jnp.float32) * s
    return dict(
        w1=n(ks[0], (PATCH_DIM, FEAT0), sc(PATCH_DIM)),
        b1=jnp.zeros((1, FEAT0), jnp.float32),
        w2=n(ks[1], (FEAT0, DMODEL), sc(FEAT0)),
        b2=jnp.zeros((1, DMODEL), jnp.float32),
        wlid=n(ks[2], (1, DMODEL), 1.0),
        pos=n(ks[3], (LIDAR, DMODEL), 0.02),
        wq=n(ks[4], (DMODEL, DMODEL), sc(DMODEL)),
        wk=n(ks[5], (DMODEL, DMODEL), sc(DMODEL)),
        wv=n(ks[6], (DMODEL, DMODEL), sc(DMODEL)),
        wo=n(ks[7], (DMODEL, DMODEL), sc(DMODEL)),
        wreg=n(ks[8], (DMODEL, NBINS), sc(DMODEL)),
        breg=jnp.zeros((1, NBINS), jnp.float32),
        wbin=n(ks[9], (DMODEL, NBINS), sc(DMODEL)),
        bbin=jnp.zeros((1, NBINS), jnp.float32),
    )


def prepare_weights(params):
    """Pre-pack weights ONCE (outside the jitted forward): bf16 casts, fused
    concats, and the algebraic folds of wq / wo. Done here so the pallas_call
    reads final layouts directly with no extra per-step XLA ops / HBM copies."""
    wq = params["wq"]
    posq = (params["pos"] @ wq).astype(jnp.bfloat16)                 # [LIDAR, D]
    wlidq = (params["wlid"] @ wq).astype(jnp.bfloat16)               # [1, D]
    wkv = jnp.concatenate([params["wk"], params["wv"]],
                          axis=1).astype(jnp.bfloat16)               # [D, 2D]
    woreg = (params["wo"] @ params["wreg"]).astype(jnp.bfloat16)     # [D, NBINS]
    # TODO(synk): on v5e/v6e w1 could be int8 per-channel quantized for another
    # ~1 MB of HBM savings; v7x has no integer MXU path, so bf16 is the
    # generation-portable choice used here.
    return dict(
        w1=params["w1"].astype(jnp.bfloat16),
        b1=params["b1"],
        w2=params["w2"].astype(jnp.bfloat16),
        b2=params["b2"],
        wlidq=wlidq,
        posq=posq,
        wkv=wkv,
        woreg=woreg,
        breg=params["breg"],
        wbin=params["wbin"].astype(jnp.bfloat16),
        bbin=params["bbin"],
        tri=jnp.triu(jnp.ones((NBINS, NBINS), jnp.float32)),
    )


# ----- forward ----------------------------------------------------------------
@jax.jit
def depthnet_forward(x, y, w):
    """x: [1,3,228,304] image (NCHW), y: [1,1,60] lidar samples, w: packed weights.

    Note: the original encap.forward() ignores its input and draws random
    dummy_x / dummy_y internally; here they are passed in explicitly so the
    run is deterministic.
    Returns (predict [1,1,8,10] coarse depth map, centers [1,64] bin centers).
    """
    # glue: NCHW -> pad to (256, 320) -> 32x32 patches -> [NTOK, PATCH_DIM] bf16
    xp = jnp.pad(x, ((0, 0), (0, 0),
                     (0, FH * PATCH - x.shape[2]),
                     (0, FW * PATCH - x.shape[3])))
    patches = (xp[0]
               .reshape(3, FH, PATCH, FW, PATCH)
               .transpose(1, 3, 0, 2, 4)
               .reshape(NTOK, PATCH_DIM)).astype(jnp.bfloat16)
    y_col = y.reshape(LIDAR, 1)

    full = lambda shape: pl.BlockSpec(shape, lambda i: (0,) * len(shape))
    in_specs = [
        full((NTOK, PATCH_DIM)),                        # patches (bf16)
        full((PATCH_DIM, FEAT0)),                       # w1      (bf16)
        full((1, FEAT0)),                               # b1
        full((FEAT0, DMODEL)),                          # w2      (bf16)
        full((1, DMODEL)),                              # b2
        full((LIDAR, 1)),                               # y_col
        full((1, DMODEL)),                              # wlidq   (bf16)
        full((LIDAR, DMODEL)),                          # posq    (bf16)
        full((DMODEL, 2 * DMODEL)),                     # wkv     (bf16)
        full((DMODEL, NBINS)),                          # woreg   (bf16)
        full((1, NBINS)),                               # breg
        full((DMODEL, NBINS)),                          # wbin    (bf16)
        full((1, NBINS)),                               # bbin
        full((NBINS, NBINS)),                           # tri
    ]

    depth_slab, centers_slab = pl.pallas_call(
        _depthnet_kernel,
        grid=(1,),
        in_specs=in_specs,
        out_specs=(full((NTOK, OUT_LANES)), full((1, OUT_LANES))),
        out_shape=(jax.ShapeDtypeStruct((NTOK, OUT_LANES), jnp.float32),
                   jax.ShapeDtypeStruct((1, OUT_LANES), jnp.float32)),
        compiler_params=pltpu.CompilerParams(
            dimension_semantics=("arbitrary",),
            vmem_limit_bytes=12 * 1024 * 1024),
    )(patches, w["w1"], w["b1"], w["w2"], w["b2"],
      y_col, w["wlidq"], w["posq"],
      w["wkv"],
      w["woreg"], w["breg"], w["wbin"], w["bbin"], w["tri"])

    # TODO(synk): the real DepthNet decoder upsamples through
    # feat_ch=[320,112,40,24,16] stages back to input resolution; we return the
    # coarse f_size (8x10) depth map.
    predict = depth_slab[:, :1].reshape(1, 1, FH, FW)
    centers = centers_slab[:, :NBINS].reshape(1, NBINS)
    return predict, centers


if __name__ == "__main__":
    key = jax.random.PRNGKey(0)
    kx, ky, kp = jax.random.split(key, 3)
    x = jax.random.uniform(kx, (1, 3, 228, 304), jnp.float32)
    y = jax.random.uniform(ky, (1, 1, LIDAR), jnp.float32)
    params = init_params(kp)
    packed = prepare_weights(params)          # one-time weight packing (not jitted)
    jax.block_until_ready(packed)

    predict, centers = depthnet_forward(x, y, packed)
    jax.block_until_ready((predict, centers))
    assert predict.shape == (1, 1, FH, FW) and centers.shape == (1, NBINS)
    assert bool(jnp.all(jnp.isfinite(predict))) and bool(jnp.all(jnp.isfinite(centers)))
    print("KERNEL_OK")
</pallas_src>

<mosaic_0001>
module attributes {stable_mosaic.version = 11 : i64} {
  func.func @_depthnet_kernel(%arg0: i32, %arg1: memref<80x3072xbf16, #tpu.memory_space<vmem>>, %arg2: memref<3072x320xbf16, #tpu.memory_space<vmem>>, %arg3: memref<1x320xf32, #tpu.memory_space<vmem>>, %arg4: memref<320x256xbf16, #tpu.memory_space<vmem>>, %arg5: memref<1x256xf32, #tpu.memory_space<vmem>>, %arg6: memref<60x1xf32, #tpu.memory_space<vmem>>, %arg7: memref<1x256xbf16, #tpu.memory_space<vmem>>, %arg8: memref<60x256xbf16, #tpu.memory_space<vmem>>, %arg9: memref<256x512xbf16, #tpu.memory_space<vmem>>, %arg10: memref<256x64xbf16, #tpu.memory_space<vmem>>, %arg11: memref<1x64xf32, #tpu.memory_space<vmem>>, %arg12: memref<256x64xbf16, #tpu.memory_space<vmem>>, %arg13: memref<1x64xf32, #tpu.memory_space<vmem>>, %arg14: memref<64x64xf32, #tpu.memory_space<vmem>>, %arg15: memref<80x128xf32, #tpu.memory_space<vmem>>, %arg16: memref<1x128xf32, #tpu.memory_space<vmem>>) attributes {dimension_semantics = [#tpu.dimension_semantics<arbitrary>], iteration_bounds = array<i64: 1>, scalar_prefetch = 0 : i64, scratch_operands = 0 : i64, tpu.core_type = #tpu.core_type<tc>, window_params = [{pipeline_mode = #tpu.pipeline_mode<synchronous>, transform_indices = @transform_0, window_bounds = array<i64: 80, 3072>}, {pipeline_mode = #tpu.pipeline_mode<synchronous>, transform_indices = @transform_1, window_bounds = array<i64: 3072, 320>}, {pipeline_mode = #tpu.pipeline_mode<synchronous>, transform_indices = @transform_2, window_bounds = array<i64: 1, 320>}, {pipeline_mode = #tpu.pipeline_mode<synchronous>, transform_indices = @transform_3, window_bounds = array<i64: 320, 256>}, {pipeline_mode = #tpu.pipeline_mode<synchronous>, transform_indices = @transform_4, window_bounds = array<i64: 1, 256>}, {pipeline_mode = #tpu.pipeline_mode<synchronous>, transform_indices = @transform_5, window_bounds = array<i64: 60, 1>}, {pipeline_mode = #tpu.pipeline_mode<synchronous>, transform_indices = @transform_6, window_bounds = array<i64: 1, 256>}, {pipeline_mode = #tpu.pipeline_mode<synchronous>, transform_indices = @transform_7, window_bounds = array<i64: 60, 256>}, {pipeline_mode = #tpu.pipeline_mode<synchronous>, transform_indices = @transform_8, window_bounds = array<i64: 256, 512>}, {pipeline_mode = #tpu.pipeline_mode<synchronous>, transform_indices = @transform_9, window_bounds = array<i64: 256, 64>}, {pipeline_mode = #tpu.pipeline_mode<synchronous>, transform_indices = @transform_10, window_bounds = array<i64: 1, 64>}, {pipeline_mode = #tpu.pipeline_mode<synchronous>, transform_indices = @transform_11, window_bounds = array<i64: 256, 64>}, {pipeline_mode = #tpu.pipeline_mode<synchronous>, transform_indices = @transform_12, window_bounds = array<i64: 1, 64>}, {pipeline_mode = #tpu.pipeline_mode<synchronous>, transform_indices = @transform_13, window_bounds = array<i64: 64, 64>}, {pipeline_mode = #tpu.pipeline_mode<synchronous>, transform_indices = @transform_14, window_bounds = array<i64: 80, 128>}, {pipeline_mode = #tpu.pipeline_mode<synchronous>, transform_indices = @transform_15, window_bounds = array<i64: 1, 128>}]} {
    %c0 = arith.constant 0 : index
    %c0_0 = arith.constant 0 : index
    %0 = vector.load %arg1[%c0, %c0_0] : memref<80x3072xbf16, #tpu.memory_space<vmem>>, vector<80x3072xbf16>
    %c0_1 = arith.constant 0 : index
    %c0_2 = arith.constant 0 : index
    %1 = vector.load %arg2[%c0_1, %c0_2] : memref<3072x320xbf16, #tpu.memory_space<vmem>>, vector<3072x320xbf16>
    %cst = arith.constant dense<0.000000e+00> : vector<80x320xf32>
    %2 = tpu.matmul %0, %1, %cst {dimension_numbers = #tpu.dot_dimension_numbers<[1], [0], [0], [1], [0, 0, 1, 1], [], []>} : vector<80x3072xbf16>, vector<3072x320xbf16>, vector<80x320xf32> -> vector<80x320xf32>
    %c0_3 = arith.constant 0 : index
    %c0_4 = arith.constant 0 : index
    %3 = vector.load %arg3[%c0_3, %c0_4] : memref<1x320xf32, #tpu.memory_space<vmem>>, vector<1x320xf32>
    %4 = vector.broadcast %3 : vector<1x320xf32> to vector<80x320xf32>
    %5 = arith.addf %2, %4 : vector<80x320xf32>
    %cst_5 = arith.constant 0.000000e+00 : f32
    %6 = vector.broadcast %cst_5 : f32 to vector<80x320xf32>
    %7 = arith.maximumf %5, %6 : vector<80x320xf32>
    %8 = arith.truncf %7 : vector<80x320xf32> to vector<80x320xbf16>
    %c0_6 = arith.constant 0 : index
    %c0_7 = arith.constant 0 : index
    %9 = vector.load %arg4[%c0_6, %c0_7] : memref<320x256xbf16, #tpu.memory_space<vmem>>, vector<320x256xbf16>
    %cst_8 = arith.constant dense<0.000000e+00> : vector<80x256xf32>
    %10 = tpu.matmul %8, %9, %cst_8 {dimension_numbers = #tpu.dot_dimension_numbers<[1], [0], [0], [1], [0, 0, 1, 1], [], []>} : vector<80x320xbf16>, vector<320x256xbf16>, vector<80x256xf32> -> vector<80x256xf32>
    %c0_9 = arith.constant 0 : index
    %c0_10 = arith.constant 0 : index
    %11 = vector.load %arg5[%c0_9, %c0_10] : memref<1x256xf32, #tpu.memory_space<vmem>>, vector<1x256xf32>
    %12 = vector.broadcast %11 : vector<1x256xf32> to vector<80x256xf32>
    %13 = arith.addf %10, %12 : vector<80x256xf32>
    %14 = arith.truncf %13 : vector<80x256xf32> to vector<80x256xbf16>
    %c0_11 = arith.constant 0 : index
    %c0_12 = arith.constant 0 : index
    %15 = vector.load %arg6[%c0_11, %c0_12] : memref<60x1xf32, #tpu.memory_space<vmem>>, vector<60x1xf32>
    %c0_13 = arith.constant 0 : index
    %c0_14 = arith.constant 0 : index
    %16 = vector.load %arg7[%c0_13, %c0_14] : memref<1x256xbf16, #tpu.memory_space<vmem>>, vector<1x256xbf16>
    %17 = arith.extf %16 : vector<1x256xbf16> to vector<1x256xf32>
    %18 = vector.broadcast %15 : vector<60x1xf32> to vector<60x256xf32>
    %19 = vector.broadcast %17 : vector<1x256xf32> to vector<60x256xf32>
    %20 = arith.mulf %18, %19 : vector<60x256xf32>
    %c0_15 = arith.constant 0 : index
    %c0_16 = arith.constant 0 : index
    %21 = vector.load %arg8[%c0_15, %c0_16] : memref<60x256xbf16, #tpu.memory_space<vmem>>, vector<60x256xbf16>
    %22 = arith.extf %21 : vector<60x256xbf16> to vector<60x256xf32>
    %23 = arith.addf %20, %22 : vector<60x256xf32>
    %24 = arith.truncf %23 : vector<60x256xf32> to vector<60x256xbf16>
    %c0_17 = arith.constant 0 : index
    %c0_18 = arith.constant 0 : index
    %25 = vector.load %arg9[%c0_17, %c0_18] : memref<256x512xbf16, #tpu.memory_space<vmem>>, vector<256x512xbf16>
    %cst_19 = arith.constant dense<0.000000e+00> : vector<80x512xf32>
    %26 = tpu.matmul %14, %25, %cst_19 {dimension_numbers = #tpu.dot_dimension_numbers<[1], [0], [0], [1], [0, 0, 1, 1], [], []>} : vector<80x256xbf16>, vector<256x512xbf16>, vector<80x512xf32> -> vector<80x512xf32>
    %27 = vector.extract_strided_slice %26 {offsets = [0, 0], sizes = [80, 256], strides = [1, 1]} : vector<80x512xf32> to vector<80x256xf32>
    %28 = arith.truncf %27 : vector<80x256xf32> to vector<80x256xbf16>
    %29 = vector.extract_strided_slice %26 {offsets = [0, 256], sizes = [80, 256], strides = [1, 1]} : vector<80x512xf32> to vector<80x256xf32>
    %30 = arith.truncf %29 : vector<80x256xf32> to vector<80x256xbf16>
    %cst_20 = arith.constant dense<0.000000e+00> : vector<60x80xf32>
    %31 = tpu.matmul %24, %28, %cst_20 {dimension_numbers = #tpu.dot_dimension_numbers<[1], [1], [0], [0], [0, 0, 1, 0], [], []>} : vector<60x256xbf16>, vector<80x256xbf16>, vector<60x80xf32> -> vector<60x80xf32>
    %cst_21 = arith.constant 6.250000e-02 : f32
    %32 = vector.broadcast %cst_21 : f32 to vector<60x80xf32>
    %33 = arith.mulf %31, %32 : vector<60x80xf32>
    %cst_22 = arith.constant dense<0xFF800000> : vector<60xf32>
    %34 = vector.multi_reduction <maximumf>, %33, %cst_22 [1] : vector<60x80xf32> to vector<60xf32>
    %35 = vector.shape_cast %34 : vector<60xf32> to vector<60x1xf32>
    %36 = vector.broadcast %35 : vector<60x1xf32> to vector<60x80xf32>
    %37 = arith.subf %33, %36 : vector<60x80xf32>
    %38 = math.exp %37 : vector<60x80xf32>
    %cst_23 = arith.constant dense<0.000000e+00> : vector<60xf32>
    %39 = vector.multi_reduction <add>, %38, %cst_23 [1] : vector<60x80xf32> to vector<60xf32>
    %40 = vector.shape_cast %39 : vector<60xf32> to vector<60x1xf32>
    %41 = tpu.reciprocal %40 {approx = true} : vector<60x1xf32> -> vector<60x1xf32>
    %42 = vector.broadcast %41 : vector<60x1xf32> to vector<60x80xf32>
    %43 = arith.mulf %38, %42 : vector<60x80xf32>
    %44 = arith.truncf %43 : vector<60x80xf32> to vector<60x80xbf16>
    %cst_24 = arith.constant dense<0.000000e+00> : vector<60x256xf32>
    %45 = tpu.matmul %44, %30, %cst_24 {dimension_numbers = #tpu.dot_dimension_numbers<[1], [0], [0], [1], [0, 0, 1, 1], [], []>} : vector<60x80xbf16>, vector<80x256xbf16>, vector<60x256xf32> -> vector<60x256xf32>
    %cst_25 = arith.constant dense<0.000000e+00> : vector<256xf32>
    %46 = vector.multi_reduction <add>, %45, %cst_25 [0] : vector<60x256xf32> to vector<256xf32>
    %47 = vector.shape_cast %46 : vector<256xf32> to vector<1x256xf32>
    %cst_26 = arith.constant 6.000000e+01 : f32
    %48 = vector.broadcast %cst_26 : f32 to vector<1x256xf32>
    %49 = arith.divf %47, %48 : vector<1x256xf32>
    %50 = arith.truncf %49 : vector<1x256xf32> to vector<1x256xbf16>
    %c0_27 = arith.constant 0 : index
    %c0_28 = arith.constant 0 : index
    %51 = vector.load %arg10[%c0_27, %c0_28] : memref<256x64xbf16, #tpu.memory_space<vmem>>, vector<256x64xbf16>
    %cst_29 = arith.constant dense<0.000000e+00> : vector<1x64xf32>
    %52 = tpu.matmul %50, %51, %cst_29 {dimension_numbers = #tpu.dot_dimension_numbers<[1], [0], [0], [1], [0, 0, 1, 1], [], []>} : vector<1x256xbf16>, vector<256x64xbf16>, vector<1x64xf32> -> vector<1x64xf32>
    %c0_30 = arith.constant 0 : index
    %c0_31 = arith.constant 0 : index
    %53 = vector.load %arg11[%c0_30, %c0_31] : memref<1x64xf32, #tpu.memory_space<vmem>>, vector<1x64xf32>
    %54 = arith.addf %52, %53 : vector<1x64xf32>
    %c0_32 = arith.constant 0 : index
    %c0_33 = arith.constant 0 : index
    %55 = vector.load %arg12[%c0_32, %c0_33] : memref<256x64xbf16, #tpu.memory_space<vmem>>, vector<256x64xbf16>
    %cst_34 = arith.constant dense<0.000000e+00> : vector<80x64xf32>
    %56 = tpu.matmul %14, %55, %cst_34 {dimension_numbers = #tpu.dot_dimension_numbers<[1], [0], [0], [1], [0, 0, 1, 1], [], []>} : vector<80x256xbf16>, vector<256x64xbf16>, vector<80x64xf32> -> vector<80x64xf32>
    %c0_35 = arith.constant 0 : index
    %c0_36 = arith.constant 0 : index
    %57 = vector.load %arg13[%c0_35, %c0_36] : memref<1x64xf32, #tpu.memory_space<vmem>>, vector<1x64xf32>
    %58 = vector.broadcast %57 : vector<1x64xf32> to vector<80x64xf32>
    %59 = arith.addf %56, %58 : vector<80x64xf32>
    %cst_37 = arith.constant 0.000000e+00 : f32
    %60 = vector.broadcast %cst_37 : f32 to vector<1x64xf32>
    %61 = arith.maximumf %54, %60 : vector<1x64xf32>
    %62 = math.absf %54 : vector<1x64xf32>
    %cst_38 = arith.constant 0.000000e+00 : f32
    %63 = vector.broadcast %cst_38 : f32 to vector<1x64xf32>
    %64 = arith.subf %63, %62 : vector<1x64xf32>
    %65 = math.exp %64 : vector<1x64xf32>
    %66 = math.log1p %65 : vector<1x64xf32>
    %67 = arith.addf %61, %66 : vector<1x64xf32>
    %cst_39 = arith.constant 9.99999974E-5 : f32
    %68 = vector.broadcast %cst_39 : f32 to vector<1x64xf32>
    %69 = arith.addf %67, %68 : vector<1x64xf32>
    %cst_40 = arith.constant dense<0.000000e+00> : vector<1xf32>
    %70 = vector.multi_reduction <add>, %69, %cst_40 [1] : vector<1x64xf32> to vector<1xf32>
    %71 = vector.shape_cast %70 : vector<1xf32> to vector<1x1xf32>
    %72 = vector.broadcast %71 : vector<1x1xf32> to vector<1x64xf32>
    %73 = arith.divf %69, %72 : vector<1x64xf32>
    %c0_41 = arith.constant 0 : index
    %c0_42 = arith.constant 0 : index
    %74 = vector.load %arg14[%c0_41, %c0_42] : memref<64x64xf32, #tpu.memory_space<vmem>>, vector<64x64xf32>
    %cst_43 = arith.constant dense<0.000000e+00> : vector<1x64xf32>
    %75 = tpu.matmul %73, %74, %cst_43 {dimension_numbers = #tpu.dot_dimension_numbers<[1], [0], [0], [1], [0, 0, 1, 1], [], []>} : vector<1x64xf32>, vector<64x64xf32>, vector<1x64xf32> -> vector<1x64xf32>
    %cst_44 = arith.constant 5.000000e-01 : f32
    %76 = vector.broadcast %cst_44 : f32 to vector<1x64xf32>
    %77 = arith.mulf %76, %73 : vector<1x64xf32>
    %78 = arith.subf %75, %77 : vector<1x64xf32>
    %cst_45 = arith.constant 9.89999961 : f32
    %79 = vector.broadcast %cst_45 : f32 to vector<1x64xf32>
    %80 = arith.mulf %79, %78 : vector<1x64xf32>
    %cst_46 = arith.constant 1.000000e-01 : f32
    %81 = vector.broadcast %cst_46 : f32 to vector<1x64xf32>
    %82 = arith.addf %81, %80 : vector<1x64xf32>
    %83 = tpu.concatenate %82, %82 in 1 : vector<1x64xf32>, vector<1x64xf32> -> vector<1x128xf32>
    %c0_47 = arith.constant 0 : index
    %c0_48 = arith.constant 0 : index
    %84 = vector.load %arg16[%c0_47, %c0_48] : memref<1x128xf32, #tpu.memory_space<vmem>>, vector<1x128xf32>
    tpu.vector_store %arg16[%c0_47, %c0_48], %83 {strides = array<i32>} : memref<1x128xf32, #tpu.memory_space<vmem>>, vector<1x128xf32>,
    %cst_49 = arith.constant dense<0xFF800000> : vector<80xf32>
    %85 = vector.multi_reduction <maximumf>, %59, %cst_49 [1] : vector<80x64xf32> to vector<80xf32>
    %86 = vector.shape_cast %85 : vector<80xf32> to vector<80x1xf32>
    %87 = vector.broadcast %86 : vector<80x1xf32> to vector<80x64xf32>
    %88 = arith.subf %59, %87 : vector<80x64xf32>
    %89 = math.exp %88 : vector<80x64xf32>
    %cst_50 = arith.constant dense<0.000000e+00> : vector<80xf32>
    %90 = vector.multi_reduction <add>, %89, %cst_50 [1] : vector<80x64xf32> to vector<80xf32>
    %91 = vector.shape_cast %90 : vector<80xf32> to vector<80x1xf32>
    %92 = tpu.reciprocal %91 {approx = true} : vector<80x1xf32> -> vector<80x1xf32>
    %93 = vector.broadcast %92 : vector<80x1xf32> to vector<80x64xf32>
    %94 = arith.mulf %89, %93 : vector<80x64xf32>
    %95 = vector.broadcast %82 : vector<1x64xf32> to vector<80x64xf32>
    %96 = arith.mulf %94, %95 : vector<80x64xf32>
    %cst_51 = arith.constant dense<0.000000e+00> : vector<80xf32>
    %97 = vector.multi_reduction <add>, %96, %cst_51 [1] : vector<80x64xf32> to vector<80xf32>
    %98 = vector.shape_cast %97 : vector<80xf32> to vector<80x1xf32>
    %99 = vector.shape_cast %98 : vector<80x1xf32> to vector<80x1xf32>
    %100 = vector.broadcast %99 : vector<80x1xf32> to vector<80x128xf32>
    %c0_52 = arith.constant 0 : index
    %c0_53 = arith.constant 0 : index
    %101 = vector.load %arg15[%c0_52, %c0_53] : memref<80x128xf32, #tpu.memory_space<vmem>>, vector<80x128xf32>
    tpu.vector_store %arg15[%c0_52, %c0_53], %100 {strides = array<i32>} : memref<80x128xf32, #tpu.memory_space<vmem>>, vector<80x128xf32>,
    return
  }
  func.func @transform_0(%arg0: i32) -> (i32, i32) {
    %c0_i32 = arith.constant 0 : i32
    %c0_i32_0 = arith.constant 0 : i32
    %c0_i32_1 = arith.constant 0 : i32
    return %c0_i32, %c0_i32_0 : i32, i32
  }
  func.func @transform_1(%arg0: i32) -> (i32, i32) {
    %c0_i32 = arith.constant 0 : i32
    %c0_i32_0 = arith.constant 0 : i32
    %c0_i32_1 = arith.constant 0 : i32
    return %c0_i32, %c0_i32_0 : i32, i32
  }
  func.func @transform_2(%arg0: i32) -> (i32, i32) {
    %c0_i32 = arith.constant 0 : i32
    %c0_i32_0 = arith.constant 0 : i32
    %c0_i32_1 = arith.constant 0 : i32
    return %c0_i32, %c0_i32_0 : i32, i32
  }
  func.func @transform_3(%arg0: i32) -> (i32, i32) {
    %c0_i32 = arith.constant 0 : i32
    %c0_i32_0 = arith.constant 0 : i32
    %c0_i32_1 = arith.constant 0 : i32
    return %c0_i32, %c0_i32_0 : i32, i32
  }
  func.func @transform_4(%arg0: i32) -> (i32, i32) {
    %c0_i32 = arith.constant 0 : i32
    %c0_i32_0 = arith.constant 0 : i32
    %c0_i32_1 = arith.constant 0 : i32
    return %c0_i32, %c0_i32_0 : i32, i32
  }
  func.func @transform_5(%arg0: i32) -> (i32, i32) {
    %c0_i32 = arith.constant 0 : i32
    %c0_i32_0 = arith.constant 0 : i32
    %c0_i32_1 = arith.constant 0 : i32
    return %c0_i32, %c0_i32_0 : i32, i32
  }
  func.func @transform_6(%arg0: i32) -> (i32, i32) {
    %c0_i32 = arith.constant 0 : i32
    %c0_i32_0 = arith.constant 0 : i32
    %c0_i32_1 = arith.constant 0 : i32
    return %c0_i32, %c0_i32_0 : i32, i32
  }
  func.func @transform_7(%arg0: i32) -> (i32, i32) {
    %c0_i32 = arith.constant 0 : i32
    %c0_i32_0 = arith.constant 0 : i32
    %c0_i32_1 = arith.constant 0 : i32
    return %c0_i32, %c0_i32_0 : i32, i32
  }
  func.func @transform_8(%arg0: i32) -> (i32, i32) {
    %c0_i32 = arith.constant 0 : i32
    %c0_i32_0 = arith.constant 0 : i32
    %c0_i32_1 = arith.constant 0 : i32
    return %c0_i32, %c0_i32_0 : i32, i32
  }
  func.func @transform_9(%arg0: i32) -> (i32, i32) {
    %c0_i32 = arith.constant 0 : i32
    %c0_i32_0 = arith.constant 0 : i32
    %c0_i32_1 = arith.constant 0 : i32
    return %c0_i32, %c0_i32_0 : i32, i32
  }
  func.func @transform_10(%arg0: i32) -> (i32, i32) {
    %c0_i32 = arith.constant 0 : i32
    %c0_i32_0 = arith.constant 0 : i32
    %c0_i32_1 = arith.constant 0 : i32
    return %c0_i32, %c0_i32_0 : i32, i32
  }
  func.func @transform_11(%arg0: i32) -> (i32, i32) {
    %c0_i32 = arith.constant 0 : i32
    %c0_i32_0 = arith.constant 0 : i32
    %c0_i32_1 = arith.constant 0 : i32
    return %c0_i32, %c0_i32_0 : i32, i32
  }
  func.func @transform_12(%arg0: i32) -> (i32, i32) {
    %c0_i32 = arith.constant 0 : i32
    %c0_i32_0 = arith.constant 0 : i32
    %c0_i32_1 = arith.constant 0 : i32
    return %c0_i32, %c0_i32_0 : i32, i32
  }
  func.func @transform_13(%arg0: i32) -> (i32, i32) {
    %c0_i32 = arith.constant 0 : i32
    %c0_i32_0 = arith.constant 0 : i32
    %c0_i32_1 = arith.constant 0 : i32
    return %c0_i32, %c0_i32_0 : i32, i32
  }
  func.func @transform_14(%arg0: i32) -> (i32, i32) {
    %c0_i32 = arith.constant 0 : i32
    %c0_i32_0 = arith.constant 0 : i32
    %c0_i32_1 = arith.constant 0 : i32
    return %c0_i32, %c0_i32_0 : i32, i32
  }
  func.func @transform_15(%arg0: i32) -> (i32, i32) {
    %c0_i32 = arith.constant 0 : i32
    %c0_i32_0 = arith.constant 0 : i32
    %c0_i32_1 = arith.constant 0 : i32
    return %c0_i32, %c0_i32_0 : i32, i32
  }
}

</mosaic_0001>

<bundles_post_ra>
// kernel: depthnet_forward.1
= control target key start
LH: loop header
LB: loop body
LE: loop exit
PB: predicated region body
PF: predicated region fallthrough
CT: control target
= control target key end

     0   :  { %s15331_s0 = inlined_call_operand.vmem [shape: bf16[80,3072], index: 0, kind: input, shape index: {}]   ;;  %s15332_s1 = inlined_call_operand.vmem [shape: bf16[3072,320], index: 1, kind: input, shape index: {}]   ;;  %s15333_s2 = inlined_call_operand.vmem [shape: f32[1,320], index: 2, kind: input, shape index: {}]   ;;  %s15334_s3 = inlined_call_operand.vmem [shape: bf16[320,256], index: 3, kind: input, shape index: {}]   ;;  %s15335_s4 = inlined_call_operand.vmem [shape: f32[1,256], index: 4, kind: input, shape index: {}]   ;;  %s15336_s5 = inlined_call_operand.vmem [shape: f32[60,1], index: 5, kind: input, shape index: {}]   ;;  %s15337_s6 = inlined_call_operand.vmem [shape: bf16[1,256], index: 6, kind: input, shape index: {}]   ;;  %s15338_s7 = inlined_call_operand.vmem [shape: bf16[60,256], index: 7, kind: input, shape index: {}]   ;;  %s15339_s8 = inlined_call_operand.vmem [shape: bf16[256,512], index: 8, kind: input, shape index: {}]   ;;  %s15340_s9 = inlined_call_operand.vmem [shape: bf16[256,64], index: 9, kind: input, shape index: {}]   ;;  %s15341_s10 = inlined_call_operand.vmem [shape: f32[1,64], index: 10, kind: input, shape index: {}]   ;;  %s15342_s11 = inlined_call_operand.vmem [shape: bf16[256,64], index: 11, kind: input, shape index: {}]   ;;  %s15343_s12 = inlined_call_operand.vmem [shape: f32[1,64], index: 12, kind: input, shape index: {}]   ;;  %s15344_s13 = inlined_call_operand.vmem [shape: f32[64,64], index: 13, kind: input, shape index: {}]   ;;  %s15345_s14 = inlined_call_operand.vmem [shape: f32[80,128], index: 14, kind: output, shape index: {0}]   ;;  %s15346_s15 = inlined_call_operand.hbm [shape: f32[1,128], index: 15, kind: output, shape index: {1}]  }
   0x1   :  { %v10441_v0 = vld [vmem:[%s15332_s1 + $0x4] ss:$12 sps:$4 sm:$0xff]   ;;  %v10443_v1 = vld [vmem:[%s15332_s1 + $0xc8] ss:$12 sps:$4 sm:$0xff]   ;;  %v10444_v2 = vld [vmem:[%s15332_s1] ss:$12 sps:$4 sm:$0xff]  }
   0x2   :  { %4628 = vmatprep.subr.bf16.mxu0 %v10441_v0  ;;  %9493 = vmatprep.subr.bf16.mxu1 %v10443_v1  ;;  %v10445_v3 = vld [vmem:[%s15332_s1 + $0x8] ss:$12 sps:$4 sm:$0xff]   ;;  %v10448_v5 = vld [vmem:[%s15332_s1 + $0xe0] ss:$12 sps:$4 sm:$0xff]   ;;  %v10449_v6 = vld [vmem:[%s15332_s1 + $0x18] ss:$12 sps:$4 sm:$0xff]  }
   0x3   :  { %4629 = vmatpush1.bf16.msra.mxu0 %v10444_v2  ;;  %v10446_v4 = vld [vmem:[%s15332_s1 + $0x1c] ss:$12 sps:$4 sm:$0xff]   ;;  %9494 = vmatpush3.bf16.msra.mxu1 %v10445_v3  ;;  %v10450_v7 = vld [vmem:[%s15332_s1 + $0x20] ss:$12 sps:$4 sm:$0xff]   ;;  %v10453_v9 = vld [vmem:[%s15332_s1 + $0xf8] ss:$12 sps:$4 sm:$0xff]  }
   0x4   :  { %4630 = vmatprep.subr.bf16.mxu0 %v10446_v4  ;;  %9495 = vmatprep.subr.bf16.mxu1 %v10448_v5  ;;  %v10451_v8 = vld [vmem:[%s15332_s1 + $0x34] ss:$12 sps:$4 sm:$0xff]   ;;  %v10454_v10 = vld [vmem:[%s15332_s1 + $0x30] ss:$12 sps:$4 sm:$0xff]   ;;  %v10455_v11 = vld [vmem:[%s15332_s1 + $0x38] ss:$12 sps:$4 sm:$0xff]  }
   0x5   :  { %v10456_v12 = vld [vmem:[%s15332_s1 + $0x4c] ss:$12 sps:$4 sm:$0xff]   ;;  %v10458_v13 = vld [vmem:[%s15332_s1 + $0x110] ss:$12 sps:$4 sm:$0xff]   ;;  %v10459_v14 = vld [vmem:[%s15332_s1 + $0x48] ss:$12 sps:$4 sm:$0xff]  }
   0x6   :  { %v10460_v15 = vld [vmem:[%s15332_s1 + $0x50] ss:$12 sps:$4 sm:$0xff]   ;;  %v10463_v17 = vld [vmem:[%s15332_s1 + $0x128] ss:$12 sps:$4 sm:$0xff]   ;;  %v10464_v18 = vld [vmem:[%s15332_s1 + $0x60] ss:$12 sps:$4 sm:$0xff]  }
   0x7   :  { %4631 = vmatpush1.bf16.msra.mxu0 %v10449_v6  ;;  %9496 = vmatpush3.bf16.msra.mxu1 %v10450_v7  ;;  %v10461_v16 = vld [vmem:[%s15332_s1 + $0x64] ss:$12 sps:$4 sm:$0xff]   ;;  %v10465_v19 = vld [vmem:[%s15332_s1 + $0x68] ss:$12 sps:$4 sm:$0xff]   ;;  %v10468_v21 = vld [vmem:[%s15332_s1 + $0x140] ss:$12 sps:$4 sm:$0xff]  }
   0x8   :  { %4632 = vmatprep.subr.bf16.mxu0 %v10451_v8  ;;  %9497 = vmatprep.subr.bf16.mxu1 %v10453_v9  ;;  %v10466_v20 = vld [vmem:[%s15332_s1 + $0x7c] ss:$12 sps:$4 sm:$0xff]   ;;  %v10469_v22 = vld [vmem:[%s15332_s1 + $0x78] ss:$12 sps:$4 sm:$0xff]   ;;  %v10470_v23 = vld [vmem:[%s15332_s1 + $0x80] ss:$12 sps:$4 sm:$0xff]  }
   0x9   :  { %v10471_v24 = vld [vmem:[%s15332_s1 + $0x94] ss:$12 sps:$4 sm:$0xff]   ;;  %v10473_v25 = vld [vmem:[%s15332_s1 + $0x158] ss:$12 sps:$4 sm:$0xff]   ;;  %v10474_v26 = vld [vmem:[%s15332_s1 + $0x90] ss:$12 sps:$4 sm:$0xff]  }
   0xa   :  { %v10475_v27 = vld [vmem:[%s15332_s1 + $0x98] ss:$12 sps:$4 sm:$0xff]   ;;  %v10478_v29 = vld [vmem:[%s15332_s1 + $0x170] ss:$12 sps:$4 sm:$0xff]   ;;  %v10479_v32 = vld [vmem:[%s15332_s1 + $0xa8] ss:$12 sps:$4 sm:$0xff]  }
   0xb   :  { %4633 = vmatpush1.bf16.msra.mxu0 %v10454_v10  ;;  %9498 = vmatpush3.bf16.msra.mxu1 %v10455_v11  ;;  %v10476_v28 = vld [vmem:[%s15332_s1 + $0xac] ss:$12 sps:$4 sm:$0xff]   ;;  %v51_v30 = vld [vmem:[%s15331_s0] sm:$0xff]  ;;  %v10480_v34 = vld [vmem:[%s15332_s1 + $0xb0] ss:$12 sps:$4 sm:$0xff]  }
   0xc   :  { %4634 = vmatprep.subr.bf16.mxu0 %v10456_v12  ;;  %9499 = vmatprep.subr.bf16.mxu1 %v10458_v13  ;;  %v63_v31 = vld [vmem:[%s15331_s0 + $0x60] sm:$0xff]  ;;  %v10489_v40 = vld [vmem:[%s15332_s1 + $0x248] ss:$12 sps:$4 sm:$0xff]   ;;  %v10490_v52 = vld [vmem:[%s15332_s1 + $0xf0] ss:$12 sps:$4 sm:$0xff]  }
   0xd   :  { %v8651_v33 = vcombine.high %v51_v30, %v63_v31  ;;  %v10481_v35 = vld [vmem:[%s15332_s1 + $0xc4] ss:$12 sps:$4 sm:$0xff]   ;;  %v11697_v38 = vcombine.low %v51_v30, %v63_v31  ;;  %v10483_v39 = vld [vmem:[%s15332_s1 + $0xc0] ss:$12 sps:$4 sm:$0xff]   ;;  %v10484_v41 = vld [vmem:[%s15332_s1 + $0xdc] ss:$12 sps:$4 sm:$0xff]  }
   0xe   :  { %v75_v36 = vld [vmem:[%s15331_s0 + $0xc0] sm:$0xff]  ;;  %v10491_v43 = vld [vmem:[%s15332_s1 + $0x188] ss:$12 sps:$4 sm:$0xff]   ;;  %v10492_v53 = vld [vmem:[%s15332_s1 + $0x10c] ss:$12 sps:$4 sm:$0xff]  }
   0xf   :  { %4635 = vmatpush1.bf16.msra.mxu0 %v10459_v14  ;;  %9500 = vmatpush3.bf16.msra.mxu1 %v10460_v15  ;;  %v87_v37 = vld [vmem:[%s15331_s0 + $0x120] sm:$0xff]  ;;  %v10495_v56 = vld [vmem:[%s15332_s1 + $0x108] ss:$12 sps:$4 sm:$0xff]   ;;  %v10504_v57 = vld [vmem:[%s15332_s1 + $0x290] ss:$12 sps:$4 sm:$0xff]  }
  0x10   :  { %4636 = vmatprep.subr.bf16.mxu0 %v10461_v16  ;;  %9501 = vmatprep.subr.bf16.mxu1 %v10463_v17  ;;  %v11708_v42 = vcombine.high %v75_v36, %v87_v37  ;;  %v10494_v44 = vld [vmem:[%s15332_s1 + $0x260] ss:$12 sps:$4 sm:$0xff]   ;;  %v10486_v45 = vld [vmem:[%s15332_s1 + $0xd8] ss:$12 sps:$4 sm:$0xff]   ;;  %v11736_v51 = vcombine.low %v75_v36, %v87_v37  ;;  %v10506_v59 = vld [vmem:[%s15332_s1 + $0x1d0] ss:$12 sps:$4 sm:$0xff]  }
  0x11   :  { %5656 = vmatprep.mubr.bf16.mxu1 %v8651_v33  ;;  %4660 = vmatprep.mubr.bf16.mxu0 %v8651_v33  ;;  %v10487_v46 = vld [vmem:[%s15332_s1 + $0xf4] ss:$12 sps:$4 sm:$0xff]   ;;  %v10499_v50 = vld [vmem:[%s15332_s1 + $0x278] ss:$12 sps:$4 sm:$0xff]   ;;  %v10502_v1 = vld [vmem:[%s15332_s1 + $0x13c] ss:$12 sps:$4 sm:$0xff]  }
  0x12   :  { %v10496_v47 = vld [vmem:[%s15332_s1 + $0x1a0] ss:$12 sps:$4 sm:$0xff]   ;;  %v10501_v55 = vld [vmem:[%s15332_s1 + $0x1b8] ss:$12 sps:$4 sm:$0xff]   ;;  %v10509_v62 = vld [vmem:[%s15332_s1 + $0x2a8] ss:$12 sps:$4 sm:$0xff]  }
  0x13   :  { %4637 = vmatpush1.bf16.msra.mxu0 %v10464_v18  ;;  %9502 = vmatpush3.bf16.msra.mxu1 %v10465_v19  ;;  %v99_v48 = vld [vmem:[%s15331_s0 + $0x180] sm:$0xff]  ;;  %v10511_v3 = vld [vmem:[%s15332_s1 + $0x1e8] ss:$12 sps:$4 sm:$0xff]   ;;  %v10510_v12 = vld [vmem:[%s15332_s1 + $0x150] ss:$12 sps:$4 sm:$0xff]  }
  0x14   :  { %4638 = vmatprep.subr.bf16.mxu0 %v10466_v20  ;;  %9503 = vmatprep.subr.bf16.mxu1 %v10468_v21  ;;  %v111_v49 = vld [vmem:[%s15331_s0 + $0x1e0] sm:$0xff]  ;;  %v10512_v13 = vld [vmem:[%s15332_s1 + $0x16c] ss:$12 sps:$4 sm:$0xff]   ;;  %v10525_v16 = vld [vmem:[%s15332_s1 + $0x2f0] ss:$12 sps:$4 sm:$0xff]  }
  0x15   :  { %v11744_v54 = vcombine.high %v99_v48, %v111_v49  ;;  %v10497_v58 = vld [vmem:[%s15332_s1 + $0x124] ss:$12 sps:$4 sm:$0xff]   ;;  %v11772_v63 = vcombine.low %v99_v48, %v111_v49  ;;  %v10500_v0 = vld [vmem:[%s15332_s1 + $0x120] ss:$12 sps:$4 sm:$0xff]   ;;  %v10515_v17 = vld [vmem:[%s15332_s1 + $0x168] ss:$12 sps:$4 sm:$0xff]  }
  0x16   :  { %v123_v60 = vld [vmem:[%s15331_s0 + $0x240] sm:$0xff]  ;;  %v10526_v19 = vld [vmem:[%s15332_s1 + $0x230] ss:$12 sps:$4 sm:$0xff]   ;;  %v52_v20 = vld [vmem:[%s15331_s0 + $0x8] sm:$0xff] }
  0x17   :  { %4639 = vmatpush1.bf16.msra.mxu0 %v10469_v22  ;;  %9504 = vmatpush3.bf16.msra.mxu1 %v10470_v23  ;;  %v135_v61 = vld [vmem:[%s15331_s0 + $0x2a0] sm:$0xff]  ;;  %v64_v21 = vld [vmem:[%s15331_s0 + $0x68] sm:$0xff]  ;;  %v10551_v48 = vld [vmem:[%s15332_s1 + $0x410] ss:$12 sps:$4 sm:$0xff]  }
  0x18   :  { %4640 = vmatprep.subr.bf16.mxu0 %v10471_v24  ;;  %9505 = vmatprep.subr.bf16.mxu1 %v10473_v25  ;;  %v11780_v2 = vcombine.high %v123_v60, %v135_v61  ;;  %v10514_v4 = vld [vmem:[%s15332_s1 + $0x2c0] ss:$12 sps:$4 sm:$0xff]   ;;  %v10505_v5 = vld [vmem:[%s15332_s1 + $0x138] ss:$12 sps:$4 sm:$0xff]   ;;  %v11808_v11 = vcombine.low %v123_v60, %v135_v61  ;;  %v10524_v24 = vld [vmem:[%s15332_s1 + $0x19c] ss:$12 sps:$4 sm:$0xff]   ;;  %v11849_v25 = vcombine.high %v52_v20, %v64_v21 }
  0x19   :  { %v10507_v6 = vld [vmem:[%s15332_s1 + $0x154] ss:$12 sps:$4 sm:$0xff]   ;;  %v10520_v10 = vld [vmem:[%s15332_s1 + $0x2d8] ss:$12 sps:$4 sm:$0xff]   ;;  %v88_v30 = vld [vmem:[%s15331_s0 + $0x128] sm:$0xff]  ;;  %v11870_v31 = vcombine.low %v52_v20, %v64_v21 }
  0x1a   :  { %v10516_v7 = vld [vmem:[%s15332_s1 + $0x200] ss:$12 sps:$4 sm:$0xff]   ;;  %v10521_v15 = vld [vmem:[%s15332_s1 + $0x218] ss:$12 sps:$4 sm:$0xff]   ;;  %v10530_v37 = vld [vmem:[%s15332_s1 + $0x1c8] ss:$12 sps:$4 sm:$0xff]  }
  0x1b   :  { %4641 = vmatpush1.bf16.msra.mxu0 %v10474_v26  ;;  %9506 = vmatpush3.bf16.msra.mxu1 %v10475_v27  ;;  %v147_v8 = vld [vmem:[%s15331_s0 + $0x300] sm:$0xff]  ;;  %v10536_v26 = vld [vmem:[%s15332_s1 + $0x3c8] ss:$12 sps:$4 sm:$0xff]   ;;  %v10532_v33 = vld [vmem:[%s15332_s1 + $0x1cc] ss:$12 sps:$4 sm:$0xff]  }
  0x1c   :  { %4642 = vmatprep.subr.bf16.mxu0 %v10476_v28  ;;  %9507 = vmatprep.subr.bf16.mxu1 %v10478_v29  ;;  %v159_v9 = vld [vmem:[%s15331_s0 + $0x360] sm:$0xff]  ;;  %v76_v29 = vld [vmem:[%s15331_s0 + $0xc8] sm:$0xff]  ;;  %v77_v21 = vld [vmem:[%s15331_s0 + $0xd0] sm:$0xff] }
  0x1d   :  { %v11816_v14 = vcombine.high %v147_v8, %v159_v9  ;;  %v10519_v18 = vld [vmem:[%s15332_s1 + $0x184] ss:$12 sps:$4 sm:$0xff]   ;;  %v10517_v22 = vld [vmem:[%s15332_s1 + $0x180] ss:$12 sps:$4 sm:$0xff]   ;;  %v11844_v23 = vcombine.low %v147_v8, %v159_v9  ;;  %v10548_v61 = vld [vmem:[%s15332_s1 + $0x228] ss:$12 sps:$4 sm:$0xff]  }
  0x1e   :  { %v10522_v27 = vld [vmem:[%s15332_s1 + $0x198] ss:$12 sps:$4 sm:$0xff]   ;;  %v10529_v28 = vld [vmem:[%s15332_s1 + $0x1b4] ss:$12 sps:$4 sm:$0xff]   ;;  %v10571_v8 = vld [vmem:[%s15332_s1 + $0x470] ss:$12 sps:$4 sm:$0xff]  }
  0x1f   :  { %4643 = vmatpush1.bf16.msra.mxu0 %v10479_v32  ;;  %9508 = vmatpush3.bf16.msra.mxu1 %v10480_v34  ;;  %v10527_v32 = vld [vmem:[%s15332_s1 + $0x1b0] ss:$12 sps:$4 sm:$0xff]   ;;  %v11878_v34 = vcombine.high %v76_v29, %v88_v30  ;;  %v10541_v36 = vld [vmem:[%s15332_s1 + $0x3e0] ss:$12 sps:$4 sm:$0xff]   ;;  %v10538_v49 = vld [vmem:[%s15332_s1 + $0x1f8] ss:$12 sps:$4 sm:$0xff]  }
  0x20   :  { %4644 = vmatprep.subr.bf16.mxu0 %v10481_v35  ;;  %9539 = vmatprep.subr.bf16.mxu1 %v10489_v40  ;;  %v10537_v35 = vld [vmem:[%s15332_s1 + $0x308] ss:$12 sps:$4 sm:$0xff]   ;;  %v10561_v60 = vld [vmem:[%s15332_s1 + $0x440] ss:$12 sps:$4 sm:$0xff]   ;;  %v10558_v9 = vld [vmem:[%s15332_s1 + $0x258] ss:$12 sps:$4 sm:$0xff]  }
  0x21   :  { %v100_v40 = vld [vmem:[%s15331_s0 + $0x188] sm:$0xff]  ;;  %v10575_v20 = vld [vmem:[%s15332_s1 + $0x2a4] ss:$12 sps:$4 sm:$0xff]  }
  0x22   :  { %5657 = vmatmul.mubr.bf16.vlgmr.msra.gmra.mrb[0].mxu1 %v11697_v38 }
  0x23   :  { %4645 = vmatpush1.bf16.msra.mxu0 %v10483_v39  ;;  %5664 = vmatprep.mubr.bf16.mxu1 %v11708_v42  ;;  %v10542_v39 = vld [vmem:[%s15332_s1 + $0x320] ss:$12 sps:$4 sm:$0xff]  }
  0x24   :  { %4646 = vmatprep.subr.bf16.mxu0 %v10484_v41  ;;  %9540 = vmatpush3.bf16.msra.mxu1 %v10491_v43  ;;  %v112_v41 = vld [vmem:[%s15331_s0 + $0x1e8] sm:$0xff] }
  0x25   :  { %9541 = vmatprep.subr.bf16.mxu1 %v10494_v44  ;;  %v10533_v43 = vld [vmem:[%s15332_s1 + $0x1e0] ss:$12 sps:$4 sm:$0xff]   ;;  %v11911_v44 = vcombine.low %v76_v29, %v88_v30  ;;  %v10576_v29 = vld [vmem:[%s15332_s1 + $0x2b8] ss:$12 sps:$4 sm:$0xff]  }
  0x26   :  { %v10581_v30 = vld [vmem:[%s15332_s1 + $0x2d4] ss:$12 sps:$4 sm:$0xff]  }
  0x27   :  { %4647 = vmatpush1.bf16.msra.mxu0 %v10486_v45  ;;  %v10540_v45 = vld [vmem:[%s15332_s1 + $0x1fc] ss:$12 sps:$4 sm:$0xff]  }
  0x28   :  { %4648 = vmatprep.subr.bf16.mxu0 %v10487_v46  ;;  %9542 = vmatpush3.bf16.msra.mxu1 %v10496_v47  ;;  %v11916_v46 = vcombine.high %v100_v40, %v112_v41  ;;  %v10547_v47 = vld [vmem:[%s15332_s1 + $0x338] ss:$12 sps:$4 sm:$0xff]  }
  0x29   :  { %9543 = vmatprep.subr.bf16.mxu1 %v10499_v50  ;;  %v10545_v50 = vld [vmem:[%s15332_s1 + $0x214] ss:$12 sps:$4 sm:$0xff]  }
  0x2a   :  { %5665 = vmatmul.mubr.bf16.gmra.mrb[4].mxu1 %v11736_v51 }
  0x2b   :  { %4649 = vmatpush1.bf16.msra.mxu0 %v10490_v52  ;;  %5672 = vmatprep.mubr.bf16.mxu1 %v11744_v54  ;;  %v124_v52 = vld [vmem:[%s15331_s0 + $0x248] sm:$0xff] }
  0x2c   :  { %4650 = vmatprep.subr.bf16.mxu0 %v10492_v53  ;;  %9544 = vmatpush3.bf16.msra.mxu1 %v10501_v55  ;;  %v136_v53 = vld [vmem:[%s15331_s0 + $0x2a8] sm:$0xff]  ;;  %v10543_v55 = vld [vmem:[%s15332_s1 + $0x210] ss:$12 sps:$4 sm:$0xff]  }
  0x2d   :  { %9545 = vmatprep.subr.bf16.mxu1 %v10504_v57  ;;  %v10550_v57 = vld [vmem:[%s15332_s1 + $0x22c] ss:$12 sps:$4 sm:$0xff]  }
  0x2f   :  { %4651 = vmatpush1.bf16.msra.mxu0 %v10495_v56  ;;  %v11949_v56 = vcombine.low %v100_v40, %v112_v41  ;;  %v10593_v41 = vld [vmem:[%s15332_s1 + $0x4b8] ss:$12 sps:$4 sm:$0xff]  }
  0x30   :  { %4652 = vmatprep.subr.bf16.mxu0 %v10497_v58  ;;  %9546 = vmatpush3.bf16.msra.mxu1 %v10506_v59  ;;  %v11954_v58 = vcombine.high %v124_v52, %v136_v53  ;;  %v10557_v59 = vld [vmem:[%s15332_s1 + $0x368] ss:$12 sps:$4 sm:$0xff]  }
  0x31   :  { %9547 = vmatprep.subr.bf16.mxu1 %v10509_v62  ;;  %v10555_v62 = vld [vmem:[%s15332_s1 + $0x244] ss:$12 sps:$4 sm:$0xff]  }
  0x32   :  { %5673 = vmatmul.mubr.bf16.gmra.mrb[8].mxu1 %v11772_v63 }
  0x33   :  { %4653 = vmatpush1.bf16.msra.mxu0 %v10500_v0  ;;  %5680 = vmatprep.mubr.bf16.mxu1 %v11780_v2  ;;  %v148_v0 = vld [vmem:[%s15331_s0 + $0x308] sm:$0xff] }
  0x34   :  { %4654 = vmatprep.subr.bf16.mxu0 %v10502_v1  ;;  %9548 = vmatpush3.bf16.msra.mxu1 %v10511_v3  ;;  %v160_v1 = vld [vmem:[%s15331_s0 + $0x368] sm:$0xff] }
  0x35   :  { %9549 = vmatprep.subr.bf16.mxu1 %v10514_v4  ;;  %v10553_v3 = vld [vmem:[%s15332_s1 + $0x240] ss:$12 sps:$4 sm:$0xff]   ;;  %v11987_v4 = vcombine.low %v124_v52, %v136_v53  ;;  %v10596_v53 = vld [vmem:[%s15332_s1 + $0x31c] ss:$12 sps:$4 sm:$0xff]  }
  0x37   :  { %4655 = vmatpush1.bf16.msra.mxu0 %v10505_v5  ;;  %v10560_v5 = vld [vmem:[%s15332_s1 + $0x25c] ss:$12 sps:$4 sm:$0xff]  }
  0x38   :  { %4656 = vmatprep.subr.bf16.mxu0 %v10507_v6  ;;  %9550 = vmatpush3.bf16.msra.mxu1 %v10516_v7  ;;  %v11992_v6 = vcombine.high %v148_v0, %v160_v1  ;;  %v10567_v7 = vld [vmem:[%s15332_s1 + $0x398] ss:$12 sps:$4 sm:$0xff]  }
  0x39   :  { %9551 = vmatprep.subr.bf16.mxu1 %v10520_v10  ;;  %v10565_v10 = vld [vmem:[%s15332_s1 + $0x274] ss:$12 sps:$4 sm:$0xff]  }
  0x3a   :  { %5681 = vmatmul.mubr.bf16.gmra.mrb[12].mxu1 %v11808_v11 }
  0x3b   :  { %4657 = vmatpush1.bf16.msra.mxu0 %v10510_v12  ;;  %5688 = vmatprep.mubr.bf16.mxu1 %v11816_v14  ;;  %v53_v12 = vld [vmem:[%s15331_s0 + $0x10] sm:$0xff] }
  0x3c   :  { %4658 = vmatprep.subr.bf16.mxu0 %v10512_v13  ;;  %9552 = vmatpush3.bf16.msra.mxu1 %v10521_v15  ;;  %v65_v13 = vld [vmem:[%s15331_s0 + $0x70] sm:$0xff] }
  0x3d   :  { %9553 = vmatprep.subr.bf16.mxu1 %v10525_v16  ;;  %v10563_v15 = vld [vmem:[%s15332_s1 + $0x270] ss:$12 sps:$4 sm:$0xff]   ;;  %v12025_v16 = vcombine.low %v148_v0, %v160_v1 }
  0x3e   :  { %v10599_v0 = vld [vmem:[%s15332_s1 + $0x330] ss:$12 sps:$4 sm:$0xff]  }
  0x3f   :  { %4659 = vmatpush1.bf16.msra.mxu0 %v10515_v17  ;;  %v10570_v17 = vld [vmem:[%s15332_s1 + $0x28c] ss:$12 sps:$4 sm:$0xff]  }
  0x40   :  { %4711 = vmatprep.subr.bf16.mxu0 %v10519_v18  ;;  %9554 = vmatpush3.bf16.msra.mxu1 %v10526_v19  ;;  %v12030_v18 = vcombine.high %v53_v12, %v65_v13  ;;  %v10568_v19 = vld [vmem:[%s15332_s1 + $0x288] ss:$12 sps:$4 sm:$0xff]  }
  0x41   :  { %9585 = vmatprep.subr.bf16.mxu1 %v10536_v26 }
  0x42   :  { %4661 = vmatmul.mubr.bf16.vlgmr.msra.gmra.mrb[0].mxu0 %v11697_v38  ;;  %5689 = vmatmul.mubr.bf16.gmra.mrb[16].mxu1 %v11844_v23  ;;  %v10535_v38 = vld [vmem:[%s15332_s1 + $0x1e4] ss:$12 sps:$4 sm:$0xff]  }
  0x43   :  { %4712 = vmatpush1.bf16.msra.mxu0 %v10517_v22  ;;  %5729 = vmatprep.mubr.bf16.mxu1 %v11849_v25  ;;  %v89_v22 = vld [vmem:[%s15331_s0 + $0x130] sm:$0xff] }
  0x44   :  { %4713 = vmatprep.subr.bf16.mxu0 %v10524_v24  ;;  %4670 = vmatprep.mubr.bf16.mxu0 %v11708_v42  ;;  %v10546_v42 = vld [vmem:[%s15332_s1 + $0x3f8] ss:$12 sps:$4 sm:$0xff]   ;;  %v10573_v24 = vld [vmem:[%s15332_s1 + $0x2a0] ss:$12 sps:$4 sm:$0xff]   ;;  %v12054_v26 = vcombine.high %v77_v21, %v89_v22 }
  0x47   :  { %4714 = vmatpush1.bf16.msra.mxu0 %v10522_v27  ;;  %v10583_v27 = vld [vmem:[%s15332_s1 + $0x488] ss:$12 sps:$4 sm:$0xff]  }
  0x48   :  { %4715 = vmatprep.subr.bf16.mxu0 %v10529_v28  ;;  %v10587_v28 = vld [vmem:[%s15332_s1 + $0x560] ss:$12 sps:$4 sm:$0xff]  }
  0x4a   :  { %4671 = vmatmul.mubr.bf16.gmra.mrb[4].mxu0 %v11736_v51  ;;  %5730 = vmatmul.mubr.bf16.vlgmr.msra.gmra.mrb[20].mxu1 %v11870_v31  ;;  %v10552_v51 = vld [vmem:[%s15332_s1 + $0x350] ss:$12 sps:$4 sm:$0xff]  }
  0x4b   :  { %4716 = vmatpush1.bf16.msra.mxu0 %v10527_v32  ;;  %5737 = vmatprep.mubr.bf16.mxu1 %v11878_v34  ;;  %v10588_v32 = vld [vmem:[%s15332_s1 + $0x4a0] ss:$12 sps:$4 sm:$0xff]  }
  0x4c   :  { %4717 = vmatprep.subr.bf16.mxu0 %v10532_v33  ;;  %9586 = vmatpush3.bf16.msra.mxu1 %v10537_v35  ;;  %v101_v33 = vld [vmem:[%s15331_s0 + $0x190] sm:$0xff] }
  0x4d   :  { %4680 = vmatprep.mubr.bf16.mxu0 %v11744_v54  ;;  %9587 = vmatprep.subr.bf16.mxu1 %v10541_v36  ;;  %v10556_v54 = vld [vmem:[%s15332_s1 + $0x428] ss:$12 sps:$4 sm:$0xff]   ;;  %v10592_v36 = vld [vmem:[%s15332_s1 + $0x578] ss:$12 sps:$4 sm:$0xff]  }
  0x4e   :  { %v113_v35 = vld [vmem:[%s15331_s0 + $0x1f0] sm:$0xff] }
  0x4f   :  { %4718 = vmatpush1.bf16.msra.mxu0 %v10530_v37  ;;  %v10579_v37 = vld [vmem:[%s15332_s1 + $0x2d0] ss:$12 sps:$4 sm:$0xff]   ;;  %v12090_v40 = vcombine.high %v101_v33, %v113_v35  ;;  %v12121_v52 = vcombine.low %v101_v33, %v113_v35  ;;  %v10625_v33 = vld [vmem:[%s15332_s1 + $0x3c0] ss:$12 sps:$4 sm:$0xff]  }
  0x50   :  { %4719 = vmatprep.subr.bf16.mxu0 %v10535_v38  ;;  %9588 = vmatpush3.bf16.msra.mxu1 %v10542_v39  ;;  %v12085_v38 = vcombine.low %v77_v21, %v89_v22  ;;  %v10586_v39 = vld [vmem:[%s15332_s1 + $0x2ec] ss:$12 sps:$4 sm:$0xff]   ;;  %v10619_v21 = vld [vmem:[%s15332_s1 + $0x390] ss:$12 sps:$4 sm:$0xff]  }
  0x51   :  { %9589 = vmatprep.subr.bf16.mxu1 %v10546_v42  ;;  %v10597_v42 = vld [vmem:[%s15332_s1 + $0x590] ss:$12 sps:$4 sm:$0xff]   ;;  %v10624_v22 = vld [vmem:[%s15332_s1 + $0x3ac] ss:$12 sps:$4 sm:$0xff]  }
  0x52   :  { %4681 = vmatmul.mubr.bf16.gmra.mrb[8].mxu0 %v11772_v63  ;;  %5738 = vmatmul.mubr.bf16.gmra.mrb[24].mxu1 %v11911_v44  ;;  %v10562_v63 = vld [vmem:[%s15332_s1 + $0x380] ss:$12 sps:$4 sm:$0xff]  }
  0x53   :  { %4720 = vmatpush1.bf16.msra.mxu0 %v10533_v43  ;;  %5745 = vmatprep.mubr.bf16.mxu1 %v11916_v46  ;;  %v10584_v43 = vld [vmem:[%s15332_s1 + $0x2e8] ss:$12 sps:$4 sm:$0xff]  }
  0x54   :  { %4721 = vmatprep.subr.bf16.mxu0 %v10540_v45  ;;  %9590 = vmatpush3.bf16.msra.mxu1 %v10547_v47  ;;  %v10591_v45 = vld [vmem:[%s15332_s1 + $0x304] ss:$12 sps:$4 sm:$0xff]  }
  0x55   :  { %4690 = vmatprep.mubr.bf16.mxu0 %v11780_v2  ;;  %9591 = vmatprep.subr.bf16.mxu1 %v10551_v48  ;;  %v10566_v2 = vld [vmem:[%s15332_s1 + $0x458] ss:$12 sps:$4 sm:$0xff]   ;;  %v10598_v47 = vld [vmem:[%s15332_s1 + $0x4d0] ss:$12 sps:$4 sm:$0xff]  }
  0x56   :  { %v125_v48 = vld [vmem:[%s15331_s0 + $0x250] sm:$0xff] }
  0x57   :  { %4722 = vmatpush1.bf16.msra.mxu0 %v10538_v49  ;;  %v137_v49 = vld [vmem:[%s15331_s0 + $0x2b0] sm:$0xff] }
  0x58   :  { %4723 = vmatprep.subr.bf16.mxu0 %v10545_v50  ;;  %9592 = vmatpush3.bf16.msra.mxu1 %v10552_v51  ;;  %v10602_v50 = vld [vmem:[%s15332_s1 + $0x5a8] ss:$12 sps:$4 sm:$0xff]   ;;  %v10589_v51 = vld [vmem:[%s15332_s1 + $0x300] ss:$12 sps:$4 sm:$0xff]   ;;  %v12159_v1 = vcombine.low %v125_v48, %v137_v49 }
  0x59   :  { %9593 = vmatprep.subr.bf16.mxu1 %v10556_v54  ;;  %v12126_v54 = vcombine.high %v125_v48, %v137_v49  ;;  %v10635_v48 = vld [vmem:[%s15332_s1 + $0x3f0] ss:$12 sps:$4 sm:$0xff]  }
  0x5a   :  { %4691 = vmatmul.mubr.bf16.gmra.mrb[12].mxu0 %v11808_v11  ;;  %5746 = vmatmul.mubr.bf16.gmra.mrb[28].mxu1 %v11949_v56  ;;  %v10572_v11 = vld [vmem:[%s15332_s1 + $0x3b0] ss:$12 sps:$4 sm:$0xff]  }
  0x5b   :  { %4724 = vmatpush1.bf16.msra.mxu0 %v10543_v55  ;;  %5753 = vmatprep.mubr.bf16.mxu1 %v11954_v58  ;;  %v10594_v55 = vld [vmem:[%s15332_s1 + $0x318] ss:$12 sps:$4 sm:$0xff]  }
  0x5c   :  { %4725 = vmatprep.subr.bf16.mxu0 %v10550_v57  ;;  %9594 = vmatpush3.bf16.msra.mxu1 %v10557_v59  ;;  %v10603_v57 = vld [vmem:[%s15332_s1 + $0x4e8] ss:$12 sps:$4 sm:$0xff]  }
  0x5d   :  { %4700 = vmatprep.mubr.bf16.mxu0 %v11816_v14  ;;  %9595 = vmatprep.subr.bf16.mxu1 %v10561_v60  ;;  %v10582_v14 = vld [vmem:[%s15332_s1 + $0x548] ss:$12 sps:$4 sm:$0xff]   ;;  %v10607_v60 = vld [vmem:[%s15332_s1 + $0x5c0] ss:$12 sps:$4 sm:$0xff]  }
  0x5e   :  { %v10601_v59 = vld [vmem:[%s15332_s1 + $0x334] ss:$12 sps:$4 sm:$0xff]  }
  0x5f   :  { %4726 = vmatpush1.bf16.msra.mxu0 %v10548_v61  ;;  %v10608_v61 = vld [vmem:[%s15332_s1 + $0x500] ss:$12 sps:$4 sm:$0xff]  }
  0x60   :  { %4727 = vmatprep.subr.bf16.mxu0 %v10555_v62  ;;  %9596 = vmatpush3.bf16.msra.mxu1 %v10562_v63  ;;  %v161_v62 = vld [vmem:[%s15331_s0 + $0x370] sm:$0xff]  ;;  %v10612_v63 = vld [vmem:[%s15332_s1 + $0x5d8] ss:$12 sps:$4 sm:$0xff]  }
  0x61   :  { %9597 = vmatprep.subr.bf16.mxu1 %v10566_v2  ;;  %v10606_v2 = vld [vmem:[%s15332_s1 + $0x34c] ss:$12 sps:$4 sm:$0xff]  }
  0x62   :  { %4701 = vmatmul.mubr.bf16.gmra.mrb[16].mxu0 %v11844_v23  ;;  %5754 = vmatmul.mubr.bf16.gmra.mrb[32].mxu1 %v11987_v4  ;;  %v12046_v23 = vcombine.low %v53_v12, %v65_v13  ;;  %v10609_v12 = vld [vmem:[%s15332_s1 + $0x360] ss:$12 sps:$4 sm:$0xff]  }
  0x63   :  { %4728 = vmatpush1.bf16.msra.mxu0 %v10553_v3  ;;  %5761 = vmatprep.mubr.bf16.mxu1 %v11992_v6 }
  0x64   :  { %4729 = vmatprep.subr.bf16.mxu0 %v10560_v5  ;;  %9598 = vmatpush3.bf16.msra.mxu1 %v10567_v7  ;;  %v10617_v5 = vld [vmem:[%s15332_s1 + $0x5f0] ss:$12 sps:$4 sm:$0xff]   ;;  %v10604_v7 = vld [vmem:[%s15332_s1 + $0x348] ss:$12 sps:$4 sm:$0xff]  }
  0x65   :  { %4743 = vmatprep.mubr.bf16.mxu0 %v11849_v25  ;;  %9599 = vmatprep.subr.bf16.mxu1 %v10571_v8  ;;  %v10578_v25 = vld [vmem:[%s15332_s1 + $0x2bc] ss:$12 sps:$4 sm:$0xff]   ;;  %v10611_v8 = vld [vmem:[%s15332_s1 + $0x364] ss:$12 sps:$4 sm:$0xff]  }
  0x67   :  { %4730 = vmatpush1.bf16.msra.mxu0 %v10558_v9  ;;  %v10618_v9 = vld [vmem:[%s15332_s1 + $0x530] ss:$12 sps:$4 sm:$0xff]  }
  0x68   :  { %4731 = vmatprep.subr.bf16.mxu0 %v10565_v10  ;;  %9600 = vmatpush3.bf16.msra.mxu1 %v10572_v11  ;;  %v66_v10 = vld [vmem:[%s15331_s0 + $0x78] sm:$0xff]  ;;  %v10628_v11 = vld [vmem:[%s15332_s1 + $0x6c8] ss:$12 sps:$4 sm:$0xff]  }
  0x69   :  { %9631 = vmatprep.subr.bf16.mxu1 %v10582_v14  ;;  %v10616_v14 = vld [vmem:[%s15332_s1 + $0x37c] ss:$12 sps:$4 sm:$0xff]  }
  0x6a   :  { %5762 = vmatmul.mubr.bf16.gmra.mrb[36].mxu1 %v12025_v16 }
  0x6b   :  { %4732 = vmatpush1.bf16.msra.mxu0 %v10563_v15  ;;  %5802 = vmatprep.mubr.bf16.mxu1 %v12030_v18 }
  0x6c   :  { %4733 = vmatprep.subr.bf16.mxu0 %v10570_v17  ;;  %v10621_v17 = vld [vmem:[%s15332_s1 + $0x394] ss:$12 sps:$4 sm:$0xff]  }
  0x6f   :  { %4734 = vmatpush1.bf16.msra.mxu0 %v10568_v19  ;;  %v78_v19 = vld [vmem:[%s15331_s0 + $0xd8] sm:$0xff] }
  0x70   :  { %4735 = vmatprep.subr.bf16.mxu0 %v10575_v20 }
  0x72   :  { %5803 = vmatmul.mubr.bf16.vlgmr.msra.gmra.mrb[40].mxu1 %v12046_v23 }
  0x73   :  { %4736 = vmatpush1.bf16.msra.mxu0 %v10573_v24  ;;  %5810 = vmatprep.mubr.bf16.mxu1 %v12054_v26 }
  0x74   :  { %4737 = vmatprep.subr.bf16.mxu0 %v10578_v25  ;;  %9632 = vmatpush3.bf16.msra.mxu1 %v10583_v27  ;;  %v10629_v25 = vld [vmem:[%s15332_s1 + $0x608] ss:$12 sps:$4 sm:$0xff]  }
  0x75   :  { %9633 = vmatprep.subr.bf16.mxu1 %v10587_v28  ;;  %v10622_v27 = vld [vmem:[%s15332_s1 + $0x3a8] ss:$12 sps:$4 sm:$0xff]   ;;  %v10627_v28 = vld [vmem:[%s15332_s1 + $0x3c4] ss:$12 sps:$4 sm:$0xff]  }
  0x77   :  { %4738 = vmatpush1.bf16.msra.mxu0 %v10576_v29  ;;  %v10634_v29 = vld [vmem:[%s15332_s1 + $0x620] ss:$12 sps:$4 sm:$0xff]  }
  0x78   :  { %4739 = vmatprep.subr.bf16.mxu0 %v10581_v30  ;;  %9634 = vmatpush3.bf16.msra.mxu1 %v10588_v32  ;;  %v114_v30 = vld [vmem:[%s15331_s0 + $0x1f8] sm:$0xff] }
  0x79   :  { %9635 = vmatprep.subr.bf16.mxu1 %v10592_v36  ;;  %v10638_v32 = vld [vmem:[%s15332_s1 + $0x6f8] ss:$12 sps:$4 sm:$0xff]   ;;  %v10632_v36 = vld [vmem:[%s15332_s1 + $0x3dc] ss:$12 sps:$4 sm:$0xff]  }
  0x7a   :  { %5811 = vmatmul.mubr.bf16.gmra.mrb[44].mxu1 %v12085_v38 }
  0x7b   :  { %4740 = vmatpush1.bf16.msra.mxu0 %v10579_v37  ;;  %5818 = vmatprep.mubr.bf16.mxu1 %v12090_v40 }
  0x7c   :  { %4741 = vmatprep.subr.bf16.mxu0 %v10586_v39  ;;  %9636 = vmatpush3.bf16.msra.mxu1 %v10593_v41  ;;  %v10639_v39 = vld [vmem:[%s15332_s1 + $0x638] ss:$12 sps:$4 sm:$0xff]   ;;  %v10643_v41 = vld [vmem:[%s15332_s1 + $0x710] ss:$12 sps:$4 sm:$0xff]  }
  0x7d   :  { %9637 = vmatprep.subr.bf16.mxu1 %v10597_v42  ;;  %v10637_v42 = vld [vmem:[%s15332_s1 + $0x3f4] ss:$12 sps:$4 sm:$0xff]  }
  0x7f   :  { %4742 = vmatpush1.bf16.msra.mxu0 %v10584_v43  ;;  %v10644_v43 = vld [vmem:[%s15332_s1 + $0x650] ss:$12 sps:$4 sm:$0xff]  }
  0x80   :  { %4794 = vmatprep.subr.bf16.mxu0 %v10591_v45  ;;  %9638 = vmatpush3.bf16.msra.mxu1 %v10598_v47  ;;  %v126_v45 = vld [vmem:[%s15331_s0 + $0x258] sm:$0xff]  ;;  %v10648_v47 = vld [vmem:[%s15332_s1 + $0x728] ss:$12 sps:$4 sm:$0xff]  }
  0x81   :  { %9639 = vmatprep.subr.bf16.mxu1 %v10602_v50  ;;  %v10642_v50 = vld [vmem:[%s15332_s1 + $0x40c] ss:$12 sps:$4 sm:$0xff]  }
  0x82   :  { %4744 = vmatmul.mubr.bf16.vlgmr.msra.gmra.mrb[0].mxu0 %v11870_v31  ;;  %5819 = vmatmul.mubr.bf16.gmra.mrb[48].mxu1 %v12121_v52  ;;  %v149_v31 = vld [vmem:[%s15331_s0 + $0x310] sm:$0xff] }
  0x83   :  { %4795 = vmatpush1.bf16.msra.mxu0 %v10589_v51  ;;  %5826 = vmatprep.mubr.bf16.mxu1 %v12126_v54  ;;  %v12164_v3 = vcombine.high %v149_v31, %v161_v62  ;;  %v12197_v13 = vcombine.low %v149_v31, %v161_v62  ;;  %v10658_v31 = vld [vmem:[%s15332_s1 + $0x758] ss:$12 sps:$4 sm:$0xff]   ;;  %v10645_v62 = vld [vmem:[%s15332_s1 + $0x420] ss:$12 sps:$4 sm:$0xff]  }
  0x84   :  { %4796 = vmatprep.subr.bf16.mxu0 %v10596_v53  ;;  %9640 = vmatpush3.bf16.msra.mxu1 %v10603_v57  ;;  %v10649_v53 = vld [vmem:[%s15332_s1 + $0x668] ss:$12 sps:$4 sm:$0xff]   ;;  %v10653_v57 = vld [vmem:[%s15332_s1 + $0x740] ss:$12 sps:$4 sm:$0xff]  }
  0x85   :  { %4753 = vmatprep.mubr.bf16.mxu0 %v11878_v34  ;;  %9641 = vmatprep.subr.bf16.mxu1 %v10607_v60  ;;  %v10613_v34 = vld [vmem:[%s15332_s1 + $0x518] ss:$12 sps:$4 sm:$0xff]  }
  0x86   :  { %v150_v60 = vld [vmem:[%s15331_s0 + $0x318] sm:$0xff] }
  0x87   :  { %4797 = vmatpush1.bf16.msra.mxu0 %v10594_v55  ;;  %v10647_v55 = vld [vmem:[%s15332_s1 + $0x424] ss:$12 sps:$4 sm:$0xff]  }
  0x88   :  { %4798 = vmatprep.subr.bf16.mxu0 %v10601_v59  ;;  %9642 = vmatpush3.bf16.msra.mxu1 %v10608_v61  ;;  %v10654_v59 = vld [vmem:[%s15332_s1 + $0x680] ss:$12 sps:$4 sm:$0xff]   ;;  %v162_v61 = vld [vmem:[%s15331_s0 + $0x378] sm:$0xff] }
  0x89   :  { %9643 = vmatprep.subr.bf16.mxu1 %v10612_v63 }
  0x8a   :  { %4754 = vmatmul.mubr.bf16.gmra.mrb[4].mxu0 %v11911_v44  ;;  %5827 = vmatmul.mubr.bf16.gmra.mrb[52].mxu1 %v12159_v1  ;;  %v54_v44 = vld [vmem:[%s15331_s0 + $0x18] sm:$0xff] }
  0x8b   :  { %4799 = vmatpush1.bf16.msra.mxu0 %v10599_v0  ;;  %5834 = vmatprep.mubr.bf16.mxu1 %v12164_v3  ;;  %v12202_v15 = vcombine.high %v54_v44, %v66_v10  ;;  %v12220_v20 = vcombine.low %v54_v44, %v66_v10  ;;  %v10652_v0 = vld [vmem:[%s15332_s1 + $0x43c] ss:$12 sps:$4 sm:$0xff]   ;;  %v55_v44 = vld [vmem:[%s15331_s0 + $0x20] sm:$0xff] }
  0x8c   :  { %4800 = vmatprep.subr.bf16.mxu0 %v10606_v2  ;;  %9644 = vmatpush3.bf16.msra.mxu1 %v10613_v34  ;;  %v12340_v2 = vcombine.high %v150_v60, %v162_v61  ;;  %v10659_v34 = vld [vmem:[%s15332_s1 + $0x698] ss:$12 sps:$4 sm:$0xff]  }
  0x8d   :  { %4763 = vmatprep.mubr.bf16.mxu0 %v11916_v46  ;;  %9645 = vmatprep.subr.bf16.mxu1 %v10617_v5  ;;  %v10614_v46 = vld [vmem:[%s15332_s1 + $0x378] ss:$12 sps:$4 sm:$0xff]   ;;  %v10663_v5 = vld [vmem:[%s15332_s1 + $0x770] ss:$12 sps:$4 sm:$0xff]  }
  0x8e   :  { %v67_v10 = vld [vmem:[%s15331_s0 + $0x80] sm:$0xff] }
  0x8f   :  { %4801 = vmatpush1.bf16.msra.mxu0 %v10604_v7  ;;  %v10650_v7 = vld [vmem:[%s15332_s1 + $0x438] ss:$12 sps:$4 sm:$0xff]  }
  0x90   :  { %4802 = vmatprep.subr.bf16.mxu0 %v10611_v8  ;;  %9646 = vmatpush3.bf16.msra.mxu1 %v10618_v9  ;;  %v10657_v8 = vld [vmem:[%s15332_s1 + $0x454] ss:$12 sps:$4 sm:$0xff]   ;;  %v10664_v9 = vld [vmem:[%s15332_s1 + $0x6b0] ss:$12 sps:$4 sm:$0xff]  }
  0x91   :  { %9677 = vmatprep.subr.bf16.mxu1 %v10628_v11  ;;  %v10674_v11 = vld [vmem:[%s15332_s1 + $0x848] ss:$12 sps:$4 sm:$0xff]  }
  0x92   :  { %4764 = vmatmul.mubr.bf16.gmra.mrb[8].mxu0 %v11949_v56  ;;  %5835 = vmatmul.mubr.bf16.gmra.mrb[56].mxu1 %v12197_v13  ;;  %v90_v56 = vld [vmem:[%s15331_s0 + $0x138] sm:$0xff] }
  0x93   :  { %4803 = vmatpush1.bf16.msra.mxu0 %v10609_v12  ;;  %5875 = vmatprep.mubr.bf16.mxu1 %v12202_v15  ;;  %v12228_v24 = vcombine.high %v78_v19, %v90_v56  ;;  %v12261_v35 = vcombine.low %v78_v19, %v90_v56  ;;  %v10655_v12 = vld [vmem:[%s15332_s1 + $0x450] ss:$12 sps:$4 sm:$0xff]   ;;  %v10660_v19 = vld [vmem:[%s15332_s1 + $0x468] ss:$12 sps:$4 sm:$0xff]  }
  0x94   :  { %4804 = vmatprep.subr.bf16.mxu0 %v10616_v14  ;;  %4773 = vmatprep.mubr.bf16.mxu0 %v11954_v58  ;;  %v10633_v58 = vld [vmem:[%s15332_s1 + $0x6e0] ss:$12 sps:$4 sm:$0xff]   ;;  %v12371_v14 = vcombine.low %v150_v60, %v162_v61  ;;  %v10667_v56 = vld [vmem:[%s15332_s1 + $0x484] ss:$12 sps:$4 sm:$0xff]   ;;  %v10695_v60 = vld [vmem:[%s15332_s1 + $0x7e8] ss:$12 sps:$4 sm:$0xff]  }
  0x95   :  { %v10693_v61 = vld [vmem:[%s15332_s1 + $0x514] ss:$12 sps:$4 sm:$0xff]  }
  0x97   :  { %4805 = vmatpush1.bf16.msra.mxu0 %v10614_v46  ;;  %v10662_v46 = vld [vmem:[%s15332_s1 + $0x46c] ss:$12 sps:$4 sm:$0xff]  }
  0x98   :  { %4806 = vmatprep.subr.bf16.mxu0 %v10621_v17  ;;  %v12376_v17 = vcombine.high %v55_v44, %v67_v10 }
  0x9a   :  { %4774 = vmatmul.mubr.bf16.gmra.mrb[12].mxu0 %v11987_v4  ;;  %5876 = vmatmul.mubr.bf16.vlgmr.msra.gmra.mrb[60].mxu1 %v12220_v20  ;;  %v102_v4 = vld [vmem:[%s15331_s0 + $0x198] sm:$0xff] }
  0x9b   :  { %4807 = vmatpush1.bf16.msra.mxu0 %v10619_v21  ;;  %5883 = vmatprep.mubr.bf16.mxu1 %v12228_v24  ;;  %v12266_v37 = vcombine.high %v102_v4, %v114_v30  ;;  %v12299_v49 = vcombine.low %v102_v4, %v114_v30  ;;  %v79_v21 = vld [vmem:[%s15331_s0 + $0xe0] sm:$0xff]  ;;  %v10675_v4 = vld [vmem:[%s15332_s1 + $0x788] ss:$12 sps:$4 sm:$0xff]  }
  0x9c   :  { %4808 = vmatprep.subr.bf16.mxu0 %v10624_v22  ;;  %9678 = vmatpush3.bf16.msra.mxu1 %v10629_v25  ;;  %v91_v22 = vld [vmem:[%s15331_s0 + $0x140] sm:$0xff]  ;;  %v12392_v25 = vcombine.low %v55_v44, %v67_v10  ;;  %v10709_v44 = vld [vmem:[%s15332_s1 + $0x8f0] ss:$12 sps:$4 sm:$0xff]   ;;  %v10696_v10 = vld [vmem:[%s15332_s1 + $0x528] ss:$12 sps:$4 sm:$0xff]  }
  0x9d   :  { %4783 = vmatprep.mubr.bf16.mxu0 %v11992_v6  ;;  %9679 = vmatprep.subr.bf16.mxu1 %v10633_v58  ;;  %v10630_v6 = vld [vmem:[%s15332_s1 + $0x3d8] ss:$12 sps:$4 sm:$0xff]   ;;  %v10665_v58 = vld [vmem:[%s15332_s1 + $0x480] ss:$12 sps:$4 sm:$0xff]  }
  0x9e   :  { %v10679_v30 = vld [vmem:[%s15332_s1 + $0x860] ss:$12 sps:$4 sm:$0xff]  }
  0x9f   :  { %4809 = vmatpush1.bf16.msra.mxu0 %v10622_v27  ;;  %v10670_v27 = vld [vmem:[%s15332_s1 + $0x49c] ss:$12 sps:$4 sm:$0xff]  }
  0xa0   :  { %4810 = vmatprep.subr.bf16.mxu0 %v10627_v28  ;;  %9680 = vmatpush3.bf16.msra.mxu1 %v10634_v29  ;;  %v12400_v28 = vcombine.high %v79_v21, %v91_v22  ;;  %v10668_v29 = vld [vmem:[%s15332_s1 + $0x498] ss:$12 sps:$4 sm:$0xff]  }
  0xa1   :  { %9681 = vmatprep.subr.bf16.mxu1 %v10638_v32  ;;  %v10673_v32 = vld [vmem:[%s15332_s1 + $0x4b4] ss:$12 sps:$4 sm:$0xff]  }
  0xa2   :  { %4784 = vmatmul.mubr.bf16.gmra.mrb[16].mxu0 %v12025_v16  ;;  %5884 = vmatmul.mubr.bf16.gmra.mrb[64].mxu1 %v12261_v35  ;;  %v138_v16 = vld [vmem:[%s15331_s0 + $0x2b8] sm:$0xff] }
  0xa3   :  { %4811 = vmatpush1.bf16.msra.mxu0 %v10625_v33  ;;  %5891 = vmatprep.mubr.bf16.mxu1 %v12266_v37  ;;  %v12304_v51 = vcombine.high %v126_v45, %v138_v16  ;;  %v12335_v63 = vcombine.low %v126_v45, %v138_v16  ;;  %v10680_v33 = vld [vmem:[%s15332_s1 + $0x7a0] ss:$12 sps:$4 sm:$0xff]   ;;  %v10685_v45 = vld [vmem:[%s15332_s1 + $0x7b8] ss:$12 sps:$4 sm:$0xff]   ;;  %v10689_v16 = vld [vmem:[%s15332_s1 + $0x890] ss:$12 sps:$4 sm:$0xff]  }
  0xa4   :  { %4812 = vmatprep.subr.bf16.mxu0 %v10632_v36  ;;  %9682 = vmatpush3.bf16.msra.mxu1 %v10639_v39  ;;  %v115_v36 = vld [vmem:[%s15331_s0 + $0x200] sm:$0xff]  ;;  %v10671_v39 = vld [vmem:[%s15332_s1 + $0x4b0] ss:$12 sps:$4 sm:$0xff]  }
  0xa5   :  { %4826 = vmatprep.mubr.bf16.mxu0 %v12030_v18  ;;  %9683 = vmatprep.subr.bf16.mxu1 %v10643_v41  ;;  %v10640_v18 = vld [vmem:[%s15332_s1 + $0x408] ss:$12 sps:$4 sm:$0xff]   ;;  %v12433_v41 = vcombine.low %v79_v21, %v91_v22 }
  0xa6   :  { %v10708_v22 = vld [vmem:[%s15332_s1 + $0x55c] ss:$12 sps:$4 sm:$0xff]  }
  0xa7   :  { %4813 = vmatpush1.bf16.msra.mxu0 %v10630_v6  ;;  %v10684_v6 = vld [vmem:[%s15332_s1 + $0x878] ss:$12 sps:$4 sm:$0xff]  }
  0xa8   :  { %4814 = vmatprep.subr.bf16.mxu0 %v10637_v42  ;;  %9684 = vmatpush3.bf16.msra.mxu1 %v10644_v43  ;;  %v10678_v42 = vld [vmem:[%s15332_s1 + $0x4cc] ss:$12 sps:$4 sm:$0xff]  }
  0xa9   :  { %9685 = vmatprep.subr.bf16.mxu1 %v10648_v47  ;;  %v10683_v47 = vld [vmem:[%s15332_s1 + $0x4e4] ss:$12 sps:$4 sm:$0xff]  }
  0xaa   :  { %5892 = vmatmul.mubr.bf16.gmra.mrb[68].mxu1 %v12299_v49 }
  0xab   :  { %4815 = vmatpush1.bf16.msra.mxu0 %v10635_v48  ;;  %5899 = vmatprep.mubr.bf16.mxu1 %v12304_v51  ;;  %v10690_v48 = vld [vmem:[%s15332_s1 + $0x7d0] ss:$12 sps:$4 sm:$0xff]  }
  0xac   :  { %4816 = vmatprep.subr.bf16.mxu0 %v10642_v50  ;;  %9686 = vmatpush3.bf16.msra.mxu1 %v10649_v53  ;;  %v127_v50 = vld [vmem:[%s15331_s0 + $0x260] sm:$0xff] }
  0xad   :  { %9687 = vmatprep.subr.bf16.mxu1 %v10653_v57  ;;  %v10681_v53 = vld [vmem:[%s15332_s1 + $0x4e0] ss:$12 sps:$4 sm:$0xff]   ;;  %v10688_v57 = vld [vmem:[%s15332_s1 + $0x4fc] ss:$12 sps:$4 sm:$0xff]  }
  0xaf   :  { %4817 = vmatpush1.bf16.msra.mxu0 %v10640_v18  ;;  %v10694_v18 = vld [vmem:[%s15332_s1 + $0x8a8] ss:$12 sps:$4 sm:$0xff]  }
  0xb0   :  { %4818 = vmatprep.subr.bf16.mxu0 %v10647_v55  ;;  %9688 = vmatpush3.bf16.msra.mxu1 %v10654_v59 }
  0xb1   :  { %9689 = vmatprep.subr.bf16.mxu1 %v10658_v31  ;;  %v10699_v31 = vld [vmem:[%s15332_s1 + $0x8c0] ss:$12 sps:$4 sm:$0xff]  }
  0xb2   :  { %5900 = vmatmul.mubr.bf16.gmra.mrb[72].mxu1 %v12335_v63 }
  0xb3   :  { %4819 = vmatpush1.bf16.msra.mxu0 %v10645_v62  ;;  %5907 = vmatprep.mubr.bf16.mxu1 %v12340_v2  ;;  %v10700_v62 = vld [vmem:[%s15332_s1 + $0x800] ss:$12 sps:$4 sm:$0xff]  }
  0xb4   :  { %4820 = vmatprep.subr.bf16.mxu0 %v10652_v0  ;;  %9690 = vmatpush3.bf16.msra.mxu1 %v10659_v34  ;;  %v151_v0 = vld [vmem:[%s15331_s0 + $0x320] sm:$0xff] }
  0xb5   :  { %9691 = vmatprep.subr.bf16.mxu1 %v10663_v5  ;;  %v163_v34 = vld [vmem:[%s15331_s0 + $0x380] sm:$0xff]  ;;  %v10691_v5 = vld [vmem:[%s15332_s1 + $0x510] ss:$12 sps:$4 sm:$0xff]  }
  0xb6   :  { %v12547_v21 = vcombine.low %v151_v0, %v163_v34 }
  0xb7   :  { %4821 = vmatpush1.bf16.msra.mxu0 %v10650_v7 }
  0xb8   :  { %4822 = vmatprep.subr.bf16.mxu0 %v10657_v8  ;;  %9692 = vmatpush3.bf16.msra.mxu1 %v10664_v9  ;;  %v10698_v8 = vld [vmem:[%s15332_s1 + $0x52c] ss:$12 sps:$4 sm:$0xff]   ;;  %v12514_v9 = vcombine.high %v151_v0, %v163_v34 }
  0xb9   :  { %9723 = vmatprep.subr.bf16.mxu1 %v10674_v11  ;;  %v10703_v11 = vld [vmem:[%s15332_s1 + $0x544] ss:$12 sps:$4 sm:$0xff]   ;;  %v10734_v34 = vld [vmem:[%s15332_s1 + $0x5ec] ss:$12 sps:$4 sm:$0xff]  }
  0xba   :  { %5908 = vmatmul.mubr.bf16.gmra.mrb[76].mxu1 %v12371_v14 }
  0xbb   :  { %4823 = vmatpush1.bf16.msra.mxu0 %v10655_v12  ;;  %5948 = vmatprep.mubr.bf16.mxu1 %v12376_v17  ;;  %v10710_v12 = vld [vmem:[%s15332_s1 + $0x830] ss:$12 sps:$4 sm:$0xff]  }
  0xbc   :  { %4824 = vmatprep.subr.bf16.mxu0 %v10662_v46  ;;  %v68_v46 = vld [vmem:[%s15331_s0 + $0x88] sm:$0xff] }
  0xbf   :  { %4825 = vmatpush1.bf16.msra.mxu0 %v10660_v19  ;;  %v10720_v19 = vld [vmem:[%s15332_s1 + $0x9c8] ss:$12 sps:$4 sm:$0xff]  }
  0xc0   :  { %4877 = vmatprep.subr.bf16.mxu0 %v10667_v56  ;;  %v10701_v56 = vld [vmem:[%s15332_s1 + $0x540] ss:$12 sps:$4 sm:$0xff]  }
  0xc2   :  { %4827 = vmatmul.mubr.bf16.vlgmr.msra.gmra.mrb[0].mxu0 %v12046_v23  ;;  %5949 = vmatmul.mubr.bf16.vlgmr.msra.gmra.mrb[80].mxu1 %v12392_v25  ;;  %v103_v23 = vld [vmem:[%s15331_s0 + $0x1a0] sm:$0xff] }
  0xc3   :  { %4878 = vmatpush1.bf16.msra.mxu0 %v10665_v58  ;;  %5956 = vmatprep.mubr.bf16.mxu1 %v12400_v28  ;;  %v12438_v43 = vcombine.high %v103_v23, %v115_v36  ;;  %v12471_v55 = vcombine.low %v103_v23, %v115_v36  ;;  %v10714_v23 = vld [vmem:[%s15332_s1 + $0x588] ss:$12 sps:$4 sm:$0xff]   ;;  %v10725_v36 = vld [vmem:[%s15332_s1 + $0x9e0] ss:$12 sps:$4 sm:$0xff]  }
  0xc4   :  { %4879 = vmatprep.subr.bf16.mxu0 %v10670_v27  ;;  %9724 = vmatpush3.bf16.msra.mxu1 %v10675_v4  ;;  %v10713_v27 = vld [vmem:[%s15332_s1 + $0x574] ss:$12 sps:$4 sm:$0xff]   ;;  %v92_v4 = vld [vmem:[%s15331_s0 + $0x148] sm:$0xff] }
  0xc5   :  { %4836 = vmatprep.mubr.bf16.mxu0 %v12054_v26  ;;  %9725 = vmatprep.subr.bf16.mxu1 %v10679_v30  ;;  %v10676_v26 = vld [vmem:[%s15332_s1 + $0x4c8] ss:$12 sps:$4 sm:$0xff]   ;;  %v10711_v30 = vld [vmem:[%s15332_s1 + $0x570] ss:$12 sps:$4 sm:$0xff]  }
  0xc7   :  { %4880 = vmatpush1.bf16.msra.mxu0 %v10668_v29  ;;  %v80_v29 = vld [vmem:[%s15331_s0 + $0xe8] sm:$0xff] }
  0xc8   :  { %4881 = vmatprep.subr.bf16.mxu0 %v10673_v32  ;;  %9726 = vmatpush3.bf16.msra.mxu1 %v10680_v33  ;;  %v10716_v32 = vld [vmem:[%s15332_s1 + $0x58c] ss:$12 sps:$4 sm:$0xff]   ;;  %v12578_v33 = vcombine.high %v80_v29, %v92_v4 }
  0xc9   :  { %9727 = vmatprep.subr.bf16.mxu1 %v10684_v6  ;;  %v10719_v6 = vld [vmem:[%s15332_s1 + $0x5a4] ss:$12 sps:$4 sm:$0xff]  }
  0xca   :  { %4837 = vmatmul.mubr.bf16.gmra.mrb[4].mxu0 %v12085_v38  ;;  %5957 = vmatmul.mubr.bf16.gmra.mrb[84].mxu1 %v12433_v41  ;;  %v139_v38 = vld [vmem:[%s15331_s0 + $0x2c0] sm:$0xff] }
  0xcb   :  { %4882 = vmatpush1.bf16.msra.mxu0 %v10671_v39  ;;  %5964 = vmatprep.mubr.bf16.mxu1 %v12438_v43  ;;  %v12476_v59 = vcombine.high %v127_v50, %v139_v38  ;;  %v12509_v7 = vcombine.low %v127_v50, %v139_v38  ;;  %v10726_v39 = vld [vmem:[%s15332_s1 + $0x920] ss:$12 sps:$4 sm:$0xff]   ;;  %v10722_v38 = vld [vmem:[%s15332_s1 + $0x5b8] ss:$12 sps:$4 sm:$0xff]  }
  0xcc   :  { %4883 = vmatprep.subr.bf16.mxu0 %v10678_v42  ;;  %9728 = vmatpush3.bf16.msra.mxu1 %v10685_v45  ;;  %v104_v42 = vld [vmem:[%s15331_s0 + $0x1a8] sm:$0xff]  ;;  %v10730_v45 = vld [vmem:[%s15332_s1 + $0x9f8] ss:$12 sps:$4 sm:$0xff]  }
  0xcd   :  { %4846 = vmatprep.mubr.bf16.mxu0 %v12090_v40  ;;  %9729 = vmatprep.subr.bf16.mxu1 %v10689_v16  ;;  %v10686_v40 = vld [vmem:[%s15332_s1 + $0x4f8] ss:$12 sps:$4 sm:$0xff]   ;;  %v10717_v16 = vld [vmem:[%s15332_s1 + $0x5a0] ss:$12 sps:$4 sm:$0xff]  }
  0xcf   :  { %4884 = vmatpush1.bf16.msra.mxu0 %v10676_v26  ;;  %v116_v26 = vld [vmem:[%s15331_s0 + $0x208] sm:$0xff] }
  0xd0   :  { %4885 = vmatprep.subr.bf16.mxu0 %v10683_v47  ;;  %9730 = vmatpush3.bf16.msra.mxu1 %v10690_v48  ;;  %v12609_v47 = vcombine.low %v80_v29, %v92_v4  ;;  %v10724_v48 = vld [vmem:[%s15332_s1 + $0x5bc] ss:$12 sps:$4 sm:$0xff]   ;;  %v12614_v50 = vcombine.high %v104_v42, %v116_v26  ;;  %v12645_v0 = vcombine.low %v104_v42, %v116_v26  ;;  %v10749_v4 = vld [vmem:[%s15332_s1 + $0x634] ss:$12 sps:$4 sm:$0xff]   ;;  %v10759_v42 = vld [vmem:[%s15332_s1 + $0x664] ss:$12 sps:$4 sm:$0xff]  }
  0xd1   :  { %9731 = vmatprep.subr.bf16.mxu1 %v10694_v18  ;;  %v10731_v18 = vld [vmem:[%s15332_s1 + $0x938] ss:$12 sps:$4 sm:$0xff]   ;;  %v10755_v29 = vld [vmem:[%s15332_s1 + $0xa70] ss:$12 sps:$4 sm:$0xff]  }
  0xd2   :  { %4847 = vmatmul.mubr.bf16.gmra.mrb[8].mxu0 %v12121_v52  ;;  %5965 = vmatmul.mubr.bf16.gmra.mrb[88].mxu1 %v12471_v55  ;;  %v10704_v52 = vld [vmem:[%s15332_s1 + $0x8d8] ss:$12 sps:$4 sm:$0xff]   ;;  %v81_v26 = vld [vmem:[%s15331_s0 + $0xf0] sm:$0xff] }
  0xd3   :  { %4886 = vmatpush1.bf16.msra.mxu0 %v10681_v53  ;;  %5972 = vmatprep.mubr.bf16.mxu1 %v12476_v59  ;;  %v10735_v53 = vld [vmem:[%s15332_s1 + $0xa10] ss:$12 sps:$4 sm:$0xff]  }
  0xd4   :  { %4887 = vmatprep.subr.bf16.mxu0 %v10688_v57  ;;  %9732 = vmatpush3.bf16.msra.mxu1 %v10695_v60  ;;  %v10729_v57 = vld [vmem:[%s15332_s1 + $0x5d4] ss:$12 sps:$4 sm:$0xff]   ;;  %v128_v60 = vld [vmem:[%s15331_s0 + $0x268] sm:$0xff] }
  0xd5   :  { %4856 = vmatprep.mubr.bf16.mxu0 %v12126_v54  ;;  %9733 = vmatprep.subr.bf16.mxu1 %v10699_v31  ;;  %v10705_v54 = vld [vmem:[%s15332_s1 + $0x818] ss:$12 sps:$4 sm:$0xff]   ;;  %v10740_v31 = vld [vmem:[%s15332_s1 + $0xa28] ss:$12 sps:$4 sm:$0xff]  }
  0xd7   :  { %4888 = vmatpush1.bf16.msra.mxu0 %v10686_v40  ;;  %v10736_v40 = vld [vmem:[%s15332_s1 + $0x950] ss:$12 sps:$4 sm:$0xff]  }
  0xd8   :  { %4889 = vmatprep.subr.bf16.mxu0 %v10693_v61  ;;  %9734 = vmatpush3.bf16.msra.mxu1 %v10700_v62  ;;  %v140_v61 = vld [vmem:[%s15331_s0 + $0x2c8] sm:$0xff]  ;;  %v10727_v62 = vld [vmem:[%s15332_s1 + $0x5d0] ss:$12 sps:$4 sm:$0xff]  }
  0xd9   :  { %9735 = vmatprep.subr.bf16.mxu1 %v10704_v52  ;;  %v12650_v52 = vcombine.high %v128_v60, %v140_v61 }
  0xda   :  { %4857 = vmatmul.mubr.bf16.gmra.mrb[12].mxu0 %v12159_v1  ;;  %5973 = vmatmul.mubr.bf16.gmra.mrb[92].mxu1 %v12509_v7  ;;  %v56_v1 = vld [vmem:[%s15331_s0 + $0x28] sm:$0xff] }
  0xdb   :  { %4890 = vmatpush1.bf16.msra.mxu0 %v10691_v5  ;;  %5980 = vmatprep.mubr.bf16.mxu1 %v12514_v9  ;;  %v12552_v58 = vcombine.high %v56_v1, %v68_v46  ;;  %v10732_v5 = vld [vmem:[%s15332_s1 + $0x5e8] ss:$12 sps:$4 sm:$0xff]  }
  0xdc   :  { %4891 = vmatprep.subr.bf16.mxu0 %v10698_v8  ;;  %9736 = vmatpush3.bf16.msra.mxu1 %v10705_v54  ;;  %v10741_v8 = vld [vmem:[%s15332_s1 + $0x968] ss:$12 sps:$4 sm:$0xff]   ;;  %v10739_v54 = vld [vmem:[%s15332_s1 + $0x604] ss:$12 sps:$4 sm:$0xff]  }
  0xdd   :  { %4866 = vmatprep.mubr.bf16.mxu0 %v12164_v3  ;;  %9737 = vmatprep.subr.bf16.mxu1 %v10709_v44  ;;  %v10706_v3 = vld [vmem:[%s15332_s1 + $0x558] ss:$12 sps:$4 sm:$0xff]   ;;  %v10745_v44 = vld [vmem:[%s15332_s1 + $0xa40] ss:$12 sps:$4 sm:$0xff]  }
  0xdf   :  { %4892 = vmatpush1.bf16.msra.mxu0 %v10696_v10  ;;  %v10746_v10 = vld [vmem:[%s15332_s1 + $0x980] ss:$12 sps:$4 sm:$0xff]  }
  0xe0   :  { %4893 = vmatprep.subr.bf16.mxu0 %v10703_v11  ;;  %9738 = vmatpush3.bf16.msra.mxu1 %v10710_v12  ;;  %v152_v11 = vld [vmem:[%s15331_s0 + $0x328] sm:$0xff] }
  0xe1   :  { %9769 = vmatprep.subr.bf16.mxu1 %v10720_v19  ;;  %v164_v12 = vld [vmem:[%s15331_s0 + $0x388] sm:$0xff]  ;;  %v12681_v19 = vcombine.low %v128_v60, %v140_v61  ;;  %v105_v60 = vld [vmem:[%s15331_s0 + $0x1b0] sm:$0xff]  ;;  %v10776_v61 = vld [vmem:[%s15332_s1 + $0xb78] ss:$12 sps:$4 sm:$0xff]  }
  0xe2   :  { %4867 = vmatmul.mubr.bf16.gmra.mrb[16].mxu0 %v12197_v13  ;;  %5981 = vmatmul.mubr.bf16.gmra.mrb[96].mxu1 %v12547_v21  ;;  %v12570_v13 = vcombine.low %v56_v1, %v68_v46  ;;  %v10750_v1 = vld [vmem:[%s15332_s1 + $0xa58] ss:$12 sps:$4 sm:$0xff]   ;;  %v10737_v46 = vld [vmem:[%s15332_s1 + $0x600] ss:$12 sps:$4 sm:$0xff]  }
  0xe3   :  { %4894 = vmatpush1.bf16.msra.mxu0 %v10701_v56  ;;  %6021 = vmatprep.mubr.bf16.mxu1 %v12552_v58  ;;  %v10744_v56 = vld [vmem:[%s15332_s1 + $0x61c] ss:$12 sps:$4 sm:$0xff]  }
  0xe4   :  { %4895 = vmatprep.subr.bf16.mxu0 %v10708_v22  ;;  %4909 = vmatprep.mubr.bf16.mxu0 %v12202_v15  ;;  %v10721_v15 = vld [vmem:[%s15332_s1 + $0x908] ss:$12 sps:$4 sm:$0xff]   ;;  %v12686_v22 = vcombine.high %v152_v11, %v164_v12 }
  0xe7   :  { %4896 = vmatpush1.bf16.msra.mxu0 %v10706_v3  ;;  %v10742_v3 = vld [vmem:[%s15332_s1 + $0x618] ss:$12 sps:$4 sm:$0xff]  }
  0xe8   :  { %4897 = vmatprep.subr.bf16.mxu0 %v10713_v27  ;;  %v10751_v27 = vld [vmem:[%s15332_s1 + $0x998] ss:$12 sps:$4 sm:$0xff]  }
  0xea   :  { %6022 = vmatmul.mubr.bf16.vlgmr.msra.gmra.mrb[100].mxu1 %v12570_v13 }
  0xeb   :  { %4898 = vmatpush1.bf16.msra.mxu0 %v10711_v30  ;;  %6029 = vmatprep.mubr.bf16.mxu1 %v12578_v33  ;;  %v10756_v30 = vld [vmem:[%s15332_s1 + $0x9b0] ss:$12 sps:$4 sm:$0xff]  }
  0xec   :  { %4899 = vmatprep.subr.bf16.mxu0 %v10716_v32  ;;  %9770 = vmatpush3.bf16.msra.mxu1 %v10721_v15  ;;  %v69_v32 = vld [vmem:[%s15331_s0 + $0x90] sm:$0xff] }
  0xed   :  { %9771 = vmatprep.subr.bf16.mxu1 %v10725_v36  ;;  %v10747_v15 = vld [vmem:[%s15332_s1 + $0x630] ss:$12 sps:$4 sm:$0xff]   ;;  %v12719_v36 = vcombine.low %v152_v11, %v164_v12  ;;  %v10786_v12 = vld [vmem:[%s15332_s1 + $0xba8] ss:$12 sps:$4 sm:$0xff]  }
  0xee   :  { %v129_v11 = vld [vmem:[%s15331_s0 + $0x270] sm:$0xff] }
  0xef   :  { %4900 = vmatpush1.bf16.msra.mxu0 %v10714_v23  ;;  %v10766_v23 = vld [vmem:[%s15332_s1 + $0xb48] ss:$12 sps:$4 sm:$0xff]  }
  0xf0   :  { %4901 = vmatprep.subr.bf16.mxu0 %v10719_v6  ;;  %9772 = vmatpush3.bf16.msra.mxu1 %v10726_v39  ;;  %v10754_v6 = vld [vmem:[%s15332_s1 + $0x64c] ss:$12 sps:$4 sm:$0xff]  }
  0xf1   :  { %9773 = vmatprep.subr.bf16.mxu1 %v10730_v45  ;;  %v93_v45 = vld [vmem:[%s15331_s0 + $0x150] sm:$0xff] }
  0xf2   :  { %6030 = vmatmul.mubr.bf16.gmra.mrb[104].mxu1 %v12609_v47 }
  0xf3   :  { %4902 = vmatpush1.bf16.msra.mxu0 %v10717_v16  ;;  %6037 = vmatprep.mubr.bf16.mxu1 %v12614_v50  ;;  %v10757_v16 = vld [vmem:[%s15332_s1 + $0x660] ss:$12 sps:$4 sm:$0xff]  }
  0xf4   :  { %4903 = vmatprep.subr.bf16.mxu0 %v10724_v48  ;;  %9774 = vmatpush3.bf16.msra.mxu1 %v10731_v18  ;;  %v10762_v48 = vld [vmem:[%s15332_s1 + $0x67c] ss:$12 sps:$4 sm:$0xff]   ;;  %v10760_v18 = vld [vmem:[%s15332_s1 + $0x678] ss:$12 sps:$4 sm:$0xff]  }
  0xf5   :  { %9775 = vmatprep.subr.bf16.mxu1 %v10735_v53  ;;  %v10771_v53 = vld [vmem:[%s15332_s1 + $0xb60] ss:$12 sps:$4 sm:$0xff]  }
  0xf7   :  { %4904 = vmatpush1.bf16.msra.mxu0 %v10722_v38  ;;  %v12750_v38 = vcombine.high %v81_v26, %v93_v45 }
  0xf8   :  { %4905 = vmatprep.subr.bf16.mxu0 %v10729_v57  ;;  %9776 = vmatpush3.bf16.msra.mxu1 %v10736_v40  ;;  %v10765_v57 = vld [vmem:[%s15332_s1 + $0x694] ss:$12 sps:$4 sm:$0xff]  }
  0xf9   :  { %9777 = vmatprep.subr.bf16.mxu1 %v10740_v31  ;;  %v10772_v40 = vld [vmem:[%s15332_s1 + $0xaa0] ss:$12 sps:$4 sm:$0xff]   ;;  %v10763_v31 = vld [vmem:[%s15332_s1 + $0x690] ss:$12 sps:$4 sm:$0xff]  }
  0xfa   :  { %6038 = vmatmul.mubr.bf16.gmra.mrb[108].mxu1 %v12645_v0 }
  0xfb   :  { %4906 = vmatpush1.bf16.msra.mxu0 %v10727_v62  ;;  %6045 = vmatprep.mubr.bf16.mxu1 %v12650_v52  ;;  %v12783_v62 = vcombine.low %v81_v26, %v93_v45  ;;  %v9509_v26 = vpop.f32.mrb[0].mxu1  ;;  %v10801_v45 = vld [vmem:[%s15332_s1 + $0xbf0] ss:$12 sps:$4 sm:$0xff]  }
  0xfc   :  { %4907 = vmatprep.subr.bf16.mxu0 %v10734_v34  ;;  %9778 = vmatpush3.bf16.msra.mxu1 %v10741_v8  ;;  %v10770_v34 = vld [vmem:[%s15332_s1 + $0x6ac] ss:$12 sps:$4 sm:$0xff]  }
  0xfd   :  { %9779 = vmatprep.subr.bf16.mxu1 %v10745_v44  ;;  %v10777_v8 = vld [vmem:[%s15332_s1 + $0xab8] ss:$12 sps:$4 sm:$0xff]  }
  0xfe   :  { %v10775_v44 = vld [vmem:[%s15332_s1 + $0x6c4] ss:$12 sps:$4 sm:$0xff]  }
  0xff   :  { %4908 = vmatpush1.bf16.msra.mxu0 %v10732_v5 }
 0x100   :  { %4960 = vmatprep.subr.bf16.mxu0 %v10739_v54  ;;  %9780 = vmatpush3.bf16.msra.mxu1 %v10746_v10  ;;  %v10781_v54 = vld [vmem:[%s15332_s1 + $0xb90] ss:$12 sps:$4 sm:$0xff]  }
 0x101   :  { %9781 = vmatprep.subr.bf16.mxu1 %v10750_v1  ;;  %v10782_v10 = vld [vmem:[%s15332_s1 + $0xad0] ss:$12 sps:$4 sm:$0xff]   ;;  %v10773_v1 = vld [vmem:[%s15332_s1 + $0x6c0] ss:$12 sps:$4 sm:$0xff]  }
 0x102   :  { %4910 = vmatmul.mubr.bf16.vlgmr.msra.gmra.mrb[0].mxu0 %v12220_v20  ;;  %6046 = vmatmul.mubr.bf16.gmra.mrb[112].mxu1 %v12681_v19  ;;  %v57_v20 = vld [vmem:[%s15331_s0 + $0x30] sm:$0xff] }
 0x103   :  { %4961 = vmatpush1.bf16.msra.mxu0 %v10737_v46  ;;  %6053 = vmatprep.mubr.bf16.mxu1 %v12686_v22  ;;  %v12724_v39 = vcombine.high %v57_v20, %v69_v32 }
 0x104   :  { %4962 = vmatprep.subr.bf16.mxu0 %v10744_v56  ;;  %9782 = vmatpush3.bf16.msra.mxu1 %v10751_v27  ;;  %v10780_v56 = vld [vmem:[%s15332_s1 + $0x6dc] ss:$12 sps:$4 sm:$0xff]   ;;  %v10778_v27 = vld [vmem:[%s15332_s1 + $0x6d8] ss:$12 sps:$4 sm:$0xff]  }
 0x105   :  { %4919 = vmatprep.mubr.bf16.mxu0 %v12228_v24  ;;  %9783 = vmatprep.subr.bf16.mxu1 %v10755_v29  ;;  %v10752_v24 = vld [vmem:[%s15332_s1 + $0x648] ss:$12 sps:$4 sm:$0xff]  }
 0x106   :  { %v10785_v29 = vld [vmem:[%s15332_s1 + $0x6f4] ss:$12 sps:$4 sm:$0xff]  }
 0x107   :  { %4963 = vmatpush1.bf16.msra.mxu0 %v10742_v3 }
 0x108   :  { %4964 = vmatprep.subr.bf16.mxu0 %v10749_v4  ;;  %9784 = vmatpush3.bf16.msra.mxu1 %v10756_v30  ;;  %v10791_v4 = vld [vmem:[%s15332_s1 + $0xbc0] ss:$12 sps:$4 sm:$0xff]  }
 0x109   :  { %9815 = vmatprep.subr.bf16.mxu1 %v10766_v23  ;;  %v10792_v30 = vld [vmem:[%s15332_s1 + $0xb00] ss:$12 sps:$4 sm:$0xff]   ;;  %v10783_v23 = vld [vmem:[%s15332_s1 + $0x6f0] ss:$12 sps:$4 sm:$0xff]  }
 0x10a   :  { %4920 = vmatmul.mubr.bf16.gmra.mrb[4].mxu0 %v12261_v35  ;;  %6054 = vmatmul.mubr.bf16.gmra.mrb[116].mxu1 %v12719_v36  ;;  %v12742_v35 = vcombine.low %v57_v20, %v69_v32  ;;  %v153_v20 = vld [vmem:[%s15331_s0 + $0x330] sm:$0xff] }
 0x10b   :  { %4965 = vmatpush1.bf16.msra.mxu0 %v10747_v15  ;;  %6094 = vmatprep.mubr.bf16.mxu1 %v12724_v39  ;;  %v165_v32 = vld [vmem:[%s15331_s0 + $0x390] sm:$0xff] }
 0x10c   :  { %4966 = vmatprep.subr.bf16.mxu0 %v10754_v6  ;;  %4929 = vmatprep.mubr.bf16.mxu0 %v12266_v37  ;;  %v10767_v37 = vld [vmem:[%s15332_s1 + $0xa88] ss:$12 sps:$4 sm:$0xff]   ;;  %v10790_v6 = vld [vmem:[%s15332_s1 + $0x70c] ss:$12 sps:$4 sm:$0xff]  }
 0x10f   :  { %4967 = vmatpush1.bf16.msra.mxu0 %v10752_v24  ;;  %v12864_v24 = vcombine.high %v153_v20, %v165_v32 }
 0x110   :  { %4968 = vmatprep.subr.bf16.mxu0 %v10759_v42  ;;  %v10797_v42 = vld [vmem:[%s15332_s1 + $0xb18] ss:$12 sps:$4 sm:$0xff]  }
 0x112   :  { %4930 = vmatmul.mubr.bf16.gmra.mrb[8].mxu0 %v12299_v49  ;;  %6095 = vmatmul.mubr.bf16.vlgmr.msra.gmra.mrb[120].mxu1 %v12742_v35  ;;  %v117_v49 = vld [vmem:[%s15331_s0 + $0x210] sm:$0xff] }
 0x113   :  { %4969 = vmatpush1.bf16.msra.mxu0 %v10757_v16  ;;  %6102 = vmatprep.mubr.bf16.mxu1 %v12750_v38  ;;  %v12788_v5 = vcombine.high %v105_v60, %v117_v49  ;;  %v12821_v46 = vcombine.low %v105_v60, %v117_v49  ;;  %v9510_v16 = vpop.f32.mrb[1].mxu1  ;;  %v10812_v60 = vld [vmem:[%s15332_s1 + $0xcc8] ss:$12 sps:$4 sm:$0xff]  }
 0x114   :  { %4970 = vmatprep.subr.bf16.mxu0 %v10762_v48  ;;  %9816 = vmatpush3.bf16.msra.mxu1 %v10767_v37  ;;  %v10795_v48 = vld [vmem:[%s15332_s1 + $0x724] ss:$12 sps:$4 sm:$0xff]   ;;  %v12882_v37 = vadd.f32 %v9510_v16, %v9509_v26  ;;  %v118_v16 = vld [vmem:[%s15331_s0 + $0x218] sm:$0xff] }
 0x115   :  { %4939 = vmatprep.mubr.bf16.mxu0 %v12304_v51  ;;  %9817 = vmatprep.subr.bf16.mxu1 %v10771_v53  ;;  %v10768_v51 = vld [vmem:[%s15332_s1 + $0x6a8] ss:$12 sps:$4 sm:$0xff]   ;;  %v58_v53 = vld [vmem:[%s15331_s0 + $0x38] sm:$0xff] }
 0x117   :  { %4971 = vmatpush1.bf16.msra.mxu0 %v10760_v18  ;;  %v10802_v18 = vld [vmem:[%s15332_s1 + $0xb30] ss:$12 sps:$4 sm:$0xff]  }
 0x118   :  { %4972 = vmatprep.subr.bf16.mxu0 %v10765_v57  ;;  %9818 = vmatpush3.bf16.msra.mxu1 %v10772_v40  ;;  %v70_v57 = vld [vmem:[%s15331_s0 + $0x98] sm:$0xff]  ;;  %v9512_v40 = vpop.f32.mrb[2].mxu1 }
 0x119   :  { %9819 = vmatprep.subr.bf16.mxu1 %v10776_v61  ;;  %v9513_v49 = vpop.f32.mrb[3].mxu1  ;;  %v10793_v61 = vld [vmem:[%s15332_s1 + $0x720] ss:$12 sps:$4 sm:$0xff]  }
 0x11a   :  { %4940 = vmatmul.mubr.bf16.gmra.mrb[12].mxu0 %v12335_v63  ;;  %6103 = vmatmul.mubr.bf16.gmra.mrb[124].mxu1 %v12783_v62  ;;  %v141_v63 = vld [vmem:[%s15331_s0 + $0x2d0] sm:$0xff] }
 0x11b   :  { %4973 = vmatpush1.bf16.msra.mxu0 %v10763_v31  ;;  %6110 = vmatprep.mubr.bf16.mxu1 %v12788_v5  ;;  %v12826_v3 = vcombine.high %v129_v11, %v141_v63  ;;  %v12859_v15 = vcombine.low %v129_v11, %v141_v63  ;;  %v12897_v31 = vcombine.low %v153_v20, %v165_v32  ;;  %v10805_v11 = vld [vmem:[%s15332_s1 + $0x754] ss:$12 sps:$4 sm:$0xff]  }
 0x11c   :  { %4974 = vmatprep.subr.bf16.mxu0 %v10770_v34  ;;  %9820 = vmatpush3.bf16.msra.mxu1 %v10777_v8  ;;  %v12899_v34 = vadd.f32 %v9513_v49, %v9512_v40  ;;  %v12904_v8 = vcombine.high %v58_v53, %v70_v57  ;;  %v10806_v20 = vld [vmem:[%s15332_s1 + $0x768] ss:$12 sps:$4 sm:$0xff]  }
 0x11d   :  { %4949 = vmatprep.mubr.bf16.mxu0 %v12340_v2  ;;  %9821 = vmatprep.subr.bf16.mxu1 %v10781_v54  ;;  %v10787_v2 = vld [vmem:[%s15332_s1 + $0xae8] ss:$12 sps:$4 sm:$0xff]   ;;  %v9515_v54 = vpop.f32.mrb[4].mxu1 }
 0x11e   :  { %v10813_v32 = vld [vmem:[%s15332_s1 + $0xc08] ss:$12 sps:$4 sm:$0xff]  }
 0x11f   :  { %4975 = vmatpush1.bf16.msra.mxu0 %v10768_v51  ;;  %v10800_v51 = vld [vmem:[%s15332_s1 + $0x73c] ss:$12 sps:$4 sm:$0xff]  }
 0x120   :  { %4976 = vmatprep.subr.bf16.mxu0 %v10775_v44  ;;  %9822 = vmatpush3.bf16.msra.mxu1 %v10782_v10  ;;  %v10798_v44 = vld [vmem:[%s15332_s1 + $0x738] ss:$12 sps:$4 sm:$0xff]   ;;  %v9516_v10 = vpop.f32.mrb[5].mxu1 }
 0x121   :  { %9823 = vmatprep.subr.bf16.mxu1 %v10786_v12  ;;  %v12913_v63 = vadd.f32 %v9516_v10, %v9515_v54  ;;  %v82_v12 = vld [vmem:[%s15331_s0 + $0xf8] sm:$0xff] }
 0x122   :  { %4950 = vmatmul.mubr.bf16.gmra.mrb[16].mxu0 %v12371_v14  ;;  %6111 = vmatmul.mubr.bf16.gmra.mrb[128].mxu1 %v12821_v46  ;;  %v10796_v14 = vld [vmem:[%s15332_s1 + $0xbd8] ss:$12 sps:$4 sm:$0xff]   ;;  %v10827_v10 = vld [vmem:[%s15332_s1 + $0xd10] ss:$12 sps:$4 sm:$0xff]  }
 0x123   :  { %4977 = vmatpush1.bf16.msra.mxu0 %v10773_v1  ;;  %6118 = vmatprep.mubr.bf16.mxu1 %v12826_v3  ;;  %v94_v1 = vld [vmem:[%s15331_s0 + $0x158] sm:$0xff] }
 0x124   :  { %4978 = vmatprep.subr.bf16.mxu0 %v10780_v56  ;;  %9824 = vmatpush3.bf16.msra.mxu1 %v10787_v2  ;;  %v9518_v56 = vpop.f32.mrb[6].mxu1  ;;  %v12922_v2 = vcombine.low %v58_v53, %v70_v57  ;;  %v10809_v53 = vld [vmem:[%s15332_s1 + $0x780] ss:$12 sps:$4 sm:$0xff]   ;;  %v12965_v57 = vcombine.low %v82_v12, %v94_v1 }
 0x125   :  { %4992 = vmatprep.mubr.bf16.mxu0 %v12376_v17  ;;  %9825 = vmatprep.subr.bf16.mxu1 %v10791_v4  ;;  %v10788_v17 = vld [vmem:[%s15332_s1 + $0x708] ss:$12 sps:$4 sm:$0xff]   ;;  %v12930_v4 = vcombine.high %v82_v12, %v94_v1  ;;  %v10814_v12 = vld [vmem:[%s15332_s1 + $0x798] ss:$12 sps:$4 sm:$0xff]  }
 0x126   :  { %v10821_v1 = vld [vmem:[%s15332_s1 + $0x7b4] ss:$12 sps:$4 sm:$0xff]  }
 0x127   :  { %4979 = vmatpush1.bf16.msra.mxu0 %v10778_v27  ;;  %v10803_v27 = vld [vmem:[%s15332_s1 + $0x750] ss:$12 sps:$4 sm:$0xff]  }
 0x128   :  { %4980 = vmatprep.subr.bf16.mxu0 %v10785_v29  ;;  %9826 = vmatpush3.bf16.msra.mxu1 %v10792_v30  ;;  %v10808_v29 = vld [vmem:[%s15332_s1 + $0x76c] ss:$12 sps:$4 sm:$0xff]   ;;  %v9519_v30 = vpop.f32.mrb[7].mxu1 }
 0x129   :  { %9827 = vmatprep.subr.bf16.mxu1 %v10796_v14  ;;  %v12938_v14 = vadd.f32 %v9519_v30, %v9518_v56 }
 0x12a   :  { %6119 = vmatmul.mubr.bf16.gmra.mrb[132].mxu1 %v12859_v15 }
 0x12b   :  { %4981 = vmatpush1.bf16.msra.mxu0 %v10783_v23  ;;  %6126 = vmatprep.mubr.bf16.mxu1 %v12864_v24  ;;  %v9521_v23 = vpop.f32.mrb[8].mxu1 }
 0x12c   :  { %4982 = vmatprep.subr.bf16.mxu0 %v10790_v6  ;;  %9828 = vmatpush3.bf16.msra.mxu1 %v10797_v42  ;;  %v10817_v6 = vld [vmem:[%s15332_s1 + $0xce0] ss:$12 sps:$4 sm:$0xff]   ;;  %v9522_v26 = vpop.f32.mrb[9].mxu1 }
 0x12d   :  { %9829 = vmatprep.subr.bf16.mxu1 %v10801_v45  ;;  %v10818_v42 = vld [vmem:[%s15332_s1 + $0xc20] ss:$12 sps:$4 sm:$0xff]   ;;  %v106_v45 = vld [vmem:[%s15331_s0 + $0x1b8] sm:$0xff]  ;;  %v9524_v40 = vpop.f32.mrb[10].mxu1 }
 0x12e   :  { %v12970_v49 = vcombine.high %v106_v45, %v118_v16 }
 0x12f   :  { %4983 = vmatpush1.bf16.msra.mxu0 %v10788_v17  ;;  %v10811_v17 = vld [vmem:[%s15332_s1 + $0x784] ss:$12 sps:$4 sm:$0xff]  }
 0x130   :  { %4984 = vmatprep.subr.bf16.mxu0 %v10795_v48  ;;  %9830 = vmatpush3.bf16.msra.mxu1 %v10802_v18  ;;  %v12957_v48 = vadd.f32 %v9522_v26, %v9521_v23  ;;  %v10822_v18 = vld [vmem:[%s15332_s1 + $0xcf8] ss:$12 sps:$4 sm:$0xff]   ;;  %v10832_v23 = vld [vmem:[%s15332_s1 + $0xd28] ss:$12 sps:$4 sm:$0xff]  }
 0x131   :  { %9861 = vmatprep.subr.bf16.mxu1 %v10812_v60  ;;  %v10816_v60 = vld [vmem:[%s15332_s1 + $0x79c] ss:$12 sps:$4 sm:$0xff]  }
 0x132   :  { %6127 = vmatmul.mubr.bf16.gmra.mrb[136].mxu1 %v12897_v31 }
 0x133   :  { %4985 = vmatpush1.bf16.msra.mxu0 %v10793_v61  ;;  %6167 = vmatprep.mubr.bf16.mxu1 %v12904_v8  ;;  %v9525_v61 = vpop.f32.mrb[11].mxu1 }
 0x134   :  { %4986 = vmatprep.subr.bf16.mxu0 %v10800_v51  ;;  %v10823_v51 = vld [vmem:[%s15332_s1 + $0xc38] ss:$12 sps:$4 sm:$0xff]   ;;  %v12975_v54 = vadd.f32 %v9525_v61, %v9524_v40 }
 0x137   :  { %4987 = vmatpush1.bf16.msra.mxu0 %v10798_v44  ;;  %v9527_v44 = vpop.f32.mrb[12].mxu1 }
 0x138   :  { %4988 = vmatprep.subr.bf16.mxu0 %v10805_v11  ;;  %v9528_v11 = vpop.f32.mrb[13].mxu1 }
 0x139   :  { %v12988_v56 = vadd.f32 %v9528_v11, %v9527_v44  ;;  %v154_v44 = vld [vmem:[%s15331_s0 + $0x338] sm:$0xff] }
 0x13a   :  { %6168 = vmatmul.mubr.bf16.vlgmr.msra.gmra.mrb[140].mxu1 %v12922_v2 }
 0x13b   :  { %4989 = vmatpush1.bf16.msra.mxu0 %v10803_v27  ;;  %6175 = vmatprep.mubr.bf16.mxu1 %v12930_v4  ;;  %v10828_v27 = vld [vmem:[%s15332_s1 + $0xc50] ss:$12 sps:$4 sm:$0xff]  }
 0x13c   :  { %4990 = vmatprep.subr.bf16.mxu0 %v10808_v29  ;;  %9862 = vmatpush3.bf16.msra.mxu1 %v10813_v32  ;;  %v130_v29 = vld [vmem:[%s15331_s0 + $0x278] sm:$0xff] }
 0x13d   :  { %9863 = vmatprep.subr.bf16.mxu1 %v10817_v6  ;;  %v10819_v6 = vld [vmem:[%s15332_s1 + $0x7b0] ss:$12 sps:$4 sm:$0xff]  }
 0x13f   :  { %4991 = vmatpush1.bf16.msra.mxu0 %v10806_v20  ;;  %v142_v20 = vld [vmem:[%s15331_s0 + $0x2d8] sm:$0xff] }
 0x140   :  { %5043 = vmatprep.subr.bf16.mxu0 %v10811_v17  ;;  %9864 = vmatpush3.bf16.msra.mxu1 %v10818_v42  ;;  %v13009_v17 = vcombine.low %v106_v45, %v118_v16  ;;  %v13014_v26 = vcombine.high %v130_v29, %v142_v20  ;;  %v10831_v45 = vld [vmem:[%s15332_s1 + $0x7e4] ss:$12 sps:$4 sm:$0xff]   ;;  %v10837_v16 = vld [vmem:[%s15332_s1 + $0xd40] ss:$12 sps:$4 sm:$0xff]  }
 0x141   :  { %9865 = vmatprep.subr.bf16.mxu1 %v10822_v18  ;;  %v10824_v18 = vld [vmem:[%s15332_s1 + $0x7c8] ss:$12 sps:$4 sm:$0xff]  }
 0x142   :  { %4993 = vmatmul.mubr.bf16.vlgmr.msra.gmra.mrb[0].mxu0 %v12392_v25  ;;  %6176 = vmatmul.mubr.bf16.gmra.mrb[144].mxu1 %v12965_v57  ;;  %v9530_v25 = vpop.f32.mrb[14].mxu1 }
 0x143   :  { %5044 = vmatpush1.bf16.msra.mxu0 %v10809_v53  ;;  %6183 = vmatprep.mubr.bf16.mxu1 %v12970_v49  ;;  %v9531_v30 = vpop.f32.mrb[15].mxu1  ;;  %v10833_v53 = vld [vmem:[%s15332_s1 + $0xc68] ss:$12 sps:$4 sm:$0xff]  }
 0x144   :  { %5045 = vmatprep.subr.bf16.mxu0 %v10816_v60  ;;  %9866 = vmatpush3.bf16.msra.mxu1 %v10823_v51  ;;  %v13001_v32 = vadd.f32 %v9531_v30, %v9530_v25  ;;  %v9533_v42 = vpop.f32.mrb[16].mxu1  ;;  %v10838_v60 = vld [vmem:[%s15332_s1 + $0xc80] ss:$12 sps:$4 sm:$0xff]   ;;  %v10834_v30 = vld [vmem:[%s15332_s1 + $0x7f8] ss:$12 sps:$4 sm:$0xff]  }
 0x145   :  { %5002 = vmatprep.mubr.bf16.mxu0 %v12400_v28  ;;  %9867 = vmatprep.subr.bf16.mxu1 %v10827_v10  ;;  %v10826_v28 = vld [vmem:[%s15332_s1 + $0x7cc] ss:$12 sps:$4 sm:$0xff]   ;;  %v9534_v40 = vpop.f32.mrb[17].mxu1 }
 0x146   :  { %v13033_v61 = vadd.f32 %v9534_v40, %v9533_v42  ;;  %v9536_v51 = vpop.f32.mrb[18].mxu1  ;;  %v10842_v10 = vld [vmem:[%s15332_s1 + $0xd58] ss:$12 sps:$4 sm:$0xff]   ;;  %v10841_v42 = vld [vmem:[%s15332_s1 + $0x814] ss:$12 sps:$4 sm:$0xff]  }
 0x147   :  { %5046 = vmatpush1.bf16.msra.mxu0 %v10814_v12  ;;  %v9537_v11 = vpop.f32.mrb[19].mxu1  ;;  %v10829_v12 = vld [vmem:[%s15332_s1 + $0x7e0] ss:$12 sps:$4 sm:$0xff]   ;;  %v10839_v40 = vld [vmem:[%s15332_s1 + $0x810] ss:$12 sps:$4 sm:$0xff]  }
 0x148   :  { %5047 = vmatprep.subr.bf16.mxu0 %v10821_v1  ;;  %9868 = vmatpush3.bf16.msra.mxu1 %v10828_v27  ;;  %v13049_v1 = vcombine.low %v130_v29, %v142_v20  ;;  %v13051_v25 = vadd.f32 %v9537_v11, %v9536_v51  ;;  %v9555_v29 = vpop.f32.mrb[20].mxu1  ;;  %v10847_v20 = vld [vmem:[%s15332_s1 + $0xd70] ss:$12 sps:$4 sm:$0xff]  }
 0x149   :  { %9869 = vmatprep.subr.bf16.mxu1 %v10832_v23  ;;  %v10843_v23 = vld [vmem:[%s15332_s1 + $0xc98] ss:$12 sps:$4 sm:$0xff]  }
 0x14a   :  { %5003 = vmatmul.mubr.bf16.gmra.mrb[4].mxu0 %v12433_v41  ;;  %6184 = vmatmul.mubr.bf16.gmra.mrb[148].mxu1 %v13009_v17  ;;  %v166_v41 = vld [vmem:[%s15331_s0 + $0x398] sm:$0xff] }
 0x14b   :  { %5048 = vmatpush1.bf16.msra.mxu0 %v10819_v6  ;;  %6191 = vmatprep.mubr.bf16.mxu1 %v13014_v26  ;;  %v13056_v27 = vcombine.high %v154_v44, %v166_v41  ;;  %v9556_v6 = vpop.f32.mrb[21].mxu1 }
 0x14c   :  { %5049 = vmatprep.subr.bf16.mxu0 %v10826_v28  ;;  %9870 = vmatpush3.bf16.msra.mxu1 %v10833_v53  ;;  %v10848_v28 = vld [vmem:[%s15332_s1 + $0xcb0] ss:$12 sps:$4 sm:$0xff]   ;;  %v13075_v53 = vadd.f32 %v9556_v6, %v9555_v29  ;;  %v10844_v29 = vld [vmem:[%s15332_s1 + $0x828] ss:$12 sps:$4 sm:$0xff]   ;;  %v83_v6 = vld [vmem:[%s15331_s0 + $0x100] sm:$0xff] }
 0x14d   :  { %5012 = vmatprep.mubr.bf16.mxu0 %v12438_v43  ;;  %9871 = vmatprep.subr.bf16.mxu1 %v10837_v16  ;;  %v10836_v43 = vld [vmem:[%s15332_s1 + $0x7fc] ss:$12 sps:$4 sm:$0xff]   ;;  %v9558_v16 = vpop.f32.mrb[22].mxu1 }
 0x14e   :  { %v9559_v51 = vpop.f32.mrb[23].mxu1 }
 0x14f   :  { %5050 = vmatpush1.bf16.msra.mxu0 %v10824_v18  ;;  %v941_v18 = vlaneseq }
 0x150   :  { %5051 = vmatprep.subr.bf16.mxu0 %v10831_v45  ;;  %9872 = vmatpush3.bf16.msra.mxu1 %v10838_v60  ;;  %v71_v45 = vld [vmem:[%s15331_s0 + $0xa0] sm:$0xff]  ;;  %v10858_v60 = vld [vmem:[%s15332_s1 + $0xe48] ss:$12 sps:$4 sm:$0xff]  }
 0x151   :  { %9873 = vmatprep.subr.bf16.mxu1 %v10842_v10  ;;  %v13091_v10 = vcombine.low %v154_v44, %v166_v41  ;;  %v13093_v11 = vshrl.u32 %v941_v18, 7  ;;  %v10851_v44 = vld [vmem:[%s15332_s1 + $0x844] ss:$12 sps:$4 sm:$0xff]  }
 0x152   :  { %5013 = vmatmul.mubr.bf16.gmra.mrb[8].mxu0 %v12471_v55  ;;  %6192 = vmatmul.mubr.bf16.gmra.mrb[152].mxu1 %v13049_v1  ;;  %v59_v55 = vld [vmem:[%s15331_s0 + $0x40] sm:$0xff] }
 0x153   :  { %5052 = vmatpush1.bf16.msra.mxu0 %v10829_v12  ;;  %6199 = vmatprep.mubr.bf16.mxu1 %v13056_v27  ;;  %15360 = vst [vmem:[#allocation5_spill] sm:$0xff] %v13093_v11  ;;  %v9560_v12 = vadd.f32 %v9559_v51, %v9558_v16  ;;  %v13120_v18 = vcombine.low %v59_v55, %v71_v45  ;;  %v10849_v16 = vld [vmem:[%s15332_s1 + $0x840] ss:$12 sps:$4 sm:$0xff]  }
 0x154   :  { %5053 = vmatprep.subr.bf16.mxu0 %v10836_v43  ;;  %9874 = vmatpush3.bf16.msra.mxu1 %v10843_v23  ;;  %v13098_v43 = vcombine.high %v59_v55, %v71_v45  ;;  %v9561_v23 = vpop.f32.mrb[24].mxu1  ;;  %v10859_v55 = vld [vmem:[%s15332_s1 + $0xd88] ss:$12 sps:$4 sm:$0xff]  }
 0x155   :  { %5022 = vmatprep.mubr.bf16.mxu0 %v12476_v59  ;;  %9875 = vmatprep.subr.bf16.mxu1 %v10847_v20  ;;  %v10846_v59 = vld [vmem:[%s15332_s1 + $0x82c] ss:$12 sps:$4 sm:$0xff]   ;;  %v9562_v41 = vpop.f32.mrb[25].mxu1  ;;  %15362 = vst [vmem:[#allocation7_spill] sm:$0xff] %v13120_v18 }
 0x156   :  { %15361 = vst [vmem:[#allocation6_spill] sm:$0xff] %v13098_v43  ;;  %v9563_v20 = vadd.f32 %v9562_v41, %v9561_v23  ;;  %v10863_v23 = vld [vmem:[%s15332_s1 + $0xe60] ss:$12 sps:$4 sm:$0xff]   ;;  %v10852_v41 = vld [vmem:[%s15332_s1 + $0x858] ss:$12 sps:$4 sm:$0xff]  }
 0x157   :  { %5054 = vmatpush1.bf16.msra.mxu0 %v10834_v30  ;;  %v15347_v30 = vsub.s32 2, %v13093_v11 }
 0x158   :  { %5055 = vmatprep.subr.bf16.mxu0 %v10841_v42  ;;  %9876 = vmatpush3.bf16.msra.mxu1 %v10848_v28  ;;  %v95_v42 = vld [vmem:[%s15331_s0 + $0x160] sm:$0xff] }
 0x159   :  { %9907 = vmatprep.subr.bf16.mxu1 %v10858_v60  ;;  %v939_v28 = vld [vmem:[%s15333_s2] sm:$0x7]  ;;  %v13132_v60 = vcombine.high %v83_v6, %v95_v42 }
 0x15a   :  { %5023 = vmatmul.mubr.bf16.gmra.mrb[12].mxu0 %v12509_v7  ;;  %6200 = vmatmul.mubr.bf16.gmra.mrb[156].mxu1 %v13091_v10  ;;  %v9564_v7 = vpop.f32.mrb[26].mxu1 }
 0x15b   :  { %5056 = vmatpush1.bf16.msra.mxu0 %v10839_v40  ;;  %6240 = vmatprep.mubr.bf16.mxu1 %v13098_v43  ;;  %v13127_v40 = vrot.slane %v939_v28, %v15347_v30  ;;  %15363 = vst [vmem:[#allocation8_spill] sm:$0xff] %v13132_v60  ;;  %v9565_v51 = vpop.f32.mrb[27].mxu1 }
 0x15c   :  { %5057 = vmatprep.subr.bf16.mxu0 %v10846_v59  ;;  %5032 = vmatprep.mubr.bf16.mxu0 %v12514_v9  ;;  %v10854_v9 = vld [vmem:[%s15332_s1 + $0x85c] ss:$12 sps:$4 sm:$0xff]   ;;  %v9567_v59 = vpop.f32.mrb[28].mxu1 }
 0x15d   :  { %v5667_v45 = vadd.f32 %v12913_v63, %v13127_v40  ;;  %v5675_v63 = vadd.f32 %v12957_v48, %v13127_v40  ;;  %v5678_v28 = vadd.f32 %v12975_v54, %v13127_v40  ;;  %v5662_v48 = vadd.f32 %v12899_v34, %v13127_v40  ;;  %v10868_v34 = vld [vmem:[%s15332_s1 + $0xe78] ss:$12 sps:$4 sm:$0xff]  }
 0x15e   :  { %v9566_v54 = vadd.f32 %v9565_v51, %v9564_v7 }
 0x15f   :  { %5058 = vmatpush1.bf16.msra.mxu0 %v10844_v29  ;;  %v5670_v29 = vadd.f32 %v12938_v14, %v13127_v40  ;;  %v10857_v14 = vld [vmem:[%s15332_s1 + $0x874] ss:$12 sps:$4 sm:$0xff]   ;;  %v13164_v11 = vadd.f32 %v9563_v20, %v5667_v45  ;;  %v13179_v20 = vadd.f32 %v9560_v12, %v5662_v48  ;;  %v13186_v45 = vcombine.low %v83_v6, %v95_v42  ;;  %v10862_v12 = vld [vmem:[%s15332_s1 + $0x88c] ss:$12 sps:$4 sm:$0xff]  }
 0x160   :  { %5059 = vmatprep.subr.bf16.mxu0 %v10851_v44  ;;  %v9568_v44 = vpop.f32.mrb[29].mxu1  ;;  %v10860_v6 = vld [vmem:[%s15332_s1 + $0x888] ss:$12 sps:$4 sm:$0xff]  }
 0x161   :  { %v9570_v30 = vpop.f32.mrb[30].mxu1  ;;  %v13181_v7 = vadd.f32 %v9566_v54, %v5670_v29  ;;  %v9569_v51 = vadd.f32 %v9568_v44, %v9567_v59  ;;  %v10873_v59 = vld [vmem:[%s15332_s1 + $0xe90] ss:$12 sps:$4 sm:$0xff]   ;;  %v10865_v54 = vld [vmem:[%s15332_s1 + $0x8a0] ss:$12 sps:$4 sm:$0xff]  }
 0x162   :  { %5033 = vmatmul.mubr.bf16.gmra.mrb[16].mxu0 %v12547_v21  ;;  %6241 = vmatmul.mubr.bf16.vlgmr.msra.gmra.mrb[160].mxu1 %v13120_v18  ;;  %v5659_v21 = vadd.f32 %v12882_v37, %v13127_v40  ;;  %v9571_v18 = vpop.f32.mrb[31].mxu1  ;;  %v107_v37 = vld [vmem:[%s15331_s0 + $0x1c0] sm:$0xff] }
 0x163   :  { %5060 = vmatpush1.bf16.msra.mxu0 %v10849_v16  ;;  %6248 = vmatprep.mubr.bf16.mxu1 %v13132_v60  ;;  %v10864_v16 = vld [vmem:[%s15332_s1 + $0xda0] ss:$12 sps:$4 sm:$0xff]   ;;  %v9573_v43 = vpop.f32.mrb[32].mxu1  ;;  %v13195_v29 = vadd.f32 %v9569_v51, %v5675_v63  ;;  %v10867_v44 = vld [vmem:[%s15332_s1 + $0x8a4] ss:$12 sps:$4 sm:$0xff]   ;;  %v5686_v63 = vadd.f32 %v13001_v32, %v13127_v40 }
 0x164   :  { %5061 = vmatprep.subr.bf16.mxu0 %v10854_v9  ;;  %9908 = vmatpush3.bf16.msra.mxu1 %v10859_v55  ;;  %v119_v9 = vld [vmem:[%s15331_s0 + $0x220] sm:$0xff]  ;;  %v13174_v60 = vadd.f32 %v13075_v53, %v5659_v21  ;;  %v9572_v55 = vadd.f32 %v9571_v18, %v9570_v30  ;;  %v5683_v53 = vadd.f32 %v12988_v56, %v13127_v40  ;;  %v9574_v18 = vpop.f32.mrb[33].mxu1  ;;  %v10878_v32 = vld [vmem:[%s15332_s1 + $0xea8] ss:$12 sps:$4 sm:$0xff]  }
 0x165   :  { %5075 = vmatprep.mubr.bf16.mxu0 %v12552_v58  ;;  %9909 = vmatprep.subr.bf16.mxu1 %v10863_v23  ;;  %v10855_v58 = vld [vmem:[%s15332_s1 + $0x870] ss:$12 sps:$4 sm:$0xff]   ;;  %v13193_v23 = vcombine.high %v107_v37, %v119_v9  ;;  %v10869_v56 = vld [vmem:[%s15332_s1 + $0xdb8] ss:$12 sps:$4 sm:$0xff]   ;;  %v9575_v42 = vadd.f32 %v9574_v18, %v9573_v43  ;;  %v10883_v18 = vld [vmem:[%s15332_s1 + $0xec0] ss:$12 sps:$4 sm:$0xff]  }
 0x166   :  { %v13197_v30 = vadd.f32 %v9572_v55, %v5678_v28  ;;  %v9576_v28 = vpop.f32.mrb[34].mxu1  ;;  %v131_v21 = vld [vmem:[%s15331_s0 + $0x280] sm:$0xff] }
 0x167   :  { %5062 = vmatpush1.bf16.msra.mxu0 %v10852_v41  ;;  %v10874_v41 = vld [vmem:[%s15332_s1 + $0xdd0] ss:$12 sps:$4 sm:$0xff]   ;;  %v13217_v43 = vadd.f32 %v9575_v42, %v5683_v53 }
 0x168   :  { %5063 = vmatprep.subr.bf16.mxu0 %v10857_v14  ;;  %9910 = vmatpush3.bf16.msra.mxu1 %v10864_v16  ;;  %v9577_v14 = vpop.f32.mrb[35].mxu1  ;;  %v143_v16 = vld [vmem:[%s15331_s0 + $0x2e0] sm:$0xff] }
 0x169   :  { %9911 = vmatprep.subr.bf16.mxu1 %v10868_v34  ;;  %v9578_v48 = vadd.f32 %v9577_v14, %v9576_v28  ;;  %v13232_v34 = vcombine.low %v107_v37, %v119_v9  ;;  %v9579_v55 = vpop.f32.mrb[36].mxu1  ;;  %v13239_v53 = vcombine.high %v131_v21, %v143_v16  ;;  %v10879_v37 = vld [vmem:[%s15332_s1 + $0xde8] ss:$12 sps:$4 sm:$0xff]   ;;  %v5691_v9 = vadd.f32 %v13033_v61, %v13127_v40  ;;  %v10884_v61 = vld [vmem:[%s15332_s1 + $0xe00] ss:$12 sps:$4 sm:$0xff]  }
 0x16a   :  { %6249 = vmatmul.mubr.bf16.gmra.mrb[164].mxu1 %v13186_v45  ;;  %v10888_v14 = vld [vmem:[%s15332_s1 + $0xed8] ss:$12 sps:$4 sm:$0xff]  }
 0x16b   :  { %5064 = vmatpush1.bf16.msra.mxu0 %v10855_v58  ;;  %6256 = vmatprep.mubr.bf16.mxu1 %v13193_v23  ;;  %v13234_v51 = vadd.f32 %v9578_v48, %v5686_v63  ;;  %v10872_v58 = vld [vmem:[%s15332_s1 + $0x8bc] ss:$12 sps:$4 sm:$0xff]   ;;  %v5694_v63 = vadd.f32 %v13051_v25, %v13127_v40  ;;  %v10882_v25 = vld [vmem:[%s15332_s1 + $0x8ec] ss:$12 sps:$4 sm:$0xff]  }
 0x16c   :  { %5065 = vmatprep.subr.bf16.mxu0 %v10862_v12  ;;  %9912 = vmatpush3.bf16.msra.mxu1 %v10869_v56  ;;  %v10870_v12 = vld [vmem:[%s15332_s1 + $0x8b8] ss:$12 sps:$4 sm:$0xff]   ;;  %v10877_v56 = vld [vmem:[%s15332_s1 + $0x8d4] ss:$12 sps:$4 sm:$0xff]  }
 0x16d   :  { %9913 = vmatprep.subr.bf16.mxu1 %v10873_v59 }
 0x16f   :  { %5066 = vmatpush1.bf16.msra.mxu0 %v10860_v6  ;;  %v9580_v6 = vpop.f32.mrb[37].mxu1 }
 0x170   :  { %5067 = vmatprep.subr.bf16.mxu0 %v10867_v44  ;;  %9914 = vmatpush3.bf16.msra.mxu1 %v10874_v41  ;;  %v9581_v42 = vadd.f32 %v9580_v6, %v9579_v55  ;;  %v9582_v59 = vpop.f32.mrb[38].mxu1  ;;  %v155_v44 = vld [vmem:[%s15331_s0 + $0x340] sm:$0xff]  ;;  %v10894_v6 = vld [vmem:[%s15332_s1 + $0xe30] ss:$12 sps:$4 sm:$0xff]  }
 0x171   :  { %9915 = vmatprep.subr.bf16.mxu1 %v10878_v32  ;;  %v167_v41 = vld [vmem:[%s15331_s0 + $0x3a0] sm:$0xff]  ;;  %v9583_v48 = vpop.f32.mrb[39].mxu1  ;;  %v10875_v32 = vld [vmem:[%s15332_s1 + $0x8d0] ss:$12 sps:$4 sm:$0xff]  }
 0x172   :  { %6257 = vmatmul.mubr.bf16.gmra.mrb[168].mxu1 %v13232_v34  ;;  %v13268_v28 = vadd.f32 %v9581_v42, %v5691_v9  ;;  %v9584_v55 = vadd.f32 %v9583_v48, %v9582_v59  ;;  %v13281_v40 = vcombine.high %v155_v44, %v167_v41  ;;  %v60_v59 = vld [vmem:[%s15331_s0 + $0x48] sm:$0xff] }
 0x173   :  { %5068 = vmatpush1.bf16.msra.mxu0 %v10865_v54  ;;  %6264 = vmatprep.mubr.bf16.mxu1 %v13239_v53  ;;  %v13276_v54 = vcombine.low %v131_v21, %v143_v16  ;;  %v10880_v21 = vld [vmem:[%s15332_s1 + $0x8e8] ss:$12 sps:$4 sm:$0xff]   ;;  %v10893_v16 = vld [vmem:[%s15332_s1 + $0xef0] ss:$12 sps:$4 sm:$0xff]  }
 0x174   :  { %5069 = vmatprep.subr.bf16.mxu0 %v10872_v58  ;;  %9916 = vmatpush3.bf16.msra.mxu1 %v10879_v37  ;;  %v9601_v58 = vpop.f32.mrb[40].mxu1  ;;  %v13286_v37 = vadd.f32 %v9584_v55, %v5694_v63  ;;  %v13317_v55 = vcombine.low %v155_v44, %v167_v41  ;;  %v10890_v41 = vld [vmem:[%s15332_s1 + $0x918] ss:$12 sps:$4 sm:$0xff]  }
 0x175   :  { %9917 = vmatprep.subr.bf16.mxu1 %v10883_v18  ;;  %v9602_v9 = vpop.f32.mrb[41].mxu1  ;;  %v10887_v18 = vld [vmem:[%s15332_s1 + $0x904] ss:$12 sps:$4 sm:$0xff]  }
 0x176   :  { %v9604_v42 = vpop.f32.mrb[42].mxu1 }
 0x177   :  { %5070 = vmatpush1.bf16.msra.mxu0 %v10870_v12  ;;  %v10889_v12 = vld [vmem:[%s15332_s1 + $0xe18] ss:$12 sps:$4 sm:$0xff]   ;;  %v9605_v48 = vpop.f32.mrb[43].mxu1 }
 0x178   :  { %5071 = vmatprep.subr.bf16.mxu0 %v10877_v56  ;;  %9918 = vmatpush3.bf16.msra.mxu1 %v10884_v61  ;;  %v9603_v56 = vadd.f32 %v9602_v9, %v9601_v58  ;;  %v72_v61 = vld [vmem:[%s15331_s0 + $0xa8] sm:$0xff]  ;;  %v9606_v58 = vadd.f32 %v9605_v48, %v9604_v42 }
 0x179   :  { %9919 = vmatprep.subr.bf16.mxu1 %v10888_v14  ;;  %v10904_v14 = vld [vmem:[%s15332_s1 + $0xfc8] ss:$12 sps:$4 sm:$0xff]  }
 0x17a   :  { %6265 = vmatmul.mubr.bf16.gmra.mrb[172].mxu1 %v13276_v54  ;;  %v13309_v63 = vadd.f32 %v9603_v56, %v13174_v60  ;;  %v10892_v60 = vld [vmem:[%s15332_s1 + $0x91c] ss:$12 sps:$4 sm:$0xff]   ;;  %v13325_v9 = vadd.f32 %v9606_v58, %v13179_v20 }
 0x17b   :  { %5072 = vmatpush1.bf16.msra.mxu0 %v10875_v32  ;;  %6272 = vmatprep.mubr.bf16.mxu1 %v13281_v40  ;;  %v10885_v32 = vld [vmem:[%s15332_s1 + $0x900] ss:$12 sps:$4 sm:$0xff]  }
 0x17c   :  { %5073 = vmatprep.subr.bf16.mxu0 %v10882_v25  ;;  %9920 = vmatpush3.bf16.msra.mxu1 %v10889_v12  ;;  %v9607_v25 = vpop.f32.mrb[44].mxu1  ;;  %v13322_v12 = vcombine.high %v60_v59, %v72_v61  ;;  %v84_v20 = vld [vmem:[%s15331_s0 + $0x108] sm:$0xff] }
 0x17d   :  { %9921 = vmatprep.subr.bf16.mxu1 %v10893_v16  ;;  %v9608_v16 = vpop.f32.mrb[45].mxu1  ;;  %v96_v48 = vld [vmem:[%s15331_s0 + $0x168] sm:$0xff] }
 0x17e   :  { %v9610_v56 = vpop.f32.mrb[46].mxu1 }
 0x17f   :  { %5074 = vmatpush1.bf16.msra.mxu0 %v10880_v21  ;;  %v9609_v21 = vadd.f32 %v9608_v16, %v9607_v25  ;;  %v9611_v44 = vpop.f32.mrb[47].mxu1  ;;  %v10895_v16 = vld [vmem:[%s15332_s1 + $0x930] ss:$12 sps:$4 sm:$0xff]  }
 0x180   :  { %5126 = vmatprep.subr.bf16.mxu0 %v10887_v18  ;;  %9922 = vmatpush3.bf16.msra.mxu1 %v10894_v6  ;;  %v9612_v6 = vadd.f32 %v9611_v44, %v9610_v56  ;;  %v9613_v42 = vpop.f32.mrb[48].mxu1 }
 0x181   :  { %9953 = vmatprep.subr.bf16.mxu1 %v10904_v14  ;;  %v13333_v18 = vadd.f32 %v9609_v21, %v13164_v11  ;;  %v9614_v14 = vpop.f32.mrb[49].mxu1 }
 0x182   :  { %5076 = vmatmul.mubr.bf16.vlgmr.msra.gmra.mrb[0].mxu0 %v12570_v13  ;;  %6273 = vmatmul.mubr.bf16.gmra.mrb[176].mxu1 %v13317_v55  ;;  %v10897_v13 = vld [vmem:[%s15332_s1 + $0x934] ss:$12 sps:$4 sm:$0xff]   ;;  %v13347_v11 = vadd.f32 %v9612_v6, %v13181_v7  ;;  %v9616_v58 = vpop.f32.mrb[50].mxu1  ;;  %v13360_v7 = vcombine.high %v84_v20, %v96_v48 }
 0x183   :  { %5127 = vmatpush1.bf16.msra.mxu0 %v10885_v32  ;;  %6313 = vmatprep.mubr.bf16.mxu1 %v13322_v12  ;;  %v9615_v32 = vadd.f32 %v9614_v14, %v9613_v42  ;;  %v9617_v25 = vpop.f32.mrb[51].mxu1 }
 0x184   :  { %5128 = vmatprep.subr.bf16.mxu0 %v10892_v60  ;;  %5085 = vmatprep.mubr.bf16.mxu0 %v12578_v33  ;;  %v13349_v60 = vcombine.low %v60_v59, %v72_v61  ;;  %v9618_v56 = vadd.f32 %v9617_v25, %v9616_v58  ;;  %v9619_v44 = vpop.f32.mrb[52].mxu1  ;;  %v10900_v33 = vld [vmem:[%s15332_s1 + $0x94c] ss:$12 sps:$4 sm:$0xff]   ;;  %v10898_v59 = vld [vmem:[%s15332_s1 + $0x948] ss:$12 sps:$4 sm:$0xff]  }
 0x185   :  { %v13355_v21 = vadd.f32 %v9615_v32, %v13195_v29  ;;  %v9620_v6 = vpop.f32.mrb[53].mxu1  ;;  %v10905_v61 = vld [vmem:[%s15332_s1 + $0xf08] ss:$12 sps:$4 sm:$0xff]   ;;  %v10903_v32 = vld [vmem:[%s15332_s1 + $0x964] ss:$12 sps:$4 sm:$0xff]  }
 0x186   :  { %v13369_v29 = vadd.f32 %v9618_v56, %v13197_v30  ;;  %v9622_v42 = vpop.f32.mrb[54].mxu1  ;;  %v10910_v30 = vld [vmem:[%s15332_s1 + $0xf20] ss:$12 sps:$4 sm:$0xff]  }
 0x187   :  { %5129 = vmatpush1.bf16.msra.mxu0 %v10890_v41  ;;  %v9621_v41 = vadd.f32 %v9620_v6, %v9619_v44  ;;  %v9623_v14 = vpop.f32.mrb[55].mxu1  ;;  %v120_v44 = vld [vmem:[%s15331_s0 + $0x228] sm:$0xff] }
 0x188   :  { %5130 = vmatprep.subr.bf16.mxu0 %v10897_v13  ;;  %v10909_v13 = vld [vmem:[%s15332_s1 + $0xfe0] ss:$12 sps:$4 sm:$0xff]   ;;  %v9624_v25 = vadd.f32 %v9623_v14, %v9622_v42  ;;  %v9625_v56 = vpop.f32.mrb[56].mxu1  ;;  %v13402_v14 = vcombine.low %v84_v20, %v96_v48 }
 0x189   :  { %v13383_v58 = vadd.f32 %v9621_v41, %v13217_v43 }
 0x18a   :  { %5086 = vmatmul.mubr.bf16.gmra.mrb[4].mxu0 %v12609_v47  ;;  %6314 = vmatmul.mubr.bf16.vlgmr.msra.gmra.mrb[180].mxu1 %v13349_v60  ;;  %v108_v47 = vld [vmem:[%s15331_s0 + $0x1c8] sm:$0xff]  ;;  %v13394_v43 = vadd.f32 %v9624_v25, %v13234_v51 }
 0x18b   :  { %5131 = vmatpush1.bf16.msra.mxu0 %v10895_v16  ;;  %6321 = vmatprep.mubr.bf16.mxu1 %v13360_v7  ;;  %v9626_v16 = vpop.f32.mrb[57].mxu1 }
 0x18c   :  { %5132 = vmatprep.subr.bf16.mxu0 %v10900_v33  ;;  %9954 = vmatpush3.bf16.msra.mxu1 %v10905_v61  ;;  %v9627_v6 = vadd.f32 %v9626_v16, %v9625_v56  ;;  %v9628_v41 = vpop.f32.mrb[58].mxu1  ;;  %v10914_v33 = vld [vmem:[%s15332_s1 + $0xff8] ss:$12 sps:$4 sm:$0xff]   ;;  %v10901_v61 = vld [vmem:[%s15332_s1 + $0x960] ss:$12 sps:$4 sm:$0xff]   ;;  %v13410_v56 = vcombine.high %v108_v47, %v120_v44 }
 0x18d   :  { %5095 = vmatprep.mubr.bf16.mxu0 %v12614_v50  ;;  %9955 = vmatprep.subr.bf16.mxu1 %v10909_v13  ;;  %v9629_v42 = vpop.f32.mrb[59].mxu1  ;;  %v10908_v13 = vld [vmem:[%s15332_s1 + $0x97c] ss:$12 sps:$4 sm:$0xff]  }
 0x18e   :  { %v13405_v50 = vadd.f32 %v9627_v6, %v13268_v28  ;;  %v9630_v51 = vadd.f32 %v9629_v42, %v9628_v41  ;;  %v9647_v25 = vpop.f32.mrb[60].mxu1 }
 0x18f   :  { %5133 = vmatpush1.bf16.msra.mxu0 %v10898_v59  ;;  %v9648_v16 = vpop.f32.mrb[61].mxu1  ;;  %v10915_v59 = vld [vmem:[%s15332_s1 + $0xf38] ss:$12 sps:$4 sm:$0xff]  }
 0x190   :  { %5134 = vmatprep.subr.bf16.mxu0 %v10903_v32  ;;  %9956 = vmatpush3.bf16.msra.mxu1 %v10910_v30  ;;  %v13416_v20 = vadd.f32 %v9630_v51, %v13286_v37  ;;  %v9649_v28 = vadd.f32 %v9648_v16, %v9647_v25  ;;  %v9650_v48 = vpop.f32.mrb[62].mxu1  ;;  %v10919_v32 = vld [vmem:[%s15332_s1 + $0x1010] ss:$12 sps:$4 sm:$0xff]   ;;  %v10906_v30 = vld [vmem:[%s15332_s1 + $0x978] ss:$12 sps:$4 sm:$0xff]   ;;  %v144_v51 = vld [vmem:[%s15331_s0 + $0x2e8] sm:$0xff] }
 0x191   :  { %9957 = vmatprep.subr.bf16.mxu1 %v10914_v33  ;;  %v9651_v6 = vpop.f32.mrb[63].mxu1  ;;  %v10920_v33 = vld [vmem:[%s15332_s1 + $0xf50] ss:$12 sps:$4 sm:$0xff]  }
 0x192   :  { %5096 = vmatmul.mubr.bf16.gmra.mrb[8].mxu0 %v12645_v0  ;;  %6322 = vmatmul.mubr.bf16.gmra.mrb[184].mxu1 %v13402_v14  ;;  %v13427_v37 = vadd.f32 %v9649_v28, %v13309_v63  ;;  %v9652_v41 = vadd.f32 %v9651_v6, %v9650_v48  ;;  %v9653_v42 = vpop.f32.mrb[64].mxu1  ;;  %v10913_v0 = vld [vmem:[%s15332_s1 + $0x994] ss:$12 sps:$4 sm:$0xff]   ;;  %v132_v63 = vld [vmem:[%s15331_s0 + $0x288] sm:$0xff]  ;;  %v10911_v48 = vld [vmem:[%s15332_s1 + $0x990] ss:$12 sps:$4 sm:$0xff]   ;;  %v13452_v6 = vcombine.low %v108_v47, %v120_v44 }
 0x193   :  { %5135 = vmatpush1.bf16.msra.mxu0 %v10901_v61  ;;  %6329 = vmatprep.mubr.bf16.mxu1 %v13410_v56  ;;  %v9654_v61 = vpop.f32.mrb[65].mxu1 }
 0x194   :  { %5136 = vmatprep.subr.bf16.mxu0 %v10908_v13  ;;  %9958 = vmatpush3.bf16.msra.mxu1 %v10915_v59  ;;  %v13444_v25 = vadd.f32 %v9652_v41, %v13325_v9  ;;  %v9655_v13 = vadd.f32 %v9654_v61, %v9653_v42  ;;  %v9656_v16 = vpop.f32.mrb[66].mxu1  ;;  %v10924_v59 = vld [vmem:[%s15332_s1 + $0x1028] ss:$12 sps:$4 sm:$0xff]   ;;  %15364 = vst [vmem:[#allocation9_spill] sm:$0xff] %v13452_v6 }
 0x195   :  { %5105 = vmatprep.mubr.bf16.mxu0 %v12650_v52  ;;  %9959 = vmatprep.subr.bf16.mxu1 %v10919_v32  ;;  %v9657_v28 = vpop.f32.mrb[67].mxu1  ;;  %v10918_v32 = vld [vmem:[%s15332_s1 + $0x9ac] ss:$12 sps:$4 sm:$0xff]   ;;  %v13460_v42 = vcombine.high %v132_v63, %v144_v51 }
 0x196   :  { %v13455_v52 = vadd.f32 %v9655_v13, %v13333_v18  ;;  %v9658_v9 = vadd.f32 %v9657_v28, %v9656_v16  ;;  %v9659_v41 = vpop.f32.mrb[68].mxu1  ;;  %v10925_v18 = vld [vmem:[%s15332_s1 + $0xf68] ss:$12 sps:$4 sm:$0xff]   ;;  %v10923_v13 = vld [vmem:[%s15332_s1 + $0x9c4] ss:$12 sps:$4 sm:$0xff]  }
 0x197   :  { %5137 = vmatpush1.bf16.msra.mxu0 %v10906_v30  ;;  %15365 = vst [vmem:[#allocation10_spill] sm:$0xff] %v13460_v42  ;;  %v9660_v61 = vpop.f32.mrb[69].mxu1  ;;  %v10916_v30 = vld [vmem:[%s15332_s1 + $0x9a8] ss:$12 sps:$4 sm:$0xff]   ;;  %v10929_v16 = vld [vmem:[%s15332_s1 + $0x1040] ss:$12 sps:$4 sm:$0xff]  }
 0x198   :  { %5138 = vmatprep.subr.bf16.mxu0 %v10913_v0  ;;  %9960 = vmatpush3.bf16.msra.mxu1 %v10920_v33  ;;  %v13469_v47 = vadd.f32 %v9658_v9, %v13347_v11  ;;  %v9661_v44 = vadd.f32 %v9660_v61, %v9659_v41  ;;  %v9662_v0 = vpop.f32.mrb[70].mxu1  ;;  %v10930_v11 = vld [vmem:[%s15332_s1 + $0xf80] ss:$12 sps:$4 sm:$0xff]  }
 0x199   :  { %9961 = vmatprep.subr.bf16.mxu1 %v10924_v59  ;;  %v9663_v33 = vpop.f32.mrb[71].mxu1  ;;  %v156_v28 = vld [vmem:[%s15331_s0 + $0x348] sm:$0xff] }
 0x19a   :  { %5106 = vmatmul.mubr.bf16.gmra.mrb[12].mxu0 %v12681_v19  ;;  %6330 = vmatmul.mubr.bf16.gmra.mrb[188].mxu1 %v13452_v6  ;;  %v13486_v59 = vadd.f32 %v9661_v44, %v13355_v21  ;;  %v9664_v9 = vadd.f32 %v9663_v33, %v9662_v0  ;;  %v9665_v41 = vpop.f32.mrb[72].mxu1  ;;  %v168_v19 = vld [vmem:[%s15331_s0 + $0x3a8] sm:$0xff]  ;;  %v13502_v33 = vcombine.low %v132_v63, %v144_v51  ;;  %v10939_v63 = vld [vmem:[%s15332_s1 + $0x1070] ss:$12 sps:$4 sm:$0xff]  }
 0x19b   :  { %5139 = vmatpush1.bf16.msra.mxu0 %v10911_v48  ;;  %6337 = vmatprep.mubr.bf16.mxu1 %v13460_v42  ;;  %v10934_v48 = vld [vmem:[%s15332_s1 + $0x1058] ss:$12 sps:$4 sm:$0xff]   ;;  %v9666_v61 = vpop.f32.mrb[73].mxu1  ;;  %v10921_v6 = vld [vmem:[%s15332_s1 + $0x9c0] ss:$12 sps:$4 sm:$0xff]  }
 0x19c   :  { %5140 = vmatprep.subr.bf16.mxu0 %v10918_v32  ;;  %9962 = vmatpush3.bf16.msra.mxu1 %v10925_v18  ;;  %v13500_v21 = vadd.f32 %v9664_v9, %v13369_v29  ;;  %v9667_v32 = vadd.f32 %v9666_v61, %v9665_v41  ;;  %v9668_v44 = vpop.f32.mrb[74].mxu1  ;;  %15366 = vst [vmem:[#allocation11_spill] sm:$0xff] %v13502_v33  ;;  %v10928_v42 = vld [vmem:[%s15332_s1 + $0x9dc] ss:$12 sps:$4 sm:$0xff]   ;;  %v10935_v18 = vld [vmem:[%s15332_s1 + $0xf98] ss:$12 sps:$4 sm:$0xff]  }
 0x19d   :  { %5115 = vmatprep.mubr.bf16.mxu0 %v12686_v22  ;;  %9963 = vmatprep.subr.bf16.mxu1 %v10929_v16  ;;  %v9669_v0 = vpop.f32.mrb[75].mxu1  ;;  %v13513_v41 = vcombine.high %v156_v28, %v168_v19 }
 0x19e   :  { %v13511_v22 = vadd.f32 %v9667_v32, %v13383_v58  ;;  %v9670_v29 = vadd.f32 %v9669_v0, %v9668_v44  ;;  %v9671_v9 = vpop.f32.mrb[76].mxu1  ;;  %v73_v44 = vld [vmem:[%s15331_s0 + $0xb0] sm:$0xff] }
 0x19f   :  { %5141 = vmatpush1.bf16.msra.mxu0 %v10916_v30  ;;  %v9672_v51 = vpop.f32.mrb[77].mxu1  ;;  %v10926_v30 = vld [vmem:[%s15332_s1 + $0x9d8] ss:$12 sps:$4 sm:$0xff]  }
 0x1a0   :  { %5142 = vmatprep.subr.bf16.mxu0 %v10923_v13  ;;  %9964 = vmatpush3.bf16.msra.mxu1 %v10930_v11  ;;  %v13522_v16 = vadd.f32 %v9670_v29, %v13394_v43  ;;  %v9673_v58 = vadd.f32 %v9672_v51, %v9671_v9  ;;  %v9674_v61 = vpop.f32.mrb[78].mxu1  ;;  %v10933_v13 = vld [vmem:[%s15332_s1 + $0x9f4] ss:$12 sps:$4 sm:$0xff]   ;;  %v10940_v11 = vld [vmem:[%s15332_s1 + $0xfb0] ss:$12 sps:$4 sm:$0xff]  }
 0x1a1   :  { %9965 = vmatprep.subr.bf16.mxu1 %v10934_v48  ;;  %v9675_v32 = vpop.f32.mrb[79].mxu1  ;;  %v61_v43 = vld [vmem:[%s15331_s0 + $0x50] sm:$0xff] }
 0x1a2   :  { %5116 = vmatmul.mubr.bf16.gmra.mrb[16].mxu0 %v12719_v36  ;;  %6338 = vmatmul.mubr.bf16.gmra.mrb[192].mxu1 %v13502_v33  ;;  %v9676_v0 = vadd.f32 %v9675_v32, %v9674_v61  ;;  %v9693_v48 = vpop.f32.mrb[80].mxu1  ;;  %v13539_v36 = vadd.f32 %v9673_v58, %v13405_v50  ;;  %v10931_v50 = vld [vmem:[%s15332_s1 + $0x9f0] ss:$12 sps:$4 sm:$0xff]  }
 0x1a3   :  { %5143 = vmatpush1.bf16.msra.mxu0 %v10921_v6  ;;  %6345 = vmatprep.mubr.bf16.mxu1 %v13513_v41  ;;  %v10950_v6 = vld [vmem:[%s15332_s1 + $0x1148] ss:$12 sps:$4 sm:$0xff]   ;;  %v9694_v29 = vpop.f32.mrb[81].mxu1 }
 0x1a4   :  { %5144 = vmatprep.subr.bf16.mxu0 %v10928_v42  ;;  %9966 = vmatpush3.bf16.msra.mxu1 %v10935_v18  ;;  %v9695_v9 = vadd.f32 %v9694_v29, %v9693_v48  ;;  %v9696_v51 = vpop.f32.mrb[82].mxu1  ;;  %v13547_v33 = vadd.f32 %v9676_v0, %v13416_v20  ;;  %v13552_v42 = vcombine.low %v156_v28, %v168_v19  ;;  %v10938_v18 = vld [vmem:[%s15332_s1 + $0xa0c] ss:$12 sps:$4 sm:$0xff]   ;;  %v10943_v48 = vld [vmem:[%s15332_s1 + $0xa24] ss:$12 sps:$4 sm:$0xff]  }
 0x1a5   :  { %5158 = vmatprep.mubr.bf16.mxu0 %v12724_v39  ;;  %9967 = vmatprep.subr.bf16.mxu1 %v10939_v63  ;;  %v9697_v61 = vpop.f32.mrb[83].mxu1  ;;  %v13560_v20 = vcombine.high %v61_v43, %v73_v44 }
 0x1a6   :  { %v9698_v58 = vadd.f32 %v9697_v61, %v9696_v51  ;;  %v9699_v39 = vpop.f32.mrb[84].mxu1  ;;  %v13558_v32 = vadd.f32 %v9695_v9, %v13427_v37  ;;  %v10941_v51 = vld [vmem:[%s15332_s1 + $0xa20] ss:$12 sps:$4 sm:$0xff]  }
 0x1a7   :  { %5145 = vmatpush1.bf16.msra.mxu0 %v10926_v30  ;;  %v9700_v63 = vpop.f32.mrb[85].mxu1  ;;  %v10936_v30 = vld [vmem:[%s15332_s1 + $0xa08] ss:$12 sps:$4 sm:$0xff]  }
 0x1a8   :  { %5146 = vmatprep.subr.bf16.mxu0 %v10933_v13  ;;  %9968 = vmatpush3.bf16.msra.mxu1 %v10940_v11  ;;  %v9701_v28 = vadd.f32 %v9700_v63, %v9699_v39  ;;  %v9702_v19 = vpop.f32.mrb[86].mxu1  ;;  %v13566_v0 = vadd.f32 %v9698_v58, %v13444_v25  ;;  %v85_v13 = vld [vmem:[%s15331_s0 + $0x110] sm:$0xff]  ;;  %v13588_v63 = vcombine.low %v61_v43, %v73_v44  ;;  %v10955_v43 = vld [vmem:[%s15332_s1 + $0x1160] ss:$12 sps:$4 sm:$0xff]  }
 0x1a9   :  { %9999 = vmatprep.subr.bf16.mxu1 %v10950_v6  ;;  %v9703_v37 = vpop.f32.mrb[87].mxu1  ;;  %v97_v11 = vld [vmem:[%s15331_s0 + $0x170] sm:$0xff] }
 0x1aa   :  { %6346 = vmatmul.mubr.bf16.gmra.mrb[196].mxu1 %v13552_v42  ;;  %v9704_v29 = vadd.f32 %v9703_v37, %v9702_v19  ;;  %v9705_v25 = vpop.f32.mrb[88].mxu1  ;;  %v13579_v9 = vadd.f32 %v9701_v28, %v13455_v52  ;;  %v10946_v52 = vld [vmem:[%s15332_s1 + $0xa3c] ss:$12 sps:$4 sm:$0xff]  }
 0x1ab   :  { %5147 = vmatpush1.bf16.msra.mxu0 %v10931_v50  ;;  %6386 = vmatprep.mubr.bf16.mxu1 %v13560_v20  ;;  %v9706_v6 = vpop.f32.mrb[89].mxu1 }
 0x1ac   :  { %5148 = vmatprep.subr.bf16.mxu0 %v10938_v18  ;;  %v9707_v61 = vadd.f32 %v9706_v6, %v9705_v25  ;;  %v9708_v50 = vpop.f32.mrb[90].mxu1  ;;  %v13586_v58 = vadd.f32 %v9704_v29, %v13469_v47  ;;  %v10951_v18 = vld [vmem:[%s15332_s1 + $0x1088] ss:$12 sps:$4 sm:$0xff]   ;;  %v13599_v47 = vcombine.high %v85_v13, %v97_v11 }
 0x1ad   :  { %v9709_v39 = vpop.f32.mrb[91].mxu1 }
 0x1ae   :  { %v9710_v28 = vadd.f32 %v9709_v39, %v9708_v50  ;;  %v9711_v19 = vpop.f32.mrb[92].mxu1  ;;  %v13597_v37 = vadd.f32 %v9707_v61, %v13486_v59  ;;  %15367 = vst [vmem:[#allocation12_spill] sm:$0xff] %v13599_v47  ;;  %v10949_v59 = vld [vmem:[%s15332_s1 + $0xa54] ss:$12 sps:$4 sm:$0xff]  }
 0x1af   :  { %5149 = vmatpush1.bf16.msra.mxu0 %v10936_v30  ;;  %v9712_v44 = vpop.f32.mrb[93].mxu1  ;;  %v10944_v30 = vld [vmem:[%s15332_s1 + $0xa38] ss:$12 sps:$4 sm:$0xff]   ;;  %v10956_v61 = vld [vmem:[%s15332_s1 + $0x10a0] ss:$12 sps:$4 sm:$0xff]   ;;  %v109_v50 = vld [vmem:[%s15331_s0 + $0x1d0] sm:$0xff] }
 0x1b0   :  { %5150 = vmatprep.subr.bf16.mxu0 %v10943_v48  ;;  %v9713_v29 = vadd.f32 %v9712_v44, %v9711_v19  ;;  %v9714_v25 = vpop.f32.mrb[94].mxu1  ;;  %v13608_v6 = vadd.f32 %v9710_v28, %v13500_v21  ;;  %v121_v21 = vld [vmem:[%s15331_s0 + $0x230] sm:$0xff] }
 0x1b1   :  { %v9715_v48 = vpop.f32.mrb[95].mxu1  ;;  %v10947_v19 = vld [vmem:[%s15332_s1 + $0xa50] ss:$12 sps:$4 sm:$0xff]  }
 0x1b2   :  { %6387 = vmatmul.mubr.bf16.vlgmr.msra.gmra.mrb[200].mxu1 %v13588_v63  ;;  %v9716_v39 = vadd.f32 %v9715_v48, %v9714_v25  ;;  %v13624_v28 = vadd.f32 %v9713_v29, %v13511_v22  ;;  %v13636_v22 = vcombine.low %v85_v13, %v97_v11  ;;  %v10961_v29 = vld [vmem:[%s15332_s1 + $0x10b8] ss:$12 sps:$4 sm:$0xff]   ;;  %v10952_v13 = vld [vmem:[%s15332_s1 + $0xa68] ss:$12 sps:$4 sm:$0xff]  }
 0x1b3   :  { %5151 = vmatpush1.bf16.msra.mxu0 %v10941_v51  ;;  %6394 = vmatprep.mubr.bf16.mxu1 %v13599_v47  ;;  %v10960_v51 = vld [vmem:[%s15332_s1 + $0x1178] ss:$12 sps:$4 sm:$0xff]   ;;  %v13644_v47 = vcombine.high %v109_v50, %v121_v21 }
 0x1b4   :  { %5152 = vmatprep.subr.bf16.mxu0 %v10946_v52  ;;  %10000 = vmatpush3.bf16.msra.mxu1 %v10951_v18  ;;  %v13634_v44 = vadd.f32 %v9716_v39, %v13522_v16  ;;  %15368 = vst [vmem:[#allocation13_spill] sm:$0xff] %v13636_v22  ;;  %v10954_v52 = vld [vmem:[%s15332_s1 + $0xa6c] ss:$12 sps:$4 sm:$0xff]   ;;  %v10965_v16 = vld [vmem:[%s15332_s1 + $0x1190] ss:$12 sps:$4 sm:$0xff]  }
 0x1b5   :  { %10001 = vmatprep.subr.bf16.mxu1 %v10955_v43  ;;  %v9717_v25 = vpop.f32.mrb[96].mxu1  ;;  %15369 = vst [vmem:[#allocation14_spill] sm:$0xff] %v13644_v47 }
 0x1b6   :  { %v9718_v48 = vpop.f32.mrb[97].mxu1 }
 0x1b7   :  { %5153 = vmatpush1.bf16.msra.mxu0 %v10944_v30  ;;  %v9719_v18 = vadd.f32 %v9718_v48, %v9717_v25  ;;  %v9720_v43 = vpop.f32.mrb[98].mxu1  ;;  %v10959_v30 = vld [vmem:[%s15332_s1 + $0xa84] ss:$12 sps:$4 sm:$0xff]  }
 0x1b8   :  { %5154 = vmatprep.subr.bf16.mxu0 %v10949_v59  ;;  %10002 = vmatpush3.bf16.msra.mxu1 %v10956_v61  ;;  %v9721_v11 = vpop.f32.mrb[99].mxu1  ;;  %v10966_v25 = vld [vmem:[%s15332_s1 + $0x10d0] ss:$12 sps:$4 sm:$0xff]  }
 0x1b9   :  { %10003 = vmatprep.subr.bf16.mxu1 %v10960_v51  ;;  %v13656_v59 = vadd.f32 %v9719_v18, %v13539_v36  ;;  %v9722_v39 = vadd.f32 %v9721_v11, %v9720_v43  ;;  %v133_v61 = vld [vmem:[%s15331_s0 + $0x290] sm:$0xff]  ;;  %v13678_v43 = vcombine.low %v109_v50, %v121_v21  ;;  %v10962_v50 = vld [vmem:[%s15332_s1 + $0xa98] ss:$12 sps:$4 sm:$0xff]  }
 0x1ba   :  { %6395 = vmatmul.mubr.bf16.gmra.mrb[204].mxu1 %v13636_v22  ;;  %v145_v48 = vld [vmem:[%s15331_s0 + $0x2f0] sm:$0xff] }
 0x1bb   :  { %5155 = vmatpush1.bf16.msra.mxu0 %v10947_v19  ;;  %6402 = vmatprep.mubr.bf16.mxu1 %v13644_v47  ;;  %v10970_v36 = vld [vmem:[%s15332_s1 + $0x11a8] ss:$12 sps:$4 sm:$0xff]   ;;  %v13673_v51 = vadd.f32 %v9722_v39, %v13547_v33  ;;  %v10957_v19 = vld [vmem:[%s15332_s1 + $0xa80] ss:$12 sps:$4 sm:$0xff]   ;;  %v13686_v39 = vcombine.high %v133_v61, %v145_v48 }
 0x1bc   :  { %5156 = vmatprep.subr.bf16.mxu0 %v10954_v52  ;;  %10004 = vmatpush3.bf16.msra.mxu1 %v10961_v29  ;;  %v10964_v52 = vld [vmem:[%s15332_s1 + $0xa9c] ss:$12 sps:$4 sm:$0xff]   ;;  %v10975_v29 = vld [vmem:[%s15332_s1 + $0x11c0] ss:$12 sps:$4 sm:$0xff]  }
 0x1bd   :  { %10005 = vmatprep.subr.bf16.mxu1 %v10965_v16  ;;  %v9739_v18 = vpop.f32.mrb[100].mxu1  ;;  %v10971_v11 = vld [vmem:[%s15332_s1 + $0x10e8] ss:$12 sps:$4 sm:$0xff]  }
 0x1be   :  { %v9740_v33 = vpop.f32.mrb[101].mxu1 }
 0x1bf   :  { %5157 = vmatpush1.bf16.msra.mxu0 %v10952_v13  ;;  %v9741_v16 = vadd.f32 %v9740_v33, %v9739_v18  ;;  %v9742_v13 = vpop.f32.mrb[102].mxu1  ;;  %v10976_v18 = vld [vmem:[%s15332_s1 + $0x1100] ss:$12 sps:$4 sm:$0xff]  }
 0x1c0   :  { %5209 = vmatprep.subr.bf16.mxu0 %v10959_v30  ;;  %10006 = vmatpush3.bf16.msra.mxu1 %v10966_v25  ;;  %v9743_v21 = vpop.f32.mrb[103].mxu1  ;;  %v10969_v30 = vld [vmem:[%s15332_s1 + $0xab4] ss:$12 sps:$4 sm:$0xff]  }
 0x1c1   :  { %10007 = vmatprep.subr.bf16.mxu1 %v10970_v36  ;;  %v13699_v47 = vadd.f32 %v9741_v16, %v13558_v32  ;;  %v9744_v22 = vadd.f32 %v9743_v21, %v9742_v13  ;;  %v169_v25 = vld [vmem:[%s15331_s0 + $0x3b0] sm:$0xff]  ;;  %v10980_v32 = vld [vmem:[%s15332_s1 + $0x11d8] ss:$12 sps:$4 sm:$0xff]  }
 0x1c2   :  { %5159 = vmatmul.mubr.bf16.vlgmr.msra.gmra.mrb[0].mxu0 %v12742_v35  ;;  %6403 = vmatmul.mubr.bf16.gmra.mrb[208].mxu1 %v13678_v43  ;;  %v157_v35 = vld [vmem:[%s15331_s0 + $0x350] sm:$0xff]  ;;  %v10974_v16 = vld [vmem:[%s15332_s1 + $0xacc] ss:$12 sps:$4 sm:$0xff]  }
 0x1c3   :  { %5210 = vmatpush1.bf16.msra.mxu0 %v10957_v19  ;;  %6410 = vmatprep.mubr.bf16.mxu1 %v13686_v39  ;;  %v13716_v36 = vadd.f32 %v9744_v22, %v13566_v0  ;;  %v10967_v19 = vld [vmem:[%s15332_s1 + $0xab0] ss:$12 sps:$4 sm:$0xff]   ;;  %v10981_v0 = vld [vmem:[%s15332_s1 + $0x1118] ss:$12 sps:$4 sm:$0xff]   ;;  %v13730_v13 = vcombine.high %v157_v35, %v169_v25 }
 0x1c4   :  { %5211 = vmatprep.subr.bf16.mxu0 %v10964_v52  ;;  %10008 = vmatpush3.bf16.msra.mxu1 %v10971_v11  ;;  %v13722_v52 = vcombine.low %v133_v61, %v145_v48  ;;  %v10972_v61 = vld [vmem:[%s15332_s1 + $0xac8] ss:$12 sps:$4 sm:$0xff]  }
 0x1c5   :  { %5168 = vmatprep.mubr.bf16.mxu0 %v12750_v38  ;;  %10009 = vmatprep.subr.bf16.mxu1 %v10975_v29  ;;  %v9745_v33 = vpop.f32.mrb[104].mxu1  ;;  %v10985_v38 = vld [vmem:[%s15332_s1 + $0x11f0] ss:$12 sps:$4 sm:$0xff]  }
 0x1c6   :  { %v9746_v22 = vpop.f32.mrb[105].mxu1 }
 0x1c7   :  { %5212 = vmatpush1.bf16.msra.mxu0 %v10962_v50  ;;  %v9747_v11 = vadd.f32 %v9746_v22, %v9745_v33  ;;  %v9748_v29 = vpop.f32.mrb[106].mxu1  ;;  %v10979_v50 = vld [vmem:[%s15332_s1 + $0xae4] ss:$12 sps:$4 sm:$0xff]   ;;  %v13763_v22 = vcombine.low %v157_v35, %v169_v25  ;;  %v10989_v35 = vld [vmem:[%s15332_s1 + $0xb14] ss:$12 sps:$4 sm:$0xff]  }
 0x1c8   :  { %5213 = vmatprep.subr.bf16.mxu0 %v10969_v30  ;;  %10010 = vmatpush3.bf16.msra.mxu1 %v10976_v18  ;;  %v9749_v48 = vpop.f32.mrb[107].mxu1  ;;  %v10986_v33 = vld [vmem:[%s15332_s1 + $0x1130] ss:$12 sps:$4 sm:$0xff]  }
 0x1c9   :  { %10011 = vmatprep.subr.bf16.mxu1 %v10980_v32  ;;  %v13743_v21 = vadd.f32 %v9747_v11, %v13579_v9  ;;  %v9750_v30 = vadd.f32 %v9749_v48, %v9748_v29  ;;  %v62_v18 = vld [vmem:[%s15331_s0 + $0x58] sm:$0xff] }
 0x1ca   :  { %5169 = vmatmul.mubr.bf16.gmra.mrb[4].mxu0 %v12783_v62  ;;  %6411 = vmatmul.mubr.bf16.gmra.mrb[212].mxu1 %v13722_v52  ;;  %v74_v32 = vld [vmem:[%s15331_s0 + $0xb8] sm:$0xff] }
 0x1cb   :  { %5214 = vmatpush1.bf16.msra.mxu0 %v10967_v19  ;;  %6418 = vmatprep.mubr.bf16.mxu1 %v13730_v13  ;;  %v13757_v62 = vadd.f32 %v9750_v30, %v13586_v58  ;;  %v10977_v19 = vld [vmem:[%s15332_s1 + $0xae0] ss:$12 sps:$4 sm:$0xff]   ;;  %v13768_v58 = vcombine.high %v62_v18, %v74_v32  ;;  %v86_v48 = vld [vmem:[%s15331_s0 + $0x118] sm:$0xff]  ;;  %v13792_v30 = vcombine.low %v62_v18, %v74_v32  ;;  %v10995_v32 = vld [vmem:[%s15332_s1 + $0xb44] ss:$12 sps:$4 sm:$0xff]  }
 0x1cc   :  { %5215 = vmatprep.subr.bf16.mxu0 %v10974_v16  ;;  %10012 = vmatpush3.bf16.msra.mxu1 %v10981_v0  ;;  %v10984_v16 = vld [vmem:[%s15332_s1 + $0xafc] ss:$12 sps:$4 sm:$0xff]  }
 0x1cd   :  { %5178 = vmatprep.mubr.bf16.mxu0 %v12788_v5  ;;  %10013 = vmatprep.subr.bf16.mxu1 %v10985_v38  ;;  %v9751_v9 = vpop.f32.mrb[108].mxu1  ;;  %v10982_v5 = vld [vmem:[%s15332_s1 + $0xaf8] ss:$12 sps:$4 sm:$0xff]  }
 0x1ce   :  { %v9752_v11 = vpop.f32.mrb[109].mxu1 }
 0x1cf   :  { %5216 = vmatpush1.bf16.msra.mxu0 %v10972_v61  ;;  %v9753_v0 = vadd.f32 %v9752_v11, %v9751_v9  ;;  %v9754_v29 = vpop.f32.mrb[110].mxu1  ;;  %v10992_v9 = vld [vmem:[%s15332_s1 + $0xb2c] ss:$12 sps:$4 sm:$0xff]  }
 0x1d0   :  { %5217 = vmatprep.subr.bf16.mxu0 %v10979_v50  ;;  %10014 = vmatpush3.bf16.msra.mxu1 %v10986_v33  ;;  %v9755_v38 = vpop.f32.mrb[111].mxu1  ;;  %v98_v50 = vld [vmem:[%s15331_s0 + $0x178] sm:$0xff] }
 0x1d1   :  { %v13778_v25 = vadd.f32 %v9753_v0, %v13597_v37  ;;  %v9756_v61 = vadd.f32 %v9755_v38, %v9754_v29  ;;  %v10987_v33 = vld [vmem:[%s15332_s1 + $0xb10] ss:$12 sps:$4 sm:$0xff]  }
 0x1d2   :  { %5179 = vmatmul.mubr.bf16.gmra.mrb[8].mxu0 %v12821_v46  ;;  %6419 = vmatmul.mubr.bf16.gmra.mrb[216].mxu1 %v13763_v22 }
 0x1d3   :  { %5218 = vmatpush1.bf16.msra.mxu0 %v10977_v19  ;;  %6459 = vmatprep.mubr.bf16.mxu1 %v13768_v58  ;;  %v13789_v46 = vadd.f32 %v9756_v61, %v13608_v6 }
 0x1d4   :  { %5219 = vmatprep.subr.bf16.mxu0 %v10984_v16  ;;  %5188 = vmatprep.mubr.bf16.mxu0 %v12826_v3  ;;  %v13800_v16 = vcombine.high %v86_v48, %v98_v50  ;;  %v10990_v3 = vld [vmem:[%s15332_s1 + $0xb28] ss:$12 sps:$4 sm:$0xff]  }
 0x1d5   :  { %v9757_v37 = vpop.f32.mrb[112].mxu1 }
 0x1d6   :  { %v9758_v19 = vpop.f32.mrb[113].mxu1 }
 0x1d7   :  { %5220 = vmatpush1.bf16.msra.mxu0 %v10982_v5  ;;  %v9759_v6 = vadd.f32 %v9758_v19, %v9757_v37  ;;  %v9760_v11 = vpop.f32.mrb[114].mxu1  ;;  %v110_v5 = vld [vmem:[%s15331_s0 + $0x1d8] sm:$0xff]  ;;  %v13830_v37 = vcombine.low %v86_v48, %v98_v50 }
 0x1d8   :  { %5221 = vmatprep.subr.bf16.mxu0 %v10989_v35  ;;  %v9761_v18 = vpop.f32.mrb[115].mxu1  ;;  %v10998_v35 = vld [vmem:[%s15332_s1 + $0xb5c] ss:$12 sps:$4 sm:$0xff]  }
 0x1d9   :  { %v13810_v0 = vadd.f32 %v9759_v6, %v13624_v28  ;;  %v9762_v29 = vadd.f32 %v9761_v18, %v9760_v11  ;;  %v122_v28 = vld [vmem:[%s15331_s0 + $0x238] sm:$0xff] }
 0x1da   :  { %5189 = vmatmul.mubr.bf16.gmra.mrb[12].mxu0 %v12859_v15  ;;  %6460 = vmatmul.mubr.bf16.vlgmr.msra.gmra.mrb[220].mxu1 %v13792_v30  ;;  %v10993_v15 = vld [vmem:[%s15332_s1 + $0xb40] ss:$12 sps:$4 sm:$0xff]   ;;  %v10996_v6 = vld [vmem:[%s15332_s1 + $0xb58] ss:$12 sps:$4 sm:$0xff]  }
 0x1db   :  { %5222 = vmatpush1.bf16.msra.mxu0 %v10987_v33  ;;  %6467 = vmatprep.mubr.bf16.mxu1 %v13800_v16  ;;  %v13818_v38 = vadd.f32 %v9762_v29, %v13634_v44  ;;  %v13832_v33 = vcombine.high %v110_v5, %v122_v28 }
 0x1dc   :  { %5223 = vmatprep.subr.bf16.mxu0 %v10992_v9  ;;  %5198 = vmatprep.mubr.bf16.mxu0 %v12864_v24  ;;  %v11001_v24 = vld [vmem:[%s15332_s1 + $0xb74] ss:$12 sps:$4 sm:$0xff]  }
 0x1dd   :  { %v9763_v61 = vpop.f32.mrb[116].mxu1 }
 0x1de   :  { %v9764_v44 = vpop.f32.mrb[117].mxu1 }
 0x1df   :  { %5224 = vmatpush1.bf16.msra.mxu0 %v10990_v3  ;;  %v9765_v9 = vadd.f32 %v9764_v44, %v9763_v61  ;;  %v9766_v19 = vpop.f32.mrb[118].mxu1  ;;  %v134_v3 = vld [vmem:[%s15331_s0 + $0x298] sm:$0xff] }
 0x1e0   :  { %5225 = vmatprep.subr.bf16.mxu0 %v10995_v32  ;;  %v9767_v11 = vpop.f32.mrb[119].mxu1  ;;  %v11004_v32 = vld [vmem:[%s15332_s1 + $0xb8c] ss:$12 sps:$4 sm:$0xff]  }
 0x1e1   :  { %v13842_v48 = vadd.f32 %v9765_v9, %v13656_v59  ;;  %v9768_v50 = vadd.f32 %v9767_v11, %v9766_v19  ;;  %v146_v59 = vld [vmem:[%s15331_s0 + $0x2f8] sm:$0xff]  ;;  %v11002_v9 = vld [vmem:[%s15332_s1 + $0xb88] ss:$12 sps:$4 sm:$0xff]  }
 0x1e2   :  { %5199 = vmatmul.mubr.bf16.gmra.mrb[16].mxu0 %v12897_v31  ;;  %6468 = vmatmul.mubr.bf16.gmra.mrb[224].mxu1 %v13830_v37  ;;  %v10999_v31 = vld [vmem:[%s15332_s1 + $0xb70] ss:$12 sps:$4 sm:$0xff]  }
 0x1e3   :  { %5226 = vmatpush1.bf16.msra.mxu0 %v10993_v15  ;;  %6475 = vmatprep.mubr.bf16.mxu1 %v13832_v33  ;;  %v13850_v18 = vadd.f32 %v9768_v50, %v13673_v51  ;;  %v13862_v15 = vcombine.low %v110_v5, %v122_v28  ;;  %v158_v28 = vld [vmem:[%s15331_s0 + $0x358] sm:$0xff] }
 0x1e4   :  { %5227 = vmatprep.subr.bf16.mxu0 %v10998_v35  ;;  %5241 = vmatprep.mubr.bf16.mxu0 %v12904_v8  ;;  %v13864_v35 = vcombine.high %v134_v3, %v146_v59  ;;  %v11007_v8 = vld [vmem:[%s15332_s1 + $0xba4] ss:$12 sps:$4 sm:$0xff]   ;;  %v11010_v50 = vld [vmem:[%s15332_s1 + $0xbbc] ss:$12 sps:$4 sm:$0xff]  }
 0x1e5   :  { %v9785_v29 = vpop.f32.mrb[120].mxu1 }
 0x1e6   :  { %v9786_v51 = vpop.f32.mrb[121].mxu1  ;;  %15370 = vst [vmem:[#allocation15_spill] sm:$0xff] %v13864_v35 }
 0x1e7   :  { %5228 = vmatpush1.bf16.msra.mxu0 %v10996_v6  ;;  %v9787_v61 = vadd.f32 %v9786_v51, %v9785_v29  ;;  %v9788_v44 = vpop.f32.mrb[122].mxu1 }
 0x1e8   :  { %5229 = vmatprep.subr.bf16.mxu0 %v11001_v24  ;;  %v9789_v19 = vpop.f32.mrb[123].mxu1  ;;  %v11005_v24 = vld [vmem:[%s15332_s1 + $0xba0] ss:$12 sps:$4 sm:$0xff]  }
 0x1e9   :  { %v13873_v11 = vadd.f32 %v9787_v61, %v13699_v47  ;;  %v9790_v5 = vadd.f32 %v9789_v19, %v9788_v44  ;;  %v170_v47 = vld [vmem:[%s15331_s0 + $0x3b8] sm:$0xff] }
 0x1ea   :  { %6476 = vmatmul.mubr.bf16.gmra.mrb[228].mxu1 %v13862_v15  ;;  %v11008_v44 = vld [vmem:[%s15332_s1 + $0xbb8] ss:$12 sps:$4 sm:$0xff]  }
 0x1eb   :  { %5230 = vmatpush1.bf16.msra.mxu0 %v10999_v31  ;;  %6483 = vmatprep.mubr.bf16.mxu1 %v13864_v35  ;;  %v13881_v6 = vadd.f32 %v9790_v5, %v13716_v36  ;;  %v13894_v36 = vcombine.high %v158_v28, %v170_v47  ;;  %v11013_v5 = vld [vmem:[%s15332_s1 + $0xbd4] ss:$12 sps:$4 sm:$0xff]  }
 0x1ec   :  { %5231 = vmatprep.subr.bf16.mxu0 %v11004_v32  ;;  %v13892_v32 = vcombine.low %v134_v3, %v146_v59 }
 0x1ed   :  { %v9791_v31 = vpop.f32.mrb[124].mxu1 }
 0x1ee   :  { %v9792_v29 = vpop.f32.mrb[125].mxu1 }
 0x1ef   :  { %5232 = vmatpush1.bf16.msra.mxu0 %v11002_v9  ;;  %v9793_v51 = vadd.f32 %v9792_v29, %v9791_v31  ;;  %v9794_v61 = vpop.f32.mrb[126].mxu1  ;;  %v11011_v9 = vld [vmem:[%s15332_s1 + $0xbd0] ss:$12 sps:$4 sm:$0xff]   ;;  %v13916_v31 = vcombine.low %v158_v28, %v170_v47  ;;  %v11017_v47 = vld [vmem:[%s15332_s1 + $0xc00] ss:$12 sps:$4 sm:$0xff]  }
 0x1f0   :  { %5233 = vmatprep.subr.bf16.mxu0 %v11007_v8  ;;  %v9795_v19 = vpop.f32.mrb[127].mxu1  ;;  %v11016_v8 = vld [vmem:[%s15332_s1 + $0xbec] ss:$12 sps:$4 sm:$0xff]  }
 0x1f1   :  { %v13903_v35 = vadd.f32 %v9793_v51, %v13743_v21  ;;  %v9796_v3 = vadd.f32 %v9795_v19, %v9794_v61  ;;  %v11019_v61 = vld [vmem:[%s15332_s1 + $0xc04] ss:$12 sps:$4 sm:$0xff]  }
 0x1f2   :  { %6484 = vmatmul.mubr.bf16.gmra.mrb[232].mxu1 %v13892_v32 }
 0x1f3   :  { %5234 = vmatpush1.bf16.msra.mxu0 %v11005_v24  ;;  %6491 = vmatprep.mubr.bf16.mxu1 %v13894_v36  ;;  %v13908_v59 = vadd.f32 %v9796_v3, %v13757_v62  ;;  %v11014_v62 = vld [vmem:[%s15332_s1 + $0xbe8] ss:$12 sps:$4 sm:$0xff]  }
 0x1f4   :  { %5235 = vmatprep.subr.bf16.mxu0 %v11010_v50 }
 0x1f5   :  { %v9797_v21 = vpop.f32.mrb[128].mxu1 }
 0x1f6   :  { %v9798_v29 = vpop.f32.mrb[129].mxu1 }
 0x1f7   :  { %5236 = vmatpush1.bf16.msra.mxu0 %v11008_v44  ;;  %v9799_v24 = vadd.f32 %v9798_v29, %v9797_v21  ;;  %v9800_v50 = vpop.f32.mrb[130].mxu1  ;;  %v11022_v44 = vld [vmem:[%s15332_s1 + $0xc1c] ss:$12 sps:$4 sm:$0xff]  }
 0x1f8   :  { %5237 = vmatprep.subr.bf16.mxu0 %v11013_v5  ;;  %v9801_v51 = vpop.f32.mrb[131].mxu1 }
 0x1f9   :  { %v13925_v19 = vadd.f32 %v9799_v24, %v13778_v25  ;;  %v9802_v3 = vadd.f32 %v9801_v51, %v9800_v50  ;;  %v11023_v51 = vld [vmem:[%s15332_s1 + $0xc30] ss:$12 sps:$4 sm:$0xff]  }
 0x1fa   :  { %6492 = vmatmul.mubr.bf16.gmra.mrb[236].mxu1 %v13916_v31 }
 0x1fb   :  { %5238 = vmatpush1.bf16.msra.mxu0 %v11011_v9  ;;  %v13929_v28 = vadd.f32 %v9802_v3, %v13789_v46  ;;  %v11020_v9 = vld [vmem:[%s15332_s1 + $0xc18] ss:$12 sps:$4 sm:$0xff]  }
 0x1fc   :  { %5239 = vmatprep.subr.bf16.mxu0 %v11016_v8  ;;  %v11025_v8 = vld [vmem:[%s15332_s1 + $0xc34] ss:$12 sps:$4 sm:$0xff]  }
 0x1fd   :  { %v9803_v5 = vpop.f32.mrb[132].mxu1 }
 0x1fe   :  { %v9804_v25 = vpop.f32.mrb[133].mxu1 }
 0x1ff   :  { %5240 = vmatpush1.bf16.msra.mxu0 %v11014_v62  ;;  %v9805_v21 = vadd.f32 %v9804_v25, %v9803_v5  ;;  %v9806_v29 = vpop.f32.mrb[134].mxu1 }
 0x200   :  { %5292 = vmatprep.subr.bf16.mxu0 %v11019_v61  ;;  %v9807_v46 = vpop.f32.mrb[135].mxu1 }
 0x201   :  { %v13945_v24 = vadd.f32 %v9805_v21, %v13810_v0  ;;  %v9808_v50 = vadd.f32 %v9807_v46, %v9806_v29  ;;  %v11029_v29 = vld [vmem:[%s15332_s1 + $0xc60] ss:$12 sps:$4 sm:$0xff]  }
 0x202   :  { %5242 = vmatmul.mubr.bf16.vlgmr.msra.gmra.mrb[0].mxu0 %v12922_v2  ;;  %v11028_v2 = vld [vmem:[%s15332_s1 + $0xc4c] ss:$12 sps:$4 sm:$0xff]  }
 0x203   :  { %5293 = vmatpush1.bf16.msra.mxu0 %v11017_v47  ;;  %5251 = vmatprep.mubr.bf16.mxu0 %v12930_v4  ;;  %v13949_v62 = vadd.f32 %v9808_v50, %v13818_v38  ;;  %v11026_v4 = vld [vmem:[%s15332_s1 + $0xc48] ss:$12 sps:$4 sm:$0xff]  }
 0x204   :  { %5294 = vmatprep.subr.bf16.mxu0 %v11022_v44  ;;  %v11031_v44 = vld [vmem:[%s15332_s1 + $0xc64] ss:$12 sps:$4 sm:$0xff]  }
 0x205   :  { %v9809_v61 = vpop.f32.mrb[136].mxu1 }
 0x206   :  { %v9810_v0 = vpop.f32.mrb[137].mxu1 }
 0x207   :  { %5295 = vmatpush1.bf16.msra.mxu0 %v11020_v9  ;;  %v9811_v3 = vadd.f32 %v9810_v0, %v9809_v61  ;;  %v9812_v47 = vpop.f32.mrb[138].mxu1  ;;  %v11034_v9 = vld [vmem:[%s15332_s1 + $0xc7c] ss:$12 sps:$4 sm:$0xff]  }
 0x208   :  { %5296 = vmatprep.subr.bf16.mxu0 %v11025_v8  ;;  %v9813_v38 = vpop.f32.mrb[139].mxu1 }
 0x209   :  { %v13965_v5 = vadd.f32 %v9811_v3, %v13842_v48  ;;  %v9814_v25 = vadd.f32 %v9813_v38, %v9812_v47 }
 0x20a   :  { %5252 = vmatmul.mubr.bf16.gmra.mrb[4].mxu0 %v12965_v57 }
 0x20b   :  { %5297 = vmatpush1.bf16.msra.mxu0 %v11023_v51  ;;  %5261 = vmatprep.mubr.bf16.mxu0 %v12970_v49  ;;  %v13969_v21 = vadd.f32 %v9814_v25, %v13850_v18 }
 0x20c   :  { %5298 = vmatprep.subr.bf16.mxu0 %v11028_v2 }
 0x20d   :  { %v9831_v57 = vpop.f32.mrb[140].mxu1 }
 0x20e   :  { %v9832_v48 = vpop.f32.mrb[141].mxu1 }
 0x20f   :  { %5299 = vmatpush1.bf16.msra.mxu0 %v11026_v4  ;;  %v9833_v46 = vadd.f32 %v9832_v48, %v9831_v57  ;;  %v9834_v8 = vpop.f32.mrb[142].mxu1 }
 0x210   :  { %5300 = vmatprep.subr.bf16.mxu0 %v11031_v44  ;;  %v9835_v50 = vpop.f32.mrb[143].mxu1 }
 0x211   :  { %v13979_v49 = vadd.f32 %v9833_v46, %v13873_v11  ;;  %v9836_v18 = vadd.f32 %v9835_v50, %v9834_v8 }
 0x212   :  { %5262 = vmatmul.mubr.bf16.gmra.mrb[8].mxu0 %v13009_v17 }
 0x213   :  { %21 = vsyncpa [#allocation3], 0  ;;  %5301 = vmatpush1.bf16.msra.mxu0 %v11029_v29  ;;  %v11032_v51 = vld [vmem:[%s15332_s1 + $0xc78] ss:$12 sps:$4 sm:$0xff]   ;;  %5271 = vmatprep.mubr.bf16.mxu0 %v13014_v26  ;;  %v11037_v2 = vld [vmem:[%s15332_s1 + $0xc94] ss:$12 sps:$4 sm:$0xff]   ;;  %v13989_v61 = vadd.f32 %v9836_v18, %v13881_v6 }
 0x214   :  { %5302 = vmatprep.subr.bf16.mxu0 %v11034_v9  ;;  %v11035_v11 = vld [vmem:[%s15332_s1 + $0xc90] ss:$12 sps:$4 sm:$0xff]   ;;  %v11040_v26 = vld [vmem:[%s15332_s1 + $0xcac] ss:$12 sps:$4 sm:$0xff]   ;;  %v11038_v44 = vld [vmem:[%s15332_s1 + $0xca8] ss:$12 sps:$4 sm:$0xff]  }
 0x215   :  { %v9837_v17 = vpop.f32.mrb[144].mxu1  ;;  %v11043_v25 = vld [vmem:[%s15332_s1 + $0xcc4] ss:$12 sps:$4 sm:$0xff]   ;;  %vm6797_vm0 = vcmask 523264   ;;  %vm7765_vm1 = vcmask 654336   ;;  %vm7787_vm2 = vcmask 650240  }
 0x216   :  { %v9838_v0 = vpop.f32.mrb[145].mxu1  ;;  %v11044_v50 = vld [vmem:[%s15332_s1 + $0xcd8] ss:$12 sps:$4 sm:$0xff]   ;;  %v15371_v18 = vld [vmem:[#allocation6_spill] sm:$0xff]  ;;  %vm7950_vm3 = vcmask 1043456   ;;  %vm8371_vm5 = vcmask 516096  }
 0x217   :  { %5303 = vmatpush1.bf16.msra.mxu0 %v11032_v51  ;;  %v9839_v3 = vadd.f32 %v9838_v0, %v9837_v17  ;;  %v9840_v47 = vpop.f32.mrb[146].mxu1  ;;  %v11049_v51 = vld [vmem:[%s15332_s1 + $0xcf4] ss:$12 sps:$4 sm:$0xff]   ;;  %vm11502_vm6 = vmmov 0   ;;  %s11505_s30 = smov [#allocation2]  }
 0x218   :  { %5304 = vmatprep.subr.bf16.mxu0 %v11037_v2  ;;  %v9841_v4 = vpop.f32.mrb[147].mxu1 }
 0x219   :  { %v13999_v6 = vadd.f32 %v9839_v3, %v13903_v35  ;;  %v9842_v38 = vadd.f32 %v9841_v4, %v9840_v47  ;;  %v11041_v35 = vld [vmem:[%s15332_s1 + $0xcc0] ss:$12 sps:$4 sm:$0xff]   ;;  %v11050_v4 = vld [vmem:[%s15332_s1 + $0xd08] ss:$12 sps:$4 sm:$0xff]  }
 0x21a   :  { %5272 = vmatmul.mubr.bf16.gmra.mrb[12].mxu0 %v13049_v1 }
 0x21b   :  { %5305 = vmatpush1.bf16.msra.mxu0 %v11035_v11  ;;  %5281 = vmatprep.mubr.bf16.mxu0 %v13056_v27  ;;  %v14009_v29 = vadd.f32 %v9842_v38, %v13908_v59  ;;  %v11046_v27 = vld [vmem:[%s15332_s1 + $0xcdc] ss:$12 sps:$4 sm:$0xff]   ;;  %v11052_v11 = vld [vmem:[%s15332_s1 + $0xd0c] ss:$12 sps:$4 sm:$0xff]   ;;  %v11055_v38 = vld [vmem:[%s15332_s1 + $0xd24] ss:$12 sps:$4 sm:$0xff]  }
 0x21c   :  { %5306 = vmatprep.subr.bf16.mxu0 %v11040_v26 }
 0x21d   :  { %v9843_v1 = vpop.f32.mrb[148].mxu1 }
 0x21e   :  { %v9844_v9 = vpop.f32.mrb[149].mxu1 }
 0x21f   :  { %5307 = vmatpush1.bf16.msra.mxu0 %v11038_v44  ;;  %v9845_v57 = vadd.f32 %v9844_v9, %v9843_v1  ;;  %v9846_v48 = vpop.f32.mrb[150].mxu1 }
 0x220   :  { %5308 = vmatprep.subr.bf16.mxu0 %v11043_v25  ;;  %v9847_v46 = vpop.f32.mrb[151].mxu1 }
 0x221   :  { %v14019_v59 = vadd.f32 %v9845_v57, %v13925_v19  ;;  %v9848_v8 = vadd.f32 %v9847_v46, %v9846_v48  ;;  %v11047_v19 = vld [vmem:[%s15332_s1 + $0xcf0] ss:$12 sps:$4 sm:$0xff]   ;;  %v11056_v46 = vld [vmem:[%s15332_s1 + $0xd38] ss:$12 sps:$4 sm:$0xff]  }
 0x222   :  { %5282 = vmatmul.mubr.bf16.gmra.mrb[16].mxu0 %v13091_v10 }
 0x223   :  { %5309 = vmatpush1.bf16.msra.mxu0 %v11041_v35  ;;  %5324 = vmatprep.mubr.bf16.mxu0 %v15371_v18  ;;  %v14029_v2 = vadd.f32 %v9848_v8, %v13929_v28  ;;  %v11058_v35 = vld [vmem:[%s15332_s1 + $0xd3c] ss:$12 sps:$4 sm:$0xff]   ;;  %v11061_v8 = vld [vmem:[%s15332_s1 + $0xd54] ss:$12 sps:$4 sm:$0xff]  }
 0x224   :  { %5310 = vmatprep.subr.bf16.mxu0 %v11046_v27 }
 0x225   :  { %v9849_v10 = vpop.f32.mrb[152].mxu1 }
 0x226   :  { %v9850_v17 = vpop.f32.mrb[153].mxu1 }
 0x227   :  { %5311 = vmatpush1.bf16.msra.mxu0 %v11044_v50  ;;  %v9851_v0 = vadd.f32 %v9850_v17, %v9849_v10  ;;  %v9852_v26 = vpop.f32.mrb[154].mxu1  ;;  %v11064_v10 = vld [vmem:[%s15332_s1 + $0xd6c] ss:$12 sps:$4 sm:$0xff]  }
 0x228   :  { %5312 = vmatprep.subr.bf16.mxu0 %v11049_v51  ;;  %v9853_v3 = vpop.f32.mrb[155].mxu1 }
 0x229   :  { %v14038_v47 = vadd.f32 %v9851_v0, %v13945_v24  ;;  %v9854_v28 = vadd.f32 %v9853_v3, %v9852_v26  ;;  %v11053_v24 = vld [vmem:[%s15332_s1 + $0xd20] ss:$12 sps:$4 sm:$0xff]   ;;  %v11062_v26 = vld [vmem:[%s15332_s1 + $0xd68] ss:$12 sps:$4 sm:$0xff]   ;;  %v11067_v3 = vld [vmem:[%s15332_s1 + $0xd84] ss:$12 sps:$4 sm:$0xff]  }
 0x22b   :  { %5313 = vmatpush1.bf16.msra.mxu0 %v11047_v19  ;;  %v14047_v44 = vadd.f32 %v9854_v28, %v13949_v62 }
 0x22c   :  { %5314 = vmatprep.subr.bf16.mxu0 %v11052_v11 }
 0x22d   :  { %v9855_v25 = vpop.f32.mrb[156].mxu1 }
 0x22e   :  { %v9856_v1 = vpop.f32.mrb[157].mxu1 }
 0x22f   :  { %5315 = vmatpush1.bf16.msra.mxu0 %v11050_v4  ;;  %v9857_v9 = vadd.f32 %v9856_v1, %v9855_v25  ;;  %v9858_v27 = vpop.f32.mrb[158].mxu1  ;;  %v11070_v25 = vld [vmem:[%s15332_s1 + $0xd9c] ss:$12 sps:$4 sm:$0xff]  }
 0x230   :  { %5316 = vmatprep.subr.bf16.mxu0 %v11055_v38  ;;  %v9859_v57 = vpop.f32.mrb[159].mxu1 }
 0x231   :  { %v14056_v48 = vadd.f32 %v9857_v9, %v13965_v5  ;;  %v9860_v62 = vadd.f32 %v9859_v57, %v9858_v27  ;;  %v11059_v5 = vld [vmem:[%s15332_s1 + $0xd50] ss:$12 sps:$4 sm:$0xff]   ;;  %v11068_v57 = vld [vmem:[%s15332_s1 + $0xd98] ss:$12 sps:$4 sm:$0xff]  }
 0x232   :  { %v15372_v9 = vld [vmem:[#allocation7_spill] sm:$0xff] }
 0x233   :  { %5317 = vmatpush1.bf16.msra.mxu0 %v11053_v24  ;;  %v14065_v50 = vadd.f32 %v9860_v62, %v13969_v21  ;;  %v15373_v62 = vld [vmem:[#allocation8_spill] sm:$0xff] }
 0x234   :  { %5318 = vmatprep.subr.bf16.mxu0 %v11058_v35 }
 0x235   :  { %v9877_v18 = vpop.f32.mrb[160].mxu1 }
 0x236   :  { %v9878_v51 = vpop.f32.mrb[161].mxu1 }
 0x237   :  { %5319 = vmatpush1.bf16.msra.mxu0 %v11056_v46  ;;  %v9879_v19 = vadd.f32 %v9878_v51, %v9877_v18  ;;  %v9880_v17 = vpop.f32.mrb[162].mxu1  ;;  %v11073_v46 = vld [vmem:[%s15332_s1 + $0xdb4] ss:$12 sps:$4 sm:$0xff]   ;;  %v11076_v51 = vld [vmem:[%s15332_s1 + $0xdcc] ss:$12 sps:$4 sm:$0xff]  }
 0x238   :  { %5320 = vmatprep.subr.bf16.mxu0 %v11061_v8  ;;  %v9881_v11 = vpop.f32.mrb[163].mxu1 }
 0x239   :  { %v14074_v0 = vadd.f32 %v9879_v19, %v13979_v49  ;;  %v9882_v21 = vadd.f32 %v9881_v11, %v9880_v17  ;;  %v11065_v49 = vld [vmem:[%s15332_s1 + $0xd80] ss:$12 sps:$4 sm:$0xff]  }
 0x23b   :  { %5321 = vmatpush1.bf16.msra.mxu0 %v11059_v5  ;;  %v14083_v28 = vadd.f32 %v9882_v21, %v13989_v61  ;;  %v11074_v21 = vld [vmem:[%s15332_s1 + $0xdc8] ss:$12 sps:$4 sm:$0xff]  }
 0x23c   :  { %5322 = vmatprep.subr.bf16.mxu0 %v11064_v10 }
 0x23d   :  { %v9883_v4 = vpop.f32.mrb[164].mxu1 }
 0x23e   :  { %v9884_v38 = vpop.f32.mrb[165].mxu1 }
 0x23f   :  { %5323 = vmatpush1.bf16.msra.mxu0 %v11062_v26  ;;  %v9885_v24 = vadd.f32 %v9884_v38, %v9883_v4  ;;  %v9886_v1 = vpop.f32.mrb[166].mxu1  ;;  %v11079_v26 = vld [vmem:[%s15332_s1 + $0xde4] ss:$12 sps:$4 sm:$0xff]  }
 0x240   :  { %5375 = vmatprep.subr.bf16.mxu0 %v11067_v3  ;;  %v9887_v35 = vpop.f32.mrb[167].mxu1 }
 0x241   :  { %v14093_v61 = vadd.f32 %v9885_v24, %v13999_v6  ;;  %v9888_v27 = vadd.f32 %v9887_v35, %v9886_v1  ;;  %v11071_v6 = vld [vmem:[%s15332_s1 + $0xdb0] ss:$12 sps:$4 sm:$0xff]   ;;  %v11080_v1 = vld [vmem:[%s15332_s1 + $0xdf8] ss:$12 sps:$4 sm:$0xff]  }
 0x242   :  { %5325 = vmatmul.mubr.bf16.vlgmr.msra.gmra.mrb[0].mxu0 %v15372_v9  ;;  %v11085_v9 = vld [vmem:[%s15332_s1 + $0xe14] ss:$12 sps:$4 sm:$0xff]  }
 0x243   :  { %5376 = vmatpush1.bf16.msra.mxu0 %v11065_v49  ;;  %5334 = vmatprep.mubr.bf16.mxu0 %v15373_v62  ;;  %v14103_v8 = vadd.f32 %v9888_v27, %v14009_v29 }
 0x244   :  { %5377 = vmatprep.subr.bf16.mxu0 %v11070_v25 }
 0x245   :  { %v9889_v18 = vpop.f32.mrb[168].mxu1 }
 0x246   :  { %v9890_v5 = vpop.f32.mrb[169].mxu1 }
 0x247   :  { %5378 = vmatpush1.bf16.msra.mxu0 %v11068_v57  ;;  %v9891_v10 = vadd.f32 %v9890_v5, %v9889_v18  ;;  %v9892_v19 = vpop.f32.mrb[170].mxu1 }
 0x248   :  { %5379 = vmatprep.subr.bf16.mxu0 %v11073_v46  ;;  %v9893_v17 = vpop.f32.mrb[171].mxu1 }
 0x249   :  { %v14112_v11 = vadd.f32 %v9891_v10, %v14019_v59  ;;  %v9894_v29 = vadd.f32 %v9893_v17, %v9892_v19 }
 0x24a   :  { %5335 = vmatmul.mubr.bf16.gmra.mrb[4].mxu0 %v13186_v45  ;;  %v11077_v45 = vld [vmem:[%s15332_s1 + $0xde0] ss:$12 sps:$4 sm:$0xff]  }
 0x24b   :  { %5380 = vmatpush1.bf16.msra.mxu0 %v11071_v6  ;;  %5344 = vmatprep.mubr.bf16.mxu0 %v13193_v23  ;;  %v14123_v3 = vadd.f32 %v9894_v29, %v14029_v2  ;;  %v11082_v23 = vld [vmem:[%s15332_s1 + $0xdfc] ss:$12 sps:$4 sm:$0xff]  }
 0x24c   :  { %5381 = vmatprep.subr.bf16.mxu0 %v11076_v51  ;;  %v11086_v6 = vld [vmem:[%s15332_s1 + $0xe28] ss:$12 sps:$4 sm:$0xff]   ;;  %v11091_v51 = vld [vmem:[%s15332_s1 + $0xe44] ss:$12 sps:$4 sm:$0xff]  }
 0x24d   :  { %v9895_v59 = vpop.f32.mrb[172].mxu1 }
 0x24e   :  { %v9896_v4 = vpop.f32.mrb[173].mxu1 }
 0x24f   :  { %5382 = vmatpush1.bf16.msra.mxu0 %v11074_v21  ;;  %v9897_v49 = vadd.f32 %v9896_v4, %v9895_v59  ;;  %v9898_v38 = vpop.f32.mrb[174].mxu1 }
 0x250   :  { %5383 = vmatprep.subr.bf16.mxu0 %v11079_v26  ;;  %v9899_v25 = vpop.f32.mrb[175].mxu1  ;;  %v11092_v26 = vld [vmem:[%s15332_s1 + $0xe58] ss:$12 sps:$4 sm:$0xff]  }
 0x251   :  { %v14132_v24 = vadd.f32 %v9897_v49, %v14038_v47  ;;  %v9900_v2 = vadd.f32 %v9899_v25, %v9898_v38 }
 0x252   :  { %5345 = vmatmul.mubr.bf16.gmra.mrb[8].mxu0 %v13232_v34  ;;  %v11083_v34 = vld [vmem:[%s15332_s1 + $0xe10] ss:$12 sps:$4 sm:$0xff]  }
 0x253   :  { %5384 = vmatpush1.bf16.msra.mxu0 %v11077_v45  ;;  %5354 = vmatprep.mubr.bf16.mxu0 %v13239_v53  ;;  %v14140_v35 = vadd.f32 %v9900_v2, %v14047_v44  ;;  %v11088_v53 = vld [vmem:[%s15332_s1 + $0xe2c] ss:$12 sps:$4 sm:$0xff]   ;;  %v11097_v45 = vld [vmem:[%s15332_s1 + $0xe74] ss:$12 sps:$4 sm:$0xff]  }
 0x254   :  { %5385 = vmatprep.subr.bf16.mxu0 %v11082_v23  ;;  %v11098_v2 = vld [vmem:[%s15332_s1 + $0xe88] ss:$12 sps:$4 sm:$0xff]  }
 0x255   :  { %v9901_v47 = vpop.f32.mrb[176].mxu1 }
 0x256   :  { %v9902_v27 = vpop.f32.mrb[177].mxu1 }
 0x257   :  { %5386 = vmatpush1.bf16.msra.mxu0 %v11080_v1  ;;  %v9903_v57 = vadd.f32 %v9902_v27, %v9901_v47  ;;  %v9904_v62 = vpop.f32.mrb[178].mxu1 }
 0x258   :  { %5387 = vmatprep.subr.bf16.mxu0 %v11085_v9  ;;  %v9905_v44 = vpop.f32.mrb[179].mxu1  ;;  %v11103_v9 = vld [vmem:[%s15332_s1 + $0xea4] ss:$12 sps:$4 sm:$0xff]  }
 0x259   :  { %v14152_v46 = vadd.f32 %v9903_v57, %v14056_v48  ;;  %v9906_v18 = vadd.f32 %v9905_v44, %v9904_v62 }
 0x25a   :  { %5355 = vmatmul.mubr.bf16.gmra.mrb[12].mxu0 %v13276_v54  ;;  %v11089_v54 = vld [vmem:[%s15332_s1 + $0xe40] ss:$12 sps:$4 sm:$0xff]  }
 0x25b   :  { %5388 = vmatpush1.bf16.msra.mxu0 %v11083_v34  ;;  %5364 = vmatprep.mubr.bf16.mxu0 %v13281_v40  ;;  %v14160_v5 = vadd.f32 %v9906_v18, %v14065_v50  ;;  %v11094_v40 = vld [vmem:[%s15332_s1 + $0xe5c] ss:$12 sps:$4 sm:$0xff]   ;;  %v11104_v18 = vld [vmem:[%s15332_s1 + $0xeb8] ss:$12 sps:$4 sm:$0xff]  }
 0x25c   :  { %5389 = vmatprep.subr.bf16.mxu0 %v11088_v53 }
 0x25d   :  { %v9923_v48 = vpop.f32.mrb[180].mxu1 }
 0x25e   :  { %v9924_v10 = vpop.f32.mrb[181].mxu1 }
 0x25f   :  { %5390 = vmatpush1.bf16.msra.mxu0 %v11086_v6  ;;  %v9925_v19 = vadd.f32 %v9924_v10, %v9923_v48  ;;  %v9926_v17 = vpop.f32.mrb[182].mxu1 }
 0x260   :  { %5391 = vmatprep.subr.bf16.mxu0 %v11091_v51  ;;  %v9927_v50 = vpop.f32.mrb[183].mxu1  ;;  %v11109_v51 = vld [vmem:[%s15332_s1 + $0xed4] ss:$12 sps:$4 sm:$0xff]  }
 0x261   :  { %v14172_v29 = vadd.f32 %v9925_v19, %v14074_v0  ;;  %v9928_v21 = vadd.f32 %v9927_v50, %v9926_v17 }
 0x262   :  { %5365 = vmatmul.mubr.bf16.gmra.mrb[16].mxu0 %v13317_v55  ;;  %v11095_v55 = vld [vmem:[%s15332_s1 + $0xe70] ss:$12 sps:$4 sm:$0xff]  }
 0x263   :  { %5392 = vmatpush1.bf16.msra.mxu0 %v11089_v54  ;;  %5407 = vmatprep.mubr.bf16.mxu0 %v13322_v12  ;;  %v14180_v59 = vadd.f32 %v9928_v21, %v14083_v28  ;;  %v11100_v12 = vld [vmem:[%s15332_s1 + $0xe8c] ss:$12 sps:$4 sm:$0xff]   ;;  %v11110_v21 = vld [vmem:[%s15332_s1 + $0xee8] ss:$12 sps:$4 sm:$0xff]  }
 0x264   :  { %5393 = vmatprep.subr.bf16.mxu0 %v11094_v40 }
 0x265   :  { %v9929_v0 = vpop.f32.mrb[184].mxu1 }
 0x266   :  { %v9930_v4 = vpop.f32.mrb[185].mxu1 }
 0x267   :  { %5394 = vmatpush1.bf16.msra.mxu0 %v11092_v26  ;;  %v9931_v23 = vadd.f32 %v9930_v4, %v9929_v0  ;;  %v9932_v49 = vpop.f32.mrb[186].mxu1 }
 0x268   :  { %5395 = vmatprep.subr.bf16.mxu0 %v11097_v45  ;;  %v9933_v28 = vpop.f32.mrb[187].mxu1  ;;  %v11115_v45 = vld [vmem:[%s15332_s1 + $0xf04] ss:$12 sps:$4 sm:$0xff]  }
 0x269   :  { %v14192_v38 = vadd.f32 %v9931_v23, %v14093_v61  ;;  %v9934_v25 = vadd.f32 %v9933_v28, %v9932_v49  ;;  %v11101_v61 = vld [vmem:[%s15332_s1 + $0xea0] ss:$12 sps:$4 sm:$0xff]  }
 0x26b   :  { %5396 = vmatpush1.bf16.msra.mxu0 %v11095_v55  ;;  %v14198_v1 = vadd.f32 %v9934_v25, %v14103_v8  ;;  %v11106_v8 = vld [vmem:[%s15332_s1 + $0xebc] ss:$12 sps:$4 sm:$0xff]   ;;  %v11116_v25 = vld [vmem:[%s15332_s1 + $0xf18] ss:$12 sps:$4 sm:$0xff]  }
 0x26c   :  { %5397 = vmatprep.subr.bf16.mxu0 %v11100_v12 }
 0x26d   :  { %v9935_v47 = vpop.f32.mrb[188].mxu1 }
 0x26e   :  { %v9936_v34 = vpop.f32.mrb[189].mxu1 }
 0x26f   :  { %5398 = vmatpush1.bf16.msra.mxu0 %v11098_v2  ;;  %v9937_v27 = vadd.f32 %v9936_v34, %v9935_v47  ;;  %v9938_v57 = vpop.f32.mrb[190].mxu1 }
 0x270   :  { %5399 = vmatprep.subr.bf16.mxu0 %v11103_v9  ;;  %v9939_v62 = vpop.f32.mrb[191].mxu1  ;;  %v11121_v9 = vld [vmem:[%s15332_s1 + $0xf34] ss:$12 sps:$4 sm:$0xff]  }
 0x271   :  { %v14210_v53 = vadd.f32 %v9937_v27, %v14112_v11  ;;  %v9940_v44 = vadd.f32 %v9939_v62, %v9938_v57  ;;  %v11107_v11 = vld [vmem:[%s15332_s1 + $0xed0] ss:$12 sps:$4 sm:$0xff]  }
 0x273   :  { %5400 = vmatpush1.bf16.msra.mxu0 %v11101_v61  ;;  %v14216_v6 = vadd.f32 %v9940_v44, %v14123_v3  ;;  %v11112_v3 = vld [vmem:[%s15332_s1 + $0xeec] ss:$12 sps:$4 sm:$0xff]   ;;  %v11127_v44 = vld [vmem:[%s15332_s1 + $0xf64] ss:$12 sps:$4 sm:$0xff]  }
 0x274   :  { %5401 = vmatprep.subr.bf16.mxu0 %v11106_v8  ;;  %v11122_v8 = vld [vmem:[%s15332_s1 + $0xf48] ss:$12 sps:$4 sm:$0xff]  }
 0x275   :  { %v9941_v48 = vpop.f32.mrb[192].mxu1 }
 0x276   :  { %v9942_v10 = vpop.f32.mrb[193].mxu1 }
 0x277   :  { %5402 = vmatpush1.bf16.msra.mxu0 %v11104_v18  ;;  %v9943_v54 = vadd.f32 %v9942_v10, %v9941_v48  ;;  %v9944_v19 = vpop.f32.mrb[194].mxu1 }
 0x278   :  { %5403 = vmatprep.subr.bf16.mxu0 %v11109_v51  ;;  %v9945_v17 = vpop.f32.mrb[195].mxu1 }
 0x279   :  { %v14228_v40 = vadd.f32 %v9943_v54, %v14132_v24  ;;  %v9946_v50 = vadd.f32 %v9945_v17, %v9944_v19  ;;  %v11113_v24 = vld [vmem:[%s15332_s1 + $0xf00] ss:$12 sps:$4 sm:$0xff]   ;;  %v11128_v19 = vld [vmem:[%s15332_s1 + $0xf78] ss:$12 sps:$4 sm:$0xff]  }
 0x27a   :  { %v15374_v54 = vld [vmem:[#allocation9_spill] sm:$0xff] }
 0x27b   :  { %5404 = vmatpush1.bf16.msra.mxu0 %v11107_v11  ;;  %v14234_v26 = vadd.f32 %v9946_v50, %v14140_v35  ;;  %v11118_v35 = vld [vmem:[%s15332_s1 + $0xf1c] ss:$12 sps:$4 sm:$0xff]   ;;  %v11133_v50 = vld [vmem:[%s15332_s1 + $0xf94] ss:$12 sps:$4 sm:$0xff]  }
 0x27c   :  { %5405 = vmatprep.subr.bf16.mxu0 %v11112_v3  ;;  %v15375_v3 = vld [vmem:[#allocation10_spill] sm:$0xff] }
 0x27d   :  { %v9947_v0 = vpop.f32.mrb[196].mxu1 }
 0x27e   :  { %v9948_v4 = vpop.f32.mrb[197].mxu1 }
 0x27f   :  { %5406 = vmatpush1.bf16.msra.mxu0 %v11110_v21  ;;  %v9949_v55 = vadd.f32 %v9948_v4, %v9947_v0  ;;  %v9950_v23 = vpop.f32.mrb[198].mxu1 }
 0x280   :  { %5458 = vmatprep.subr.bf16.mxu0 %v11115_v45  ;;  %v9951_v49 = vpop.f32.mrb[199].mxu1  ;;  %v11131_v45 = vld [vmem:[%s15332_s1 + $0xf90] ss:$12 sps:$4 sm:$0xff]  }
 0x281   :  { %v14246_v12 = vadd.f32 %v9949_v55, %v14152_v46  ;;  %v9952_v28 = vadd.f32 %v9951_v49, %v9950_v23  ;;  %v11134_v49 = vld [vmem:[%s15332_s1 + $0xfa8] ss:$12 sps:$4 sm:$0xff]  }
 0x282   :  { %5408 = vmatmul.mubr.bf16.vlgmr.msra.gmra.mrb[0].mxu0 %v13349_v60  ;;  %v11119_v60 = vld [vmem:[%s15332_s1 + $0xf30] ss:$12 sps:$4 sm:$0xff]  }
 0x283   :  { %5459 = vmatpush1.bf16.msra.mxu0 %v11113_v24  ;;  %5417 = vmatprep.mubr.bf16.mxu0 %v13360_v7  ;;  %v14254_v2 = vadd.f32 %v9952_v28, %v14160_v5  ;;  %v11124_v7 = vld [vmem:[%s15332_s1 + $0xf4c] ss:$12 sps:$4 sm:$0xff]  }
 0x284   :  { %5460 = vmatprep.subr.bf16.mxu0 %v11118_v35  ;;  %v15376_v35 = vld [vmem:[#allocation11_spill] sm:$0xff] }
 0x285   :  { %v9969_v46 = vpop.f32.mrb[200].mxu1 }
 0x286   :  { %v9970_v47 = vpop.f32.mrb[201].mxu1 }
 0x287   :  { %5461 = vmatpush1.bf16.msra.mxu0 %v11116_v25  ;;  %v9971_v34 = vadd.f32 %v9970_v47, %v9969_v46  ;;  %v9972_v61 = vpop.f32.mrb[202].mxu1  ;;  %v11139_v25 = vld [vmem:[%s15332_s1 + $0xfc4] ss:$12 sps:$4 sm:$0xff]   ;;  %v11137_v46 = vld [vmem:[%s15332_s1 + $0xfc0] ss:$12 sps:$4 sm:$0xff]  }
 0x288   :  { %5462 = vmatprep.subr.bf16.mxu0 %v11121_v9  ;;  %v9973_v5 = vpop.f32.mrb[203].mxu1 }
 0x289   :  { %v14266_v27 = vadd.f32 %v9971_v34, %v14172_v29  ;;  %v9974_v57 = vadd.f32 %v9973_v5, %v9972_v61  ;;  %v11211_v5 = vld [vmem:[%s15334_s3 + $0x4] ss:$8 sps:$4 sm:$0xff]  }
 0x28a   :  { %5418 = vmatmul.mubr.bf16.gmra.mrb[4].mxu0 %v13402_v14  ;;  %v11125_v14 = vld [vmem:[%s15332_s1 + $0xf60] ss:$12 sps:$4 sm:$0xff]   ;;  %6813 = vmatprep.subr.bf16.mxu1 %v11211_v5 }
 0x28b   :  { %5463 = vmatpush1.bf16.msra.mxu0 %v11119_v60  ;;  %5427 = vmatprep.mubr.bf16.mxu0 %v13410_v56  ;;  %v14274_v62 = vadd.f32 %v9974_v57, %v14180_v59  ;;  %v11130_v56 = vld [vmem:[%s15332_s1 + $0xf7c] ss:$12 sps:$4 sm:$0xff]   ;;  %v11140_v57 = vld [vmem:[%s15332_s1 + $0xfd8] ss:$12 sps:$4 sm:$0xff]  }
 0x28c   :  { %5464 = vmatprep.subr.bf16.mxu0 %v11124_v7  ;;  %v11209_v7 = vld [vmem:[%s15334_s3] ss:$8 sps:$4 sm:$0xff]  }
 0x28d   :  { %v9975_v29 = vpop.f32.mrb[204].mxu1  ;;  %6814 = vmatpush1.bf16.msra.mxu1 %v11209_v7 }
 0x28e   :  { %v9976_v18 = vpop.f32.mrb[205].mxu1 }
 0x28f   :  { %5465 = vmatpush1.bf16.msra.mxu0 %v11122_v8  ;;  %v9977_v51 = vadd.f32 %v9976_v18, %v9975_v29  ;;  %v9978_v48 = vpop.f32.mrb[206].mxu1  ;;  %v11145_v8 = vld [vmem:[%s15332_s1 + $0xff4] ss:$12 sps:$4 sm:$0xff]  }
 0x290   :  { %5466 = vmatprep.subr.bf16.mxu0 %v11127_v44  ;;  %v9979_v59 = vpop.f32.mrb[207].mxu1  ;;  %v11212_v44 = vld [vmem:[%s15334_s3 + $0x10] ss:$8 sps:$4 sm:$0xff]  }
 0x291   :  { %v14286_v10 = vadd.f32 %v9977_v51, %v14192_v38  ;;  %v9980_v11 = vadd.f32 %v9979_v59, %v9978_v48  ;;  %v11148_v48 = vld [vmem:[%s15332_s1 + $0x100c] ss:$12 sps:$4 sm:$0xff]   ;;  %v11215_v59 = vld [vmem:[%s15334_s3 + $0x20] ss:$8 sps:$4 sm:$0xff]  }
 0x292   :  { %5428 = vmatmul.mubr.bf16.gmra.mrb[8].mxu0 %v15374_v54 }
 0x293   :  { %5467 = vmatpush1.bf16.msra.mxu0 %v11125_v14  ;;  %5437 = vmatprep.mubr.bf16.mxu0 %v15375_v3  ;;  %v14294_v17 = vadd.f32 %v9980_v11, %v14198_v1  ;;  %v11136_v1 = vld [vmem:[%s15332_s1 + $0xfac] ss:$12 sps:$4 sm:$0xff]   ;;  %v11146_v3 = vld [vmem:[%s15332_s1 + $0x1008] ss:$12 sps:$4 sm:$0xff]  }
 0x294   :  { %5468 = vmatprep.subr.bf16.mxu0 %v11130_v56 }
 0x295   :  { %v9981_v38 = vpop.f32.mrb[208].mxu1 }
 0x296   :  { %v9982_v21 = vpop.f32.mrb[209].mxu1 }
 0x297   :  { %5469 = vmatpush1.bf16.msra.mxu0 %v11128_v19  ;;  %v9983_v0 = vadd.f32 %v9982_v21, %v9981_v38  ;;  %v9984_v4 = vpop.f32.mrb[210].mxu1  ;;  %v11220_v19 = vld [vmem:[%s15334_s3 + $0x34] ss:$8 sps:$4 sm:$0xff]   ;;  %v11218_v38 = vld [vmem:[%s15334_s3 + $0x30] ss:$8 sps:$4 sm:$0xff]  }
 0x298   :  { %5470 = vmatprep.subr.bf16.mxu0 %v11133_v50  ;;  %v9985_v24 = vpop.f32.mrb[211].mxu1 }
 0x299   :  { %v14306_v55 = vadd.f32 %v9983_v0, %v14210_v53  ;;  %v9986_v23 = vadd.f32 %v9985_v24, %v9984_v4  ;;  %v11154_v24 = vld [vmem:[%s15332_s1 + $0x103c] ss:$12 sps:$4 sm:$0xff]  }
 0x29a   :  { %5438 = vmatmul.mubr.bf16.gmra.mrb[12].mxu0 %v15376_v35  ;;  %v11221_v35 = vld [vmem:[%s15334_s3 + $0x40] ss:$8 sps:$4 sm:$0xff]  }
 0x29b   :  { %5471 = vmatpush1.bf16.msra.mxu0 %v11131_v45  ;;  %5447 = vmatprep.mubr.bf16.mxu0 %v13513_v41  ;;  %v14314_v28 = vadd.f32 %v9986_v23, %v14216_v6  ;;  %v11142_v41 = vld [vmem:[%s15332_s1 + $0xfdc] ss:$12 sps:$4 sm:$0xff]   ;;  %v11223_v45 = vld [vmem:[%s15334_s3 + $0x44] ss:$8 sps:$4 sm:$0xff]  }
 0x29c   :  { %5472 = vmatprep.subr.bf16.mxu0 %v11136_v1 }
 0x29d   :  { %v9987_v53 = vpop.f32.mrb[212].mxu1 }
 0x29e   :  { %v9988_v9 = vpop.f32.mrb[213].mxu1 }
 0x29f   :  { %5473 = vmatpush1.bf16.msra.mxu0 %v11134_v49  ;;  %v9989_v47 = vadd.f32 %v9988_v9, %v9987_v53  ;;  %v9990_v60 = vpop.f32.mrb[214].mxu1  ;;  %v11226_v53 = vld [vmem:[%s15334_s3 + $0x54] ss:$8 sps:$4 sm:$0xff]   ;;  %v11152_v9 = vld [vmem:[%s15332_s1 + $0x1038] ss:$12 sps:$4 sm:$0xff]  }
 0x2a0   :  { %5474 = vmatprep.subr.bf16.mxu0 %v11139_v25  ;;  %v9991_v6 = vpop.f32.mrb[215].mxu1 }
 0x2a1   :  { %v14326_v34 = vadd.f32 %v9989_v47, %v14228_v40  ;;  %v9992_v61 = vadd.f32 %v9991_v6, %v9990_v60  ;;  %v11214_v40 = vld [vmem:[%s15334_s3 + $0x14] ss:$8 sps:$4 sm:$0xff]  }
 0x2a2   :  { %5448 = vmatmul.mubr.bf16.gmra.mrb[16].mxu0 %v13552_v42  ;;  %6815 = vmatprep.subr.bf16.mxu1 %v11214_v40  ;;  %v11157_v47 = vld [vmem:[%s15332_s1 + $0x1054] ss:$12 sps:$4 sm:$0xff]  }
 0x2a3   :  { %5475 = vmatpush1.bf16.msra.mxu0 %v11137_v46  ;;  %5490 = vmatprep.mubr.bf16.mxu0 %v13560_v20  ;;  %v14343_v42 = vadd.f32 %v9992_v61, %v14234_v26  ;;  %v11217_v20 = vld [vmem:[%s15334_s3 + $0x24] ss:$8 sps:$4 sm:$0xff]   ;;  %v11143_v26 = vld [vmem:[%s15332_s1 + $0xff0] ss:$12 sps:$4 sm:$0xff]  }
 0x2a4   :  { %5476 = vmatprep.subr.bf16.mxu0 %v11142_v41  ;;  %6816 = vmatpush1.bf16.msra.mxu1 %v11212_v44  ;;  %v11229_v61 = vld [vmem:[%s15334_s3 + $0x64] ss:$8 sps:$4 sm:$0xff]  }
 0x2a5   :  { %v9993_v29 = vpop.f32.mrb[216].mxu1  ;;  %6817 = vmatprep.subr.bf16.mxu1 %v11217_v20 }
 0x2a6   :  { %v9994_v18 = vpop.f32.mrb[217].mxu1 }
 0x2a7   :  { %5477 = vmatpush1.bf16.msra.mxu0 %v11140_v57  ;;  %v9995_v14 = vadd.f32 %v9994_v18, %v9993_v29  ;;  %v9996_v51 = vpop.f32.mrb[218].mxu1  ;;  %v11227_v29 = vld [vmem:[%s15334_s3 + $0x60] ss:$8 sps:$4 sm:$0xff]  }
 0x2a8   :  { %5478 = vmatprep.subr.bf16.mxu0 %v11145_v8  ;;  %v9997_v56 = vpop.f32.mrb[219].mxu1  ;;  %6818 = vmatpush1.bf16.msra.mxu1 %v11215_v59  ;;  %v11160_v8 = vld [vmem:[%s15332_s1 + $0x106c] ss:$12 sps:$4 sm:$0xff]  }
 0x2a9   :  { %v14364_v11 = vadd.f32 %v9995_v14, %v14246_v12  ;;  %v9998_v54 = vadd.f32 %v9997_v56, %v9996_v51  ;;  %v11151_v12 = vld [vmem:[%s15332_s1 + $0x1024] ss:$12 sps:$4 sm:$0xff]   ;;  %6819 = vmatprep.subr.bf16.mxu1 %v11220_v19  ;;  %v11158_v14 = vld [vmem:[%s15332_s1 + $0x1068] ss:$12 sps:$4 sm:$0xff]  }
 0x2aa   :  { %v11235_v19 = vld [vmem:[%s15334_s3 + $0x84] ss:$8 sps:$4 sm:$0xff]  }
 0x2ab   :  { %5479 = vmatpush1.bf16.msra.mxu0 %v11143_v26  ;;  %v14373_v50 = vadd.f32 %v9998_v54, %v14254_v2  ;;  %v11149_v2 = vld [vmem:[%s15332_s1 + $0x1020] ss:$12 sps:$4 sm:$0xff]   ;;  %v11232_v26 = vld [vmem:[%s15334_s3 + $0x74] ss:$8 sps:$4 sm:$0xff]  }
 0x2ac   :  { %5480 = vmatprep.subr.bf16.mxu0 %v11148_v48  ;;  %6820 = vmatpush1.bf16.msra.mxu1 %v11218_v38  ;;  %v11163_v48 = vld [vmem:[%s15332_s1 + $0x1084] ss:$12 sps:$4 sm:$0xff]  }
 0x2ad   :  { %v10015_v21 = vpop.f32.mrb[220].mxu1  ;;  %6821 = vmatprep.subr.bf16.mxu1 %v11223_v45  ;;  %v11166_v45 = vld [vmem:[%s15332_s1 + $0x109c] ss:$12 sps:$4 sm:$0xff]  }
 0x2ae   :  { %v10016_v0 = vpop.f32.mrb[221].mxu1 }
 0x2af   :  { %5481 = vmatpush1.bf16.msra.mxu0 %v11146_v3  ;;  %v10017_v4 = vadd.f32 %v10016_v0, %v10015_v21  ;;  %v10018_v1 = vpop.f32.mrb[222].mxu1 }
 0x2b0   :  { %5482 = vmatprep.subr.bf16.mxu0 %v11151_v12  ;;  %v10019_v23 = vpop.f32.mrb[223].mxu1  ;;  %6822 = vmatpush1.bf16.msra.mxu1 %v11221_v35  ;;  %v15377_v35 = vld [vmem:[#allocation12_spill] sm:$0xff] }
 0x2b1   :  { %v6462_v49 = vadd.f32 %v10017_v4, %v14266_v27  ;;  %v10020_v25 = vadd.f32 %v10019_v23, %v10018_v1  ;;  %v11224_v27 = vld [vmem:[%s15334_s3 + $0x50] ss:$8 sps:$4 sm:$0xff]   ;;  %6823 = vmatprep.subr.bf16.mxu1 %v11226_v53 }
 0x2b2   :  { %v11164_v23 = vld [vmem:[%s15332_s1 + $0x1098] ss:$12 sps:$4 sm:$0xff]  }
 0x2b3   :  { %5483 = vmatpush1.bf16.msra.mxu0 %v11149_v2  ;;  %v6465_v46 = vadd.f32 %v10020_v25, %v14274_v62  ;;  %v6502_v60 = vmax.f32 %v6462_v49, 0.0  ;;  %v11155_v62 = vld [vmem:[%s15332_s1 + $0x1050] ss:$12 sps:$4 sm:$0xff]   ;;  %v11233_v2 = vld [vmem:[%s15334_s3 + $0x80] ss:$8 sps:$4 sm:$0xff]  }
 0x2b4   :  { %5484 = vmatprep.subr.bf16.mxu0 %v11154_v24  ;;  %6824 = vmatpush1.bf16.msra.mxu1 %v11224_v27  ;;  %v11238_v24 = vld [vmem:[%s15334_s3 + $0x94] ss:$8 sps:$4 sm:$0xff]  }
 0x2b5   :  { %v6505_v41 = vmax.f32 %v6465_v46, 0.0  ;;  %v10021_v6 = vpop.f32.mrb[224].mxu1  ;;  %6825 = vmatprep.subr.bf16.mxu1 %v11229_v61  ;;  %v11241_v46 = vld [vmem:[%s15334_s3 + $0xa4] ss:$8 sps:$4 sm:$0xff]  }
 0x2b6   :  { %v10022_v7 = vpop.f32.mrb[225].mxu1 }
 0x2b7   :  { %5485 = vmatpush1.bf16.msra.mxu0 %v11152_v9  ;;  %v14413_v5 = vpack.c.bf16 %v6505_v41, %v6502_v60  ;;  %v10023_v57 = vadd.f32 %v10022_v7, %v10021_v6  ;;  %v10024_v40 = vpop.f32.mrb[226].mxu1  ;;  %v11172_v6 = vld [vmem:[%s15332_s1 + $0x10cc] ss:$12 sps:$4 sm:$0xff]   ;;  %v11239_v7 = vld [vmem:[%s15334_s3 + $0xa0] ss:$8 sps:$4 sm:$0xff]  }
 0x2b8   :  { %5486 = vmatprep.subr.bf16.mxu0 %v11157_v47  ;;  %v10025_v44 = vpop.f32.mrb[227].mxu1  ;;  %6826 = vmatpush1.bf16.msra.mxu1 %v11227_v29  ;;  %v15379_v29 = vld [vmem:[#allocation14_spill] sm:$0xff] }
 0x2b9   :  { %v6470_v20 = vadd.f32 %v10023_v57, %v14286_v10  ;;  %v10026_v18 = vadd.f32 %v10025_v44, %v10024_v40  ;;  %v11230_v10 = vld [vmem:[%s15334_s3 + $0x70] ss:$8 sps:$4 sm:$0xff]   ;;  %6827 = vmatprep.subr.bf16.mxu1 %v11232_v26  ;;  %v15378_v40 = vld [vmem:[#allocation13_spill] sm:$0xff] }
 0x2ba   :  { %v11170_v44 = vld [vmem:[%s15332_s1 + $0x10c8] ss:$12 sps:$4 sm:$0xff]  }
 0x2bb   :  { %5487 = vmatpush1.bf16.msra.mxu0 %v11155_v62  ;;  %v6473_v51 = vadd.f32 %v10026_v18, %v14294_v17  ;;  %v6508_v56 = vmax.f32 %v6470_v20, 0.0  ;;  %v11161_v17 = vld [vmem:[%s15332_s1 + $0x1080] ss:$12 sps:$4 sm:$0xff]   ;;  %v11242_v18 = vld [vmem:[%s15334_s3 + $0xb0] ss:$8 sps:$4 sm:$0xff]  }
 0x2bc   :  { %5488 = vmatprep.subr.bf16.mxu0 %v11160_v8  ;;  %6828 = vmatpush1.bf16.msra.mxu1 %v11230_v10  ;;  %v11244_v8 = vld [vmem:[%s15334_s3 + $0xb4] ss:$8 sps:$4 sm:$0xff]  }
 0x2bd   :  { %v6511_v59 = vmax.f32 %v6473_v51, 0.0  ;;  %v10027_v54 = vpop.f32.mrb[228].mxu1  ;;  %6829 = vmatprep.subr.bf16.mxu1 %v11235_v19  ;;  %v11178_v19 = vld [vmem:[%s15332_s1 + $0x10fc] ss:$12 sps:$4 sm:$0xff]  }
 0x2be   :  { %v10028_v3 = vpop.f32.mrb[229].mxu1 }
 0x2bf   :  { %5489 = vmatpush1.bf16.msra.mxu0 %v11158_v14  ;;  %v14441_v12 = vpack.c.bf16 %v6511_v59, %v6508_v56  ;;  %v10029_v38 = vadd.f32 %v10028_v3, %v10027_v54  ;;  %v10030_v21 = vpop.f32.mrb[230].mxu1 }
 0x2c0   :  { %5541 = vmatprep.subr.bf16.mxu0 %v11163_v48  ;;  %v10031_v0 = vpop.f32.mrb[231].mxu1  ;;  %6830 = vmatpush1.bf16.msra.mxu1 %v11233_v2  ;;  %v11247_v48 = vld [vmem:[%s15334_s3 + $0xc4] ss:$8 sps:$4 sm:$0xff]  }
 0x2c1   :  { %v6478_v4 = vadd.f32 %v10029_v38, %v14306_v55  ;;  %v10032_v1 = vadd.f32 %v10031_v0, %v10030_v21  ;;  %v11169_v55 = vld [vmem:[%s15332_s1 + $0x10b4] ss:$12 sps:$4 sm:$0xff]   ;;  %6831 = vmatprep.subr.bf16.mxu1 %v11238_v24  ;;  %v11176_v0 = vld [vmem:[%s15332_s1 + $0x10f8] ss:$12 sps:$4 sm:$0xff]  }
 0x2c2   :  { %5491 = vmatmul.mubr.bf16.vlgmr.msra.gmra.mrb[0].mxu0 %v13588_v63  ;;  %v11236_v63 = vld [vmem:[%s15334_s3 + $0x90] ss:$8 sps:$4 sm:$0xff]  }
 0x2c3   :  { %5542 = vmatpush1.bf16.msra.mxu0 %v11161_v17  ;;  %5500 = vmatprep.mubr.bf16.mxu0 %v15377_v35  ;;  %v6481_v49 = vadd.f32 %v10032_v1, %v14314_v28  ;;  %v6514_v25 = vmax.f32 %v6478_v4, 0.0  ;;  %v11167_v28 = vld [vmem:[%s15332_s1 + $0x10b0] ss:$12 sps:$4 sm:$0xff]   ;;  %v11245_v17 = vld [vmem:[%s15334_s3 + $0xc0] ss:$8 sps:$4 sm:$0xff]  }
 0x2c4   :  { %5543 = vmatprep.subr.bf16.mxu0 %v11166_v45  ;;  %6832 = vmatpush1.bf16.msra.mxu1 %v11236_v63  ;;  %v11250_v45 = vld [vmem:[%s15334_s3 + $0xd4] ss:$8 sps:$4 sm:$0xff]   ;;  %v11187_v35 = vld [vmem:[%s15332_s1 + $0x1144] ss:$12 sps:$4 sm:$0xff]  }
 0x2c5   :  { %v6517_v53 = vmax.f32 %v6481_v49, 0.0  ;;  %v10033_v9 = vpop.f32.mrb[232].mxu1  ;;  %6833 = vmatprep.subr.bf16.mxu1 %v11241_v46  ;;  %v11185_v49 = vld [vmem:[%s15332_s1 + $0x1140] ss:$12 sps:$4 sm:$0xff]   ;;  %v11191_v63 = vld [vmem:[%s15332_s1 + $0x1170] ss:$12 sps:$4 sm:$0xff]  }
 0x2c6   :  { %v10034_v47 = vpop.f32.mrb[233].mxu1  ;;  %v11200_v46 = vld [vmem:[%s15332_s1 + $0x11b8] ss:$12 sps:$4 sm:$0xff]  }
 0x2c7   :  { %5544 = vmatpush1.bf16.msra.mxu0 %v11164_v23  ;;  %v14471_v27 = vpack.c.bf16 %v6517_v53, %v6514_v25  ;;  %v10035_v60 = vadd.f32 %v10034_v47, %v10033_v9  ;;  %v10036_v41 = vpop.f32.mrb[234].mxu1  ;;  %v11182_v23 = vld [vmem:[%s15332_s1 + $0x1128] ss:$12 sps:$4 sm:$0xff]   ;;  %v11199_v25 = vld [vmem:[%s15332_s1 + $0x11a4] ss:$12 sps:$4 sm:$0xff]  }
 0x2c8   :  { %5545 = vmatprep.subr.bf16.mxu0 %v11169_v55  ;;  %v10037_v61 = vpop.f32.mrb[235].mxu1  ;;  %6834 = vmatpush1.bf16.msra.mxu1 %v11239_v7  ;;  %v11193_v55 = vld [vmem:[%s15332_s1 + $0x1174] ss:$12 sps:$4 sm:$0xff]   ;;  %v11202_v9 = vld [vmem:[%s15332_s1 + $0x11bc] ss:$12 sps:$4 sm:$0xff]  }
 0x2c9   :  { %v6486_v62 = vadd.f32 %v10035_v60, %v14326_v34  ;;  %v10038_v57 = vadd.f32 %v10037_v61, %v10036_v41  ;;  %v11175_v34 = vld [vmem:[%s15332_s1 + $0x10e4] ss:$12 sps:$4 sm:$0xff]   ;;  %6835 = vmatprep.subr.bf16.mxu1 %v11244_v8  ;;  %v11197_v53 = vld [vmem:[%s15332_s1 + $0x11a0] ss:$12 sps:$4 sm:$0xff]   ;;  %v11206_v41 = vld [vmem:[%s15332_s1 + $0x11e8] ss:$12 sps:$4 sm:$0xff]  }
 0x2ca   :  { %5501 = vmatmul.mubr.bf16.gmra.mrb[4].mxu0 %v15378_v40  ;;  %v11205_v47 = vld [vmem:[%s15332_s1 + $0x11d4] ss:$12 sps:$4 sm:$0xff]   ;;  %v11208_v60 = vld [vmem:[%s15332_s1 + $0x11ec] ss:$12 sps:$4 sm:$0xff]  }
 0x2cb   :  { %5546 = vmatpush1.bf16.msra.mxu0 %v11167_v28  ;;  %5510 = vmatprep.mubr.bf16.mxu0 %v15379_v29  ;;  %v6489_v20 = vadd.f32 %v10038_v57, %v14343_v42  ;;  %v6520_v26 = vmax.f32 %v6486_v62, 0.0  ;;  %v11173_v42 = vld [vmem:[%s15332_s1 + $0x10e0] ss:$12 sps:$4 sm:$0xff]   ;;  %v11203_v28 = vld [vmem:[%s15332_s1 + $0x11d0] ss:$12 sps:$4 sm:$0xff]  }
 0x2cc   :  { %5547 = vmatprep.subr.bf16.mxu0 %v11172_v6  ;;  %6836 = vmatpush1.bf16.msra.mxu1 %v11242_v18  ;;  %v15380_v6 = vld [vmem:[#allocation15_spill] sm:$0xff]  ;;  %v11475_v7 = vld [vmem:[%s15333_s2] sm:$0x7] }
 0x2cd   :  { %v6523_v14 = vmax.f32 %v6489_v20, 0.0  ;;  %v10039_v51 = vpop.f32.mrb[236].mxu1  ;;  %6837 = vmatprep.subr.bf16.mxu1 %v11247_v48 }
 0x2ce   :  { %v10040_v10 = vpop.f32.mrb[237].mxu1 }
 0x2cf   :  { %5548 = vmatpush1.bf16.msra.mxu0 %v11170_v44  ;;  %v14501_v56 = vpack.c.bf16 %v6523_v14, %v6520_v26  ;;  %v10041_v59 = vadd.f32 %v10040_v10, %v10039_v51  ;;  %v10042_v54 = vpop.f32.mrb[238].mxu1 }
 0x2d0   :  { %5549 = vmatprep.subr.bf16.mxu0 %v11175_v34  ;;  %v10043_v3 = vpop.f32.mrb[239].mxu1  ;;  %6838 = vmatpush1.bf16.msra.mxu1 %v11245_v17 }
 0x2d1   :  { %v6494_v38 = vadd.f32 %v10041_v59, %v14364_v11  ;;  %v10044_v21 = vadd.f32 %v10043_v3, %v10042_v54  ;;  %v11181_v11 = vld [vmem:[%s15332_s1 + $0x1114] ss:$12 sps:$4 sm:$0xff]   ;;  %6839 = vmatprep.subr.bf16.mxu1 %v11250_v45 }
 0x2d2   :  { %5511 = vmatmul.mubr.bf16.gmra.mrb[8].mxu0 %v13678_v43  ;;  %v11248_v43 = vld [vmem:[%s15334_s3 + $0xd0] ss:$8 sps:$4 sm:$0xff]  }
 0x2d3   :  { %5550 = vmatpush1.bf16.msra.mxu0 %v11173_v42  ;;  %5520 = vmatprep.mubr.bf16.mxu0 %v13686_v39  ;;  %v6497_v2 = vadd.f32 %v10044_v21, %v14373_v50  ;;  %v6526_v4 = vmax.f32 %v6494_v38, 0.0  ;;  %v11179_v39 = vld [vmem:[%s15332_s1 + $0x1110] ss:$12 sps:$4 sm:$0xff]   ;;  %v11184_v50 = vld [vmem:[%s15332_s1 + $0x112c] ss:$12 sps:$4 sm:$0xff]  }
 0x2d4   :  { %5551 = vmatprep.subr.bf16.mxu0 %v11178_v19  ;;  %6840 = vmatpush1.bf16.msra.mxu1 %v11248_v43  ;;  %v11257_v19 = vld [vmem:[%s15334_s3 + $0x100] ss:$8 sps:$4 sm:$0xff]   ;;  %v11262_v38 = vld [vmem:[%s15334_s3 + $0x114] ss:$8 sps:$4 sm:$0xff]   ;;  %v11260_v43 = vld [vmem:[%s15334_s3 + $0x110] ss:$8 sps:$4 sm:$0xff]  }
 0x2d5   :  { %v6529_v1 = vmax.f32 %v6497_v2, 0.0 }
 0x2d7   :  { %5552 = vmatpush1.bf16.msra.mxu0 %v11176_v0  ;;  %v14528_v24 = vpack.c.bf16 %v6529_v1, %v6526_v4 }
 0x2d8   :  { %5553 = vmatprep.subr.bf16.mxu0 %v11181_v11 }
 0x2da   :  { %5521 = vmatmul.mubr.bf16.gmra.mrb[12].mxu0 %v13722_v52  ;;  %v11190_v52 = vld [vmem:[%s15332_s1 + $0x115c] ss:$12 sps:$4 sm:$0xff]  }
 0x2db   :  { %5554 = vmatpush1.bf16.msra.mxu0 %v11179_v39  ;;  %5530 = vmatprep.mubr.bf16.mxu0 %v13730_v13  ;;  %v11188_v13 = vld [vmem:[%s15332_s1 + $0x1158] ss:$12 sps:$4 sm:$0xff]  }
 0x2dc   :  { %5555 = vmatprep.subr.bf16.mxu0 %v11184_v50  ;;  %v11265_v39 = vld [vmem:[%s15334_s3 + $0x124] ss:$8 sps:$4 sm:$0xff]  }
 0x2df   :  { %5556 = vmatpush1.bf16.msra.mxu0 %v11182_v23 }
 0x2e0   :  { %5557 = vmatprep.subr.bf16.mxu0 %v11187_v35 }
 0x2e2   :  { %5531 = vmatmul.mubr.bf16.gmra.mrb[16].mxu0 %v13763_v22  ;;  %v11196_v22 = vld [vmem:[%s15332_s1 + $0x118c] ss:$12 sps:$4 sm:$0xff]  }
 0x2e3   :  { %5558 = vmatpush1.bf16.msra.mxu0 %v11185_v49  ;;  %5573 = vmatprep.mubr.bf16.mxu0 %v13768_v58  ;;  %v11194_v58 = vld [vmem:[%s15332_s1 + $0x1188] ss:$12 sps:$4 sm:$0xff]  }
 0x2e4   :  { %5559 = vmatprep.subr.bf16.mxu0 %v11190_v52 }
 0x2e7   :  { %5560 = vmatpush1.bf16.msra.mxu0 %v11188_v13  ;;  %v11263_v13 = vld [vmem:[%s15334_s3 + $0x120] ss:$8 sps:$4 sm:$0xff]  }
 0x2e8   :  { %5561 = vmatprep.subr.bf16.mxu0 %v11193_v55 }
 0x2eb   :  { %5562 = vmatpush1.bf16.msra.mxu0 %v11191_v63 }
 0x2ec   :  { %5563 = vmatprep.subr.bf16.mxu0 %v11196_v22  ;;  %v11268_v22 = vld [vmem:[%s15334_s3 + $0x134] ss:$8 sps:$4 sm:$0xff]  }
 0x2ef   :  { %5564 = vmatpush1.bf16.msra.mxu0 %v11194_v58 }
 0x2f0   :  { %5565 = vmatprep.subr.bf16.mxu0 %v11199_v25 }
 0x2f3   :  { %5566 = vmatpush1.bf16.msra.mxu0 %v11197_v53 }
 0x2f4   :  { %5567 = vmatprep.subr.bf16.mxu0 %v11202_v9 }
 0x2f7   :  { %5568 = vmatpush1.bf16.msra.mxu0 %v11200_v46 }
 0x2f8   :  { %5569 = vmatprep.subr.bf16.mxu0 %v11205_v47  ;;  %v11266_v47 = vld [vmem:[%s15334_s3 + $0x130] ss:$8 sps:$4 sm:$0xff]  }
 0x2fb   :  { %5570 = vmatpush1.bf16.msra.mxu0 %v11203_v28 }
 0x2fc   :  { %5571 = vmatprep.subr.bf16.mxu0 %v11208_v60 }
 0x2ff   :  { %5572 = vmatpush1.bf16.msra.mxu0 %v11206_v41  ;;  %v11271_v41 = vld [vmem:[%s15339_s8 + $0x4] ss:$16 sps:$4 sm:$0xff]  }
 0x302   :  { %5574 = vmatmul.mubr.bf16.vlgmr.msra.gmra.mrb[0].mxu0 %v13792_v30  ;;  %v11253_v30 = vld [vmem:[%s15334_s3 + $0xe4] ss:$8 sps:$4 sm:$0xff]  }
 0x303   :  { %5583 = vmatprep.mubr.bf16.mxu0 %v13800_v16  ;;  %v11251_v16 = vld [vmem:[%s15334_s3 + $0xe0] ss:$8 sps:$4 sm:$0xff]   ;;  %6841 = vmatprep.subr.bf16.mxu1 %v11253_v30 }
 0x304   :  { %6842 = vmatpush1.bf16.msra.mxu1 %v11251_v16 }
 0x30a   :  { %5584 = vmatmul.mubr.bf16.gmra.mrb[4].mxu0 %v13830_v37  ;;  %v11256_v37 = vld [vmem:[%s15334_s3 + $0xf4] ss:$8 sps:$4 sm:$0xff]  }
 0x30b   :  { %5593 = vmatprep.mubr.bf16.mxu0 %v13832_v33  ;;  %v11254_v33 = vld [vmem:[%s15334_s3 + $0xf0] ss:$8 sps:$4 sm:$0xff]   ;;  %6843 = vmatprep.subr.bf16.mxu1 %v11256_v37 }
 0x30c   :  { %6844 = vmatpush1.bf16.msra.mxu1 %v11254_v33 }
 0x312   :  { %5594 = vmatmul.mubr.bf16.gmra.mrb[8].mxu0 %v13862_v15  ;;  %v11259_v15 = vld [vmem:[%s15334_s3 + $0x104] ss:$8 sps:$4 sm:$0xff]  }
 0x313   :  { %5603 = vmatprep.mubr.bf16.mxu0 %v15380_v6  ;;  %6896 = vmatprep.subr.bf16.mxu1 %v11259_v15 }
 0x31a   :  { %5604 = vmatmul.mubr.bf16.gmra.mrb[12].mxu0 %v13892_v32  ;;  %v11500_v32 = vmov 0  }
 0x31b   :  { %5613 = vmatprep.mubr.bf16.mxu0 %v13894_v36  ;;  %10440 = vset.pattern.permute.xlu1 %v11500_v32  ;;  %v15381_v36 = vld [vmem:[#allocation5_spill] sm:$0xff] }
 0x31c   :  { %10439 = vset.pattern.permute.xlu0 %v11500_v32  ;;  %v947_v61 = vsub.s32 1, %v15381_v36 }
 0x31e   :  { %v14626_v57 = vrot.slane %v11475_v7, %v947_v61 }
 0x322   :  { %5614 = vmatmul.mubr.bf16.gmra.mrb[16].mxu0 %v13916_v31  ;;  %v14615_v31 = vsub.s32 0, %v15381_v36 }
 0x324   :  { %v14622_v62 = vrot.slane %v11475_v7, %v14615_v31 }
 0x3d5   :  { %v5575_v40 = vpop.f32.mrb[0].mxu0 }
 0x3d6   :  { %v10153_v8 = vadd.f32 %v5575_v40, %v14622_v62  ;;  %v5577_v44 = vpop.f32.mrb[1].mxu0 }
 0x3d7   :  { %v10154_v29 = vadd.f32 %v5577_v44, %v14626_v57  ;;  %v5579_v20 = vpop.f32.mrb[2].mxu0 }
 0x3d8   :  { %v10155_v34 = vadd.f32 %v5579_v20, %v14622_v62  ;;  %v5581_v18 = vpop.f32.mrb[3].mxu0  ;;  %v6500_v14 = vmax.f32 %v10153_v8, 0.0 }
 0x3d9   :  { %v10156_v26 = vadd.f32 %v5581_v18, %v14626_v57  ;;  %v6501_v48 = vmax.f32 %v10154_v29, 0.0 }
 0x3da   :  { %v6503_v51 = vmax.f32 %v10155_v34, 0.0 }
 0x3db   :  { %v6504_v10 = vmax.f32 %v10156_v26, 0.0 }
 0x3dc   :  { %v6530_v42 = vpack.c.bf16 %v6503_v51, %v6500_v14 }
 0x3dd   :  { %v6531_v59 = vpack.c.bf16 %v6504_v10, %v6501_v48  ;;  %v5585_v54 = vpop.f32.mrb[4].mxu0 }
 0x3de   :  { %v10157_v3 = vadd.f32 %v5585_v54, %v14622_v62  ;;  %v5587_v17 = vpop.f32.mrb[5].mxu0 }
 0x3df   :  { %v10158_v21 = vadd.f32 %v5587_v17, %v14626_v57  ;;  %v5589_v45 = vpop.f32.mrb[6].mxu0  ;;  %6845 = vmatprep.mubr.bf16.mxu1 %v6531_v59 }
 0x3e0   :  { %v10159_v0 = vadd.f32 %v5589_v45, %v14622_v62  ;;  %v5591_v2 = vpop.f32.mrb[7].mxu0  ;;  %6846 = vmatmul.mubr.bf16.vlgmr.msra.gmra.mrb[240].mxu1 %v6530_v42  ;;  %v6506_v4 = vmax.f32 %v10157_v3, 0.0 }
 0x3e1   :  { %v10160_v11 = vadd.f32 %v5591_v2, %v14626_v57  ;;  %6897 = vmatpush1.bf16.msra.mxu1 %v11257_v19  ;;  %v6507_v50 = vmax.f32 %v10158_v21, 0.0 }
 0x3e2   :  { %v6509_v1 = vmax.f32 %v10159_v0, 0.0  ;;  %6898 = vmatprep.subr.bf16.mxu1 %v11262_v38 }
 0x3e3   :  { %v6510_v23 = vmax.f32 %v10160_v11, 0.0 }
 0x3e4   :  { %v6533_v35 = vpack.c.bf16 %v6509_v1, %v6506_v4  ;;  %v11269_v4 = vld [vmem:[%s15339_s8] ss:$16 sps:$4 sm:$0xff]   ;;  %v11277_v1 = vld [vmem:[%s15339_s8 + $0x44] ss:$16 sps:$4 sm:$0xff]  }
 0x3e5   :  { %v6534_v49 = vpack.c.bf16 %v6510_v23, %v6507_v50  ;;  %v5595_v52 = vpop.f32.mrb[8].mxu0  ;;  %6899 = vmatpush1.bf16.msra.mxu1 %v11260_v43  ;;  %v11278_v50 = vld [vmem:[%s15339_s8 + $0x60] ss:$16 sps:$4 sm:$0xff]   ;;  %v11283_v23 = vld [vmem:[%s15339_s8 + $0x84] ss:$16 sps:$4 sm:$0xff]  }
 0x3e6   :  { %v10161_v55 = vadd.f32 %v5595_v52, %v14622_v62  ;;  %v5597_v63 = vpop.f32.mrb[9].mxu0  ;;  %6900 = vmatprep.subr.bf16.mxu1 %v11265_v39  ;;  %v11275_v39 = vld [vmem:[%s15339_s8 + $0x40] ss:$16 sps:$4 sm:$0xff]   ;;  %v11289_v52 = vld [vmem:[%s15339_s8 + $0xc4] ss:$16 sps:$4 sm:$0xff]  }
 0x3e7   :  { %v10162_v58 = vadd.f32 %v5597_v63, %v14626_v57  ;;  %v5599_v25 = vpop.f32.mrb[10].mxu0  ;;  %6855 = vmatprep.mubr.bf16.mxu1 %v6534_v49  ;;  %v11284_v49 = vld [vmem:[%s15339_s8 + $0xa0] ss:$16 sps:$4 sm:$0xff]   ;;  %v11295_v63 = vld [vmem:[%s15339_s8 + $0x104] ss:$16 sps:$4 sm:$0xff]  }
 0x3e8   :  { %v10163_v53 = vadd.f32 %v5599_v25, %v14622_v62  ;;  %v5601_v9 = vpop.f32.mrb[11].mxu0  ;;  %6856 = vmatmul.mubr.bf16.gmra.mrb[244].mxu1 %v6533_v35  ;;  %v6512_v28 = vmax.f32 %v10161_v55, 0.0  ;;  %v11281_v35 = vld [vmem:[%s15339_s8 + $0x80] ss:$16 sps:$4 sm:$0xff]   ;;  %v11301_v25 = vld [vmem:[%s15339_s8 + $0x144] ss:$16 sps:$4 sm:$0xff]  }
 0x3e9   :  { %v10164_v46 = vadd.f32 %v5601_v9, %v14626_v57  ;;  %6901 = vmatpush1.bf16.msra.mxu1 %v11263_v13  ;;  %v6513_v6 = vmax.f32 %v10162_v58, 0.0  ;;  %v11287_v13 = vld [vmem:[%s15339_s8 + $0xc0] ss:$16 sps:$4 sm:$0xff]  }
 0x3ea   :  { %v6515_v60 = vmax.f32 %v10163_v53, 0.0  ;;  %6902 = vmatprep.subr.bf16.mxu1 %v11268_v22  ;;  %v11290_v55 = vld [vmem:[%s15339_s8 + $0xe0] ss:$16 sps:$4 sm:$0xff]  }
 0x3eb   :  { %v6516_v30 = vmax.f32 %v10164_v46, 0.0  ;;  %v11293_v22 = vld [vmem:[%s15339_s8 + $0x100] ss:$16 sps:$4 sm:$0xff]   ;;  %v11307_v46 = vld [vmem:[%s15339_s8 + $0x184] ss:$16 sps:$4 sm:$0xff]  }
 0x3ec   :  { %v6536_v16 = vpack.c.bf16 %v6515_v60, %v6512_v28  ;;  %v11296_v58 = vld [vmem:[%s15339_s8 + $0x120] ss:$16 sps:$4 sm:$0xff]   ;;  %v11310_v28 = vld [vmem:[%s15339_s8 + $0x1a4] ss:$16 sps:$4 sm:$0xff]  }
 0x3ed   :  { %v6537_v37 = vpack.c.bf16 %v6516_v30, %v6513_v6  ;;  %v5605_v33 = vpop.f32.mrb[12].mxu0  ;;  %6903 = vmatpush1.bf16.msra.mxu1 %v11266_v47  ;;  %v11299_v53 = vld [vmem:[%s15339_s8 + $0x140] ss:$16 sps:$4 sm:$0xff]   ;;  %v11316_v30 = vld [vmem:[%s15339_s8 + $0x1e4] ss:$16 sps:$4 sm:$0xff]  }
 0x3ee   :  { %v10165_v15 = vadd.f32 %v5605_v33, %v14622_v62  ;;  %v5607_v7 = vpop.f32.mrb[13].mxu0  ;;  %7506 = vmatprep.subr.bf16.mxu1 %v11271_v41  ;;  %v11302_v9 = vld [vmem:[%s15339_s8 + $0x160] ss:$16 sps:$4 sm:$0xff]   ;;  %v11313_v41 = vld [vmem:[%s15339_s8 + $0x1c4] ss:$16 sps:$4 sm:$0xff]  }
 0x3ef   :  { %v10166_v40 = vadd.f32 %v5607_v7, %v14626_v57  ;;  %v5609_v8 = vpop.f32.mrb[14].mxu0  ;;  %6865 = vmatprep.mubr.bf16.mxu1 %v6537_v37  ;;  %v11305_v47 = vld [vmem:[%s15339_s8 + $0x180] ss:$16 sps:$4 sm:$0xff]   ;;  %v11319_v37 = vld [vmem:[%s15339_s8 + $0xc] ss:$16 sps:$4 sm:$0xff]  }
 0x3f0   :  { %v10167_v44 = vadd.f32 %v5609_v8, %v14622_v62  ;;  %v5611_v29 = vpop.f32.mrb[15].mxu0  ;;  %6866 = vmatmul.mubr.bf16.gmra.mrb[248].mxu1 %v6536_v16  ;;  %v6518_v34 = vmax.f32 %v10165_v15, 0.0  ;;  %v11308_v60 = vld [vmem:[%s15339_s8 + $0x1a0] ss:$16 sps:$4 sm:$0xff]   ;;  %v6992_v7 = vld [vmem:[%s15336_s5 + $0x18] sm:$0xff]  ;;  %v6994_v8 = vld [vmem:[%s15336_s5 + $0x28] sm:$0xff] }
 0x3f1   :  { %v10168_v20 = vadd.f32 %v5611_v29, %v14626_v57  ;;  %v6519_v26 = vmax.f32 %v10166_v40, 0.0  ;;  %v11311_v6 = vld [vmem:[%s15339_s8 + $0x1c0] ss:$16 sps:$4 sm:$0xff]   ;;  %v6990_v40 = vld [vmem:[%s15336_s5 + $0x8] sm:$0xff]  ;;  %v6996_v29 = vld [vmem:[%s15336_s5 + $0x38] sm:$0xf] }
 0x3f2   :  { %v6521_v18 = vmax.f32 %v10167_v44, 0.0  ;;  %v11314_v16 = vld [vmem:[%s15339_s8 + $0x1e0] ss:$16 sps:$4 sm:$0xff]  }
 0x3f3   :  { %v6522_v14 = vmax.f32 %v10168_v20, 0.0  ;;  %v6991_v33 = vld [vmem:[%s15336_s5 + $0x10] sm:$0xff]  ;;  %v6989_v15 = vld [vmem:[%s15336_s5] sm:$0xff] }
 0x3f4   :  { %v6539_v51 = vpack.c.bf16 %v6521_v18, %v6518_v34  ;;  %7011 = vperm.xlu1 %10440, %v6991_v33   ;;  %7001 = vperm.xlu0 %10439, %v6989_v15   ;;  %v6993_v44 = vld [vmem:[%s15336_s5 + $0x20] sm:$0xff]  ;;  %v6995_v20 = vld [vmem:[%s15336_s5 + $0x30] sm:$0xff] }
 0x3f5   :  { %v6540_v48 = vpack.c.bf16 %v6522_v14, %v6519_v26  ;;  %v5615_v10 = vpop.f32.mrb[16].mxu0  ;;  %v6585_v34 = vld [vmem:[%s15335_s4] sm:$0x3] }
 0x3f6   :  { %v10169_v42 = vadd.f32 %v5615_v10, %v14622_v62  ;;  %v5617_v59 = vpop.f32.mrb[17].mxu0  ;;  %v14811_v18 = vrot.slane %v6585_v34, %v14615_v31  ;;  %v14815_v14 = vrot.slane %v6585_v34, %v947_v61  ;;  %v11317_v61 = vld [vmem:[%s15339_s8 + $0x8] ss:$16 sps:$4 sm:$0xff]  }
 0x3f7   :  { %v10170_v54 = vadd.f32 %v5617_v59, %v14626_v57  ;;  %v5619_v19 = vpop.f32.mrb[18].mxu0  ;;  %6875 = vmatprep.mubr.bf16.mxu1 %v6540_v48 }
 0x3f8   :  { %v10171_v3 = vadd.f32 %v5619_v19, %v14622_v62  ;;  %v5621_v17 = vpop.f32.mrb[19].mxu0  ;;  %6876 = vmatmul.mubr.bf16.gmra.mrb[252].mxu1 %v6539_v51  ;;  %v6524_v21 = vmax.f32 %v10169_v42, 0.0  ;;  %v11274_v62 = vld [vmem:[%s15339_s8 + $0x24] ss:$16 sps:$4 sm:$0xff]   ;;  %7016 = vperm.xlu1 %10440, %v6992_v7   ;;  %v11335_v7 = vld [vmem:[%s15339_s8 + $0xc8] ss:$16 sps:$4 sm:$0xff]  }
 0x3f9   :  { %v10172_v38 = vadd.f32 %v5621_v17, %v14626_v57  ;;  %v6525_v0 = vmax.f32 %v10170_v54, 0.0  ;;  %v11272_v57 = vld [vmem:[%s15339_s8 + $0x20] ss:$16 sps:$4 sm:$0xff]   ;;  %7006 = vperm.xlu0 %10439, %v6990_v40   ;;  %v11340_v40 = vld [vmem:[%s15339_s8 + $0xec] ss:$16 sps:$4 sm:$0xff]  }
 0x3fa   :  { %v6527_v45 = vmax.f32 %v10171_v3, 0.0 }
 0x3fb   :  { %v6528_v2 = vmax.f32 %v10172_v38, 0.0  ;;  %v11322_v38 = vld [vmem:[%s15339_s8 + $0x2c] ss:$16 sps:$4 sm:$0xff]  }
 0x3fc   :  { %v6542_v11 = vpack.c.bf16 %v6527_v45, %v6524_v21  ;;  %7026 = vperm.xlu1 %10440, %v6994_v8  }
 0x3fd   :  { %v6543_v43 = vpack.c.bf16 %v6528_v2, %v6525_v0  ;;  %7021 = vperm.xlu0 %10439, %v6993_v44   ;;  %v11320_v2 = vld [vmem:[%s15339_s8 + $0x28] ss:$16 sps:$4 sm:$0xff]  }
 0x3ff   :  { %6885 = vmatprep.mubr.bf16.mxu1 %v6543_v43 }
 0x400   :  { %6886 = vmatmul.mubr.bf16.gmra.mrb[0].mxu1 %v6542_v11  ;;  %7036 = vperm.xlu1 %10440, %v6996_v29  }
 0x401   :  { %6928 = vmatprep.mubr.bf16.mxu1 %v11500_v32  ;;  %7031 = vperm.xlu0 %10439, %v6995_v20   ;;  %v11338_v20 = vld [vmem:[%s15339_s8 + $0xe8] ss:$16 sps:$4 sm:$0xff]  }
 0x408   :  { %9386 = vmatmul.mubr.msk.bf16.vlgmr.msra.gmra.mrb[240].mxu1 %vm6797_vm0, %v14413_v5  ;;  %v11280_v5 = vld [vmem:[%s15339_s8 + $0x64] ss:$16 sps:$4 sm:$0xff]  }
 0x409   :  { %6938 = vmatprep.mubr.bf16.mxu1 %v11500_v32  ;;  %7507 = vmatpush1.bf16.msra.mxu1 %v11269_v4 }
 0x40a   :  { %7508 = vmatprep.subr.bf16.mxu1 %v11274_v62  ;;  %v11325_v62 = vld [vmem:[%s15339_s8 + $0x4c] ss:$16 sps:$4 sm:$0xff]  }
 0x40d   :  { %7509 = vmatpush1.bf16.msra.mxu1 %v11272_v57 }
 0x40e   :  { %7510 = vmatprep.subr.bf16.mxu1 %v11277_v1 }
 0x410   :  { %9387 = vmatmul.mubr.msk.bf16.gmra.mrb[244].mxu1 %vm6797_vm0, %v14441_v12  ;;  %v11286_v12 = vld [vmem:[%s15339_s8 + $0xa4] ss:$16 sps:$4 sm:$0xff]  }
 0x411   :  { %6948 = vmatprep.mubr.bf16.mxu1 %v11500_v32  ;;  %7511 = vmatpush1.bf16.msra.mxu1 %v11275_v39 }
 0x412   :  { %7512 = vmatprep.subr.bf16.mxu1 %v11280_v5 }
 0x415   :  { %7513 = vmatpush1.bf16.msra.mxu1 %v11278_v50  ;;  %v11323_v50 = vld [vmem:[%s15339_s8 + $0x48] ss:$16 sps:$4 sm:$0xff]  }
 0x416   :  { %7514 = vmatprep.subr.bf16.mxu1 %v11283_v23  ;;  %v11328_v23 = vld [vmem:[%s15339_s8 + $0x6c] ss:$16 sps:$4 sm:$0xff]  }
 0x418   :  { %9388 = vmatmul.mubr.msk.bf16.gmra.mrb[248].mxu1 %vm6797_vm0, %v14471_v27  ;;  %v11292_v27 = vld [vmem:[%s15339_s8 + $0xe4] ss:$16 sps:$4 sm:$0xff]  }
 0x419   :  { %6958 = vmatprep.mubr.bf16.mxu1 %v11500_v32  ;;  %7515 = vmatpush1.bf16.msra.mxu1 %v11281_v35 }
 0x41a   :  { %7516 = vmatprep.subr.bf16.mxu1 %v11286_v12 }
 0x41d   :  { %7517 = vmatpush1.bf16.msra.mxu1 %v11284_v49 }
 0x41e   :  { %7518 = vmatprep.subr.bf16.mxu1 %v11289_v52  ;;  %v11326_v52 = vld [vmem:[%s15339_s8 + $0x68] ss:$16 sps:$4 sm:$0xff]  }
 0x420   :  { %9389 = vmatmul.mubr.msk.bf16.gmra.mrb[252].mxu1 %vm6797_vm0, %v14501_v56  ;;  %v11298_v56 = vld [vmem:[%s15339_s8 + $0x124] ss:$16 sps:$4 sm:$0xff]  }
 0x421   :  { %6968 = vmatprep.mubr.bf16.mxu1 %v11500_v32  ;;  %7519 = vmatpush1.bf16.msra.mxu1 %v11287_v13 }
 0x422   :  { %7520 = vmatprep.subr.bf16.mxu1 %v11292_v27 }
 0x425   :  { %7521 = vmatpush1.bf16.msra.mxu1 %v11290_v55 }
 0x426   :  { %7522 = vmatprep.subr.bf16.mxu1 %v11295_v63  ;;  %v11331_v63 = vld [vmem:[%s15339_s8 + $0x8c] ss:$16 sps:$4 sm:$0xff]  }
 0x428   :  { %9390 = vmatmul.mubr.msk.bf16.gmra.mrb[0].mxu1 %vm6797_vm0, %v14528_v24  ;;  %v11304_v24 = vld [vmem:[%s15339_s8 + $0x164] ss:$16 sps:$4 sm:$0xff]  }
 0x429   :  { %7523 = vmatpush1.bf16.msra.mxu1 %v11293_v22 }
 0x42a   :  { %7524 = vmatprep.subr.bf16.mxu1 %v11298_v56 }
 0x42d   :  { %7525 = vmatpush1.bf16.msra.mxu1 %v11296_v58 }
 0x42e   :  { %7526 = vmatprep.subr.bf16.mxu1 %v11301_v25 }
 0x431   :  { %7527 = vmatpush1.bf16.msra.mxu1 %v11299_v53  ;;  %v11329_v53 = vld [vmem:[%s15339_s8 + $0x88] ss:$16 sps:$4 sm:$0xff]  }
 0x432   :  { %7528 = vmatprep.subr.bf16.mxu1 %v11304_v24  ;;  %v11334_v24 = vld [vmem:[%s15339_s8 + $0xac] ss:$16 sps:$4 sm:$0xff]  }
 0x435   :  { %7529 = vmatpush1.bf16.msra.mxu1 %v11302_v9 }
 0x436   :  { %7530 = vmatprep.subr.bf16.mxu1 %v11307_v46 }
 0x439   :  { %7531 = vmatpush1.bf16.msra.mxu1 %v11305_v47 }
 0x43a   :  { %7532 = vmatprep.subr.bf16.mxu1 %v11310_v28  ;;  %v11332_v28 = vld [vmem:[%s15339_s8 + $0xa8] ss:$16 sps:$4 sm:$0xff]  }
 0x43d   :  { %7533 = vmatpush1.bf16.msra.mxu1 %v11308_v60 }
 0x43e   :  { %7534 = vmatprep.subr.bf16.mxu1 %v11313_v41 }
 0x441   :  { %7535 = vmatpush1.bf16.msra.mxu1 %v11311_v6 }
 0x442   :  { %7536 = vmatprep.subr.bf16.mxu1 %v11316_v30  ;;  %v11337_v30 = vld [vmem:[%s15339_s8 + $0xcc] ss:$16 sps:$4 sm:$0xff]  }
 0x445   :  { %7537 = vmatpush1.bf16.msra.mxu1 %v11314_v16 }
 0x446   :  { %7589 = vmatprep.subr.bf16.mxu1 %v11319_v37 }
 0x4db   :  { %v6930_v26 = vpop.f32.mrb[240].mxu1 }
 0x4dc   :  { %v6932_v51 = vpop.f32.mrb[241].mxu1  ;;  %v10173_v10 = vadd.f32 %v6930_v26, %v14811_v18 }
 0x4dd   :  { %v6934_v48 = vpop.f32.mrb[242].mxu1  ;;  %v10174_v54 = vadd.f32 %v6932_v51, %v14815_v14 }
 0x4de   :  { %v10175_v42 = vadd.f32 %v6934_v48, %v14811_v18  ;;  %v6936_v59 = vpop.f32.mrb[243].mxu1  ;;  %v11343_v48 = vld [vmem:[%s15339_s8 + $0x10c] ss:$16 sps:$4 sm:$0xff]  }
 0x4df   :  { %v10176_v19 = vadd.f32 %v6936_v59, %v14815_v14 }
 0x4e0   :  { %v14821_v3 = vpack.c.bf16 %v10175_v42, %v10173_v10 }
 0x4e1   :  { %v14823_v17 = vpack.c.bf16 %v10176_v19, %v10174_v54  ;;  %v11341_v19 = vld [vmem:[%s15339_s8 + $0x108] ss:$16 sps:$4 sm:$0xff]  }
 0x4e3   :  { %v6940_v21 = vpop.f32.mrb[244].mxu1  ;;  %7538 = vmatprep.mubr.bf16.mxu1 %v14823_v17 }
 0x4e4   :  { %v6942_v45 = vpop.f32.mrb[245].mxu1  ;;  %7539 = vmatmul.mubr.bf16.vlgmr.msra.gmra.mrb[4].mxu1 %v14821_v3  ;;  %v10177_v11 = vadd.f32 %v6940_v21, %v14811_v18  ;;  %v11352_v21 = vld [vmem:[%s15339_s8 + $0x16c] ss:$16 sps:$4 sm:$0xff]  }
 0x4e5   :  { %7590 = vmatpush1.bf16.msra.mxu1 %v11317_v61  ;;  %v6944_v0 = vpop.f32.mrb[246].mxu1  ;;  %v10178_v57 = vadd.f32 %v6942_v45, %v14815_v14  ;;  %v11349_v61 = vld [vmem:[%s15339_s8 + $0x14c] ss:$16 sps:$4 sm:$0xff]   ;;  %v11350_v45 = vld [vmem:[%s15339_s8 + $0x168] ss:$16 sps:$4 sm:$0xff]  }
 0x4e6   :  { %v10179_v43 = vadd.f32 %v6944_v0, %v14811_v18  ;;  %v6946_v4 = vpop.f32.mrb[247].mxu1  ;;  %7591 = vmatprep.subr.bf16.mxu1 %v11322_v38  ;;  %v11347_v38 = vld [vmem:[%s15339_s8 + $0x148] ss:$16 sps:$4 sm:$0xff]   ;;  %v11355_v0 = vld [vmem:[%s15339_s8 + $0x18c] ss:$16 sps:$4 sm:$0xff]  }
 0x4e7   :  { %v10180_v1 = vadd.f32 %v6946_v4, %v14815_v14  ;;  %v11361_v4 = vld [vmem:[%s15339_s8 + $0x1cc] ss:$16 sps:$4 sm:$0xff]  }
 0x4e8   :  { %v14843_v39 = vpack.c.bf16 %v10179_v43, %v10177_v11  ;;  %v11358_v11 = vld [vmem:[%s15339_s8 + $0x1ac] ss:$16 sps:$4 sm:$0xff]   ;;  %v11356_v43 = vld [vmem:[%s15339_s8 + $0x1a8] ss:$16 sps:$4 sm:$0xff]  }
 0x4e9   :  { %v14845_v5 = vpack.c.bf16 %v10180_v1, %v10178_v57  ;;  %7592 = vmatpush1.bf16.msra.mxu1 %v11320_v2  ;;  %v11353_v2 = vld [vmem:[%s15339_s8 + $0x188] ss:$16 sps:$4 sm:$0xff]   ;;  %v11364_v57 = vld [vmem:[%s15339_s8 + $0x1ec] ss:$16 sps:$4 sm:$0xff]  }
 0x4ea   :  { %7593 = vmatprep.subr.bf16.mxu1 %v11325_v62  ;;  %v11359_v62 = vld [vmem:[%s15339_s8 + $0x1c8] ss:$16 sps:$4 sm:$0xff]  }
 0x4eb   :  { %v6950_v35 = vpop.f32.mrb[248].mxu1  ;;  %7548 = vmatprep.mubr.bf16.mxu1 %v14845_v5  ;;  %v11362_v1 = vld [vmem:[%s15339_s8 + $0x1e8] ss:$16 sps:$4 sm:$0xff]  }
 0x4ec   :  { %v6952_v12 = vpop.f32.mrb[249].mxu1  ;;  %7549 = vmatmul.mubr.bf16.gmra.mrb[8].mxu1 %v14843_v39  ;;  %v10181_v13 = vadd.f32 %v6950_v35, %v14811_v18  ;;  %v7002_v35 = vpop.permute.xlu0 %7001 }
 0x4ed   :  { %7594 = vmatpush1.bf16.msra.mxu1 %v11323_v50  ;;  %v6954_v49 = vpop.f32.mrb[250].mxu1  ;;  %v10182_v22 = vadd.f32 %v6952_v12, %v14815_v14  ;;  %v6997_v50 = vld [vmem:[%s15337_s6] sm:$0x3] }
 0x4ee   :  { %v10183_v27 = vadd.f32 %v6954_v49, %v14811_v18  ;;  %v6956_v55 = vpop.f32.mrb[251].mxu1  ;;  %7595 = vmatprep.subr.bf16.mxu1 %v11328_v23  ;;  %v6998_v23 = vunpack.c.l.bf16 %v6997_v50  ;;  %v7074_v12 = vld [vmem:[%s15338_s7] sm:$0xff] }
 0x4ef   :  { %v10184_v56 = vadd.f32 %v6956_v55, %v14815_v14 }
 0x4f0   :  { %v14865_v58 = vpack.c.bf16 %v10183_v27, %v10181_v13  ;;  %v7043_v49 = vrot.slane %v6998_v23, %v14615_v31 }
 0x4f1   :  { %v14867_v25 = vpack.c.bf16 %v10184_v56, %v10182_v22  ;;  %7596 = vmatpush1.bf16.msra.mxu1 %v11326_v52  ;;  %v15382_v52 = vsub.s32 2, %v15381_v36  ;;  %v7075_v22 = vld [vmem:[%s15338_s7 + $0x8] sm:$0xff] }
 0x4f2   :  { %7597 = vmatprep.subr.bf16.mxu1 %v11331_v63  ;;  %v14980_v27 = vrot.slane %v7043_v49, %v14615_v31  ;;  %v7082_v63 = vunpack.c.l.bf16 %v7074_v12  ;;  %v7084_v56 = vunpack.c.l.bf16 %v7075_v22 }
 0x4f3   :  { %v6960_v9 = vpop.f32.mrb[252].mxu1  ;;  %7558 = vmatprep.mubr.bf16.mxu1 %v14867_v25  ;;  %v7047_v13 = vrot.slane %v6998_v23, %v15382_v52 }
 0x4f4   :  { %v6962_v46 = vpop.f32.mrb[253].mxu1  ;;  %7559 = vmatmul.mubr.bf16.gmra.mrb[12].mxu1 %v14865_v58  ;;  %v10185_v60 = vadd.f32 %v6960_v9, %v14811_v18  ;;  %v7083_v9 = vunpack.c.h.bf16 %v7074_v12 }
 0x4f5   :  { %7598 = vmatpush1.bf16.msra.mxu1 %v11329_v53  ;;  %v6964_v47 = vpop.f32.mrb[254].mxu1  ;;  %v10186_v16 = vadd.f32 %v6962_v46, %v14815_v14  ;;  %v14983_v55 = vrot.slane %v7047_v13, %v14615_v31  ;;  %v7058_v53 = vmul.f32 %v14980_v27, %v7002_v35 }
 0x4f6   :  { %v10187_v41 = vadd.f32 %v6964_v47, %v14811_v18  ;;  %v6966_v6 = vpop.f32.mrb[255].mxu1  ;;  %7599 = vmatprep.subr.bf16.mxu1 %v11334_v24  ;;  %v7007_v24 = vpop.permute.xlu0 %7006 }
 0x4f7   :  { %v10188_v37 = vadd.f32 %v6966_v6, %v14815_v14  ;;  %v7060_v46 = vmul.f32 %v14980_v27, %v7007_v24  ;;  %v7059_v36 = vmul.f32 %v14983_v55, %v7002_v35  ;;  %v14991_v47 = vadd.f32 %v7082_v63, %v7058_v53 }
 0x4f8   :  { %v14887_v33 = vpack.c.bf16 %v10187_v41, %v10185_v60  ;;  %v7061_v60 = vmul.f32 %v14983_v55, %v7007_v24 }
 0x4f9   :  { %v14889_v15 = vpack.c.bf16 %v10188_v37, %v10186_v16  ;;  %7600 = vmatpush1.bf16.msra.mxu1 %v11332_v28  ;;  %v7085_v28 = vunpack.c.h.bf16 %v7075_v22  ;;  %v14994_v41 = vadd.f32 %v7084_v56, %v7060_v46  ;;  %v7079_v46 = vld [vmem:[%s15338_s7 + $0x28] sm:$0xff] }
 0x4fa   :  { %7601 = vmatprep.subr.bf16.mxu1 %v11337_v30  ;;  %v7099_v30 = vadd.f32 %v7083_v9, %v7059_v36  ;;  %v7078_v36 = vld [vmem:[%s15338_s7 + $0x20] sm:$0xff] }
 0x4fb   :  { %v6970_v8 = vpop.f32.mrb[0].mxu1  ;;  %7568 = vmatprep.mubr.bf16.mxu1 %v14889_v15  ;;  %v7114_v6 = vpack.c.bf16 %v14994_v41, %v14991_v47  ;;  %v7101_v16 = vadd.f32 %v7085_v28, %v7061_v60  ;;  %v7090_v41 = vunpack.c.l.bf16 %v7078_v36 }
 0x4fc   :  { %v6972_v44 = vpop.f32.mrb[1].mxu1  ;;  %7569 = vmatmul.mubr.bf16.gmra.mrb[16].mxu1 %v14887_v33  ;;  %v10189_v34 = vadd.f32 %v6970_v8, %v14811_v18 }
 0x4fd   :  { %7602 = vmatpush1.bf16.msra.mxu1 %v11335_v7  ;;  %v6974_v29 = vpop.f32.mrb[2].mxu1  ;;  %v10190_v10 = vadd.f32 %v6972_v44, %v14815_v14  ;;  %v7115_v37 = vpack.c.bf16 %v7101_v16, %v7099_v30 }
 0x4fe   :  { %v10191_v26 = vadd.f32 %v6974_v29, %v14811_v18  ;;  %v6976_v51 = vpop.f32.mrb[3].mxu1  ;;  %7603 = vmatprep.subr.bf16.mxu1 %v11340_v40  ;;  %v11346_v18 = vld [vmem:[%s15339_s8 + $0x12c] ss:$16 sps:$4 sm:$0xff]  }
 0x4ff   :  { %v10192_v42 = vadd.f32 %v6976_v51, %v14815_v14  ;;  %v11344_v14 = vld [vmem:[%s15339_s8 + $0x128] ss:$16 sps:$4 sm:$0xff]  }
 0x500   :  { %v14909_v59 = vpack.c.bf16 %v10191_v26, %v10189_v34 }
 0x501   :  { %v14911_v54 = vpack.c.bf16 %v10192_v42, %v10190_v10  ;;  %7604 = vmatpush1.bf16.msra.mxu1 %v11338_v20 }
 0x502   :  { %7605 = vmatprep.subr.bf16.mxu1 %v11343_v48 }
 0x503   :  { %7578 = vmatprep.mubr.bf16.mxu1 %v14911_v54 }
 0x504   :  { %7579 = vmatmul.mubr.bf16.gmra.mrb[20].mxu1 %v14909_v59 }
 0x505   :  { %7606 = vmatpush1.bf16.msra.mxu1 %v11341_v19  ;;  %7621 = vmatprep.mubr.bf16.mxu1 %v14823_v17 }
 0x506   :  { %7607 = vmatprep.subr.bf16.mxu1 %v11346_v18 }
 0x509   :  { %7608 = vmatpush1.bf16.msra.mxu1 %v11344_v14 }
 0x50a   :  { %7609 = vmatprep.subr.bf16.mxu1 %v11349_v61 }
 0x50d   :  { %7610 = vmatpush1.bf16.msra.mxu1 %v11347_v38 }
 0x50e   :  { %7611 = vmatprep.subr.bf16.mxu1 %v11352_v21 }
 0x511   :  { %7612 = vmatpush1.bf16.msra.mxu1 %v11350_v45 }
 0x512   :  { %7613 = vmatprep.subr.bf16.mxu1 %v11355_v0 }
 0x515   :  { %7614 = vmatpush1.bf16.msra.mxu1 %v11353_v2 }
 0x516   :  { %7615 = vmatprep.subr.bf16.mxu1 %v11358_v11 }
 0x519   :  { %7616 = vmatpush1.bf16.msra.mxu1 %v11356_v43 }
 0x51a   :  { %7617 = vmatprep.subr.bf16.mxu1 %v11361_v4  ;;  %v7012_v4 = vpop.permute.xlu1 %7011 }
 0x51b   :  { %v7063_v52 = vmul.f32 %v14983_v55, %v7012_v4  ;;  %v7062_v30 = vmul.f32 %v14980_v27, %v7012_v4 }
 0x51d   :  { %7618 = vmatpush1.bf16.msra.mxu1 %v11359_v62 }
 0x51e   :  { %7619 = vmatprep.subr.bf16.mxu1 %v11364_v57  ;;  %v7076_v57 = vld [vmem:[%s15338_s7 + $0x10] sm:$0xff]  ;;  %v7017_v12 = vpop.permute.xlu1 %7016 }
 0x51f   :  { %v7087_v35 = vunpack.c.h.bf16 %v7076_v57  ;;  %v7065_v63 = vmul.f32 %v14983_v55, %v7017_v12  ;;  %v7086_v60 = vunpack.c.l.bf16 %v7076_v57 }
 0x521   :  { %7620 = vmatpush1.bf16.msra.mxu1 %v11362_v1  ;;  %v7077_v1 = vld [vmem:[%s15338_s7 + $0x18] sm:$0xff]  ;;  %v7103_v24 = vadd.f32 %v7087_v35, %v7063_v52 }
 0x522   :  { %v7089_v13 = vunpack.c.h.bf16 %v7077_v1  ;;  %v7088_v16 = vunpack.c.l.bf16 %v7077_v1 }
 0x524   :  { %7622 = vmatmul.mubr.bf16.vlgmr.msra.gmra.mrb[24].mxu1 %v14821_v3  ;;  %v7105_v9 = vadd.f32 %v7089_v13, %v7065_v63 }
 0x525   :  { %7631 = vmatprep.mubr.bf16.mxu1 %v14845_v5 }
 0x526   :  { %v7117_v28 = vpack.c.bf16 %v7105_v9, %v7103_v24 }
 0x52c   :  { %7632 = vmatmul.mubr.bf16.gmra.mrb[28].mxu1 %v14843_v39 }
 0x52d   :  { %7641 = vmatprep.mubr.bf16.mxu1 %v14867_v25 }
 0x534   :  { %7642 = vmatmul.mubr.bf16.gmra.mrb[32].mxu1 %v14865_v58 }
 0x535   :  { %7651 = vmatprep.mubr.bf16.mxu1 %v14889_v15 }
 0x53c   :  { %7652 = vmatmul.mubr.bf16.gmra.mrb[36].mxu1 %v14887_v33 }
 0x53d   :  { %7661 = vmatprep.mubr.bf16.mxu1 %v14911_v54 }
 0x544   :  { %7662 = vmatmul.mubr.bf16.gmra.mrb[40].mxu1 %v14909_v59 }
 0x545   :  { %7724 = vmatprep.mubr.bf16.mxu1 %v7115_v37  ;;  %v7064_v37 = vmul.f32 %v14980_v27, %v7017_v12 }
 0x5b7   :  { %v7540_v7 = vpop.f32.mrb[4].mxu1 }
 0x5b8   :  { %v7542_v40 = vpop.f32.mrb[5].mxu1 }
 0x5b9   :  { %v7544_v8 = vpop.f32.mrb[6].mxu1 }
 0x5ba   :  { %v7672_v44 = vpack.c.bf16 %v7544_v8, %v7540_v7  ;;  %v7546_v29 = vpop.f32.mrb[7].mxu1  ;;  %v7027_v7 = vpop.permute.xlu1 %7026  ;;  %v7093_v8 = vunpack.c.h.bf16 %v7079_v46 }
 0x5bb   :  { %v7673_v20 = vpack.c.bf16 %v7546_v29, %v7542_v40  ;;  %v7022_v40 = vpop.permute.xlu0 %7021  ;;  %v7091_v29 = vunpack.c.h.bf16 %v7078_v36 }
 0x5bd   :  { %7692 = vmatprep.subr.bf16.mxu1 %v7673_v20  ;;  %v7067_v20 = vmul.f32 %v14983_v55, %v7022_v40 }
 0x5be   :  { %7693 = vmatpush1.bf16.xpose.msra.mxu1 %v7672_v44  ;;  %v7069_v44 = vmul.f32 %v14983_v55, %v7027_v7 }
 0x5bf   :  { %v7550_v34 = vpop.f32.mrb[8].mxu1 }
 0x5c0   :  { %v7552_v26 = vpop.f32.mrb[9].mxu1 }
 0x5c1   :  { %v7554_v51 = vpop.f32.mrb[10].mxu1 }
 0x5c2   :  { %v7674_v48 = vpack.c.bf16 %v7554_v51, %v7550_v34  ;;  %v7556_v10 = vpop.f32.mrb[11].mxu1  ;;  %v7102_v34 = vadd.f32 %v7086_v60, %v7062_v30  ;;  %v7109_v51 = vadd.f32 %v7093_v8, %v7069_v44 }
 0x5c3   :  { %v7675_v42 = vpack.c.bf16 %v7556_v10, %v7552_v26  ;;  %v7104_v26 = vadd.f32 %v7088_v16, %v7064_v37  ;;  %v7081_v10 = vld [vmem:[%s15338_s7 + $0x38] sm:$0x33] }
 0x5c4   :  { %v7096_v57 = vunpack.c.l.bf16 %v7081_v10 }
 0x5c5   :  { %7694 = vmatprep.subr.bf16.mxu1 %v7675_v42  ;;  %v7037_v42 = vpop.permute.xlu1 %7036  ;;  %v7116_v47 = vpack.c.bf16 %v7104_v26, %v7102_v34 }
 0x5c6   :  { %7695 = vmatpush1.bf16.xpose.msra.mxu1 %v7674_v48  ;;  %v7107_v48 = vadd.f32 %v7091_v29, %v7067_v20 }
 0x5c7   :  { %v7560_v19 = vpop.f32.mrb[12].mxu1 }
 0x5c8   :  { %v7562_v18 = vpop.f32.mrb[13].mxu1 }
 0x5c9   :  { %v7564_v14 = vpop.f32.mrb[14].mxu1 }
 0x5ca   :  { %v7676_v61 = vpack.c.bf16 %v7564_v14, %v7560_v19  ;;  %v7566_v38 = vpop.f32.mrb[15].mxu1  ;;  %v7080_v19 = vld [vmem:[%s15338_s7 + $0x30] sm:$0xff]  ;;  %v7092_v14 = vunpack.c.l.bf16 %v7079_v46  ;;  %s8640_s7 = sshll.u32 %s11505_s30, 4  ;;  %s8641_s7 = int_to_ptr.vmem [resolvable:$true] %s8640_s7 }
 0x5cb   :  { %v7677_v21 = vpack.c.bf16 %v7566_v38, %v7562_v18  ;;  %v7032_v18 = vpop.permute.xlu0 %7031  ;;  %v7097_v38 = vunpack.c.h.bf16 %v7081_v10  ;;  %s11476_s3 = scalar_lea.vmem %s8641_s7, 16  ;;  %s11480_s16 = scalar_lea.vmem %s8641_s7, 32 }
 0x5cc   :  { %v7070_v35 = vmul.f32 %v14980_v27, %v7032_v18  ;;  %p11477_p0 = scmp.ne.s32.totalorder %s8641_s7, %s11476_s3  ;;  %p11481_p1 = scmp.lt.s32.totalorder %s8641_s7, %s8641_s7 }
 0x5cd   :  { %7696 = vmatprep.subr.bf16.mxu1 %v7677_v21  ;;  %v7073_v21 = vmul.f32 %v14983_v55, %v7037_v42  ;;  %p11482_p2 = scmp.lt.s32.totalorder %s11480_s16, %s11476_s3 }
 0x5ce   :  { %7697 = vmatpush1.bf16.xpose.msra.mxu1 %v7676_v61  ;;  %v7068_v61 = vmul.f32 %v14980_v27, %v7027_v7 }
 0x5cf   :  { %v7570_v45 = vpop.f32.mrb[16].mxu1  ;;  %v7113_v4 = vadd.f32 %v7097_v38, %v7073_v21  ;;  %p11483_p3 = por %p11482_p2, %p11481_p1 }
 0x5d0   :  { %v7572_v0 = vpop.f32.mrb[17].mxu1 }
 0x5d1   :  { %v7574_v2 = vpop.f32.mrb[18].mxu1  ;;  %p11484_p4 = pnand %p11483_p3, %p11477_p0 }
 0x5d2   :  { %v7678_v11 = vpack.c.bf16 %v7574_v2, %v7570_v45  ;;  %v7576_v43 = vpop.f32.mrb[19].mxu1  ;;  %v7095_v45 = vunpack.c.h.bf16 %v7080_v19  ;;  %v7119_v2 = vpack.c.bf16 %v7109_v51, %v7107_v48 }
 0x5d3   :  { %v7679_v62 = vpack.c.bf16 %v7576_v43, %v7572_v0  ;;  %v7071_v0 = vmul.f32 %v14983_v55, %v7032_v18 }
 0x5d5   :  { %7698 = vmatprep.subr.bf16.mxu1 %v7679_v62  ;;  %v7111_v62 = vadd.f32 %v7095_v45, %v7071_v0 }
 0x5d6   :  { %7699 = vmatpush1.bf16.xpose.msra.mxu1 %v7678_v11  ;;  %v7108_v11 = vadd.f32 %v7092_v14, %v7068_v61 }
 0x5d7   :  { %v7580_v50 = vpop.f32.mrb[20].mxu1  ;;  %v7121_v12 = vpack.c.bf16 %v7113_v4, %v7111_v62 }
 0x5d8   :  { %v7582_v23 = vpop.f32.mrb[21].mxu1 }
 0x5d9   :  { %v7584_v49 = vpop.f32.mrb[22].mxu1 }
 0x5da   :  { %v7680_v22 = vpack.c.bf16 %v7584_v49, %v7580_v50  ;;  %v7586_v56 = vpop.f32.mrb[23].mxu1  ;;  %v7072_v50 = vmul.f32 %v14980_v27, %v7037_v42 }
 0x5db   :  { %v7681_v53 = vpack.c.bf16 %v7586_v56, %v7582_v23  ;;  %v7094_v23 = vunpack.c.l.bf16 %v7080_v19 }
 0x5dc   :  { %v7112_v49 = vadd.f32 %v7096_v57, %v7072_v50 }
 0x5dd   :  { %7700 = vmatprep.subr.bf16.mxu1 %v7681_v53  ;;  %v7110_v52 = vadd.f32 %v7094_v23, %v7070_v35 }
 0x5de   :  { %7701 = vmatpush1.bf16.xpose.msra.mxu1 %v7680_v22 }
 0x5df   :  { %v7120_v53 = vpack.c.bf16 %v7112_v49, %v7110_v52 }
 0x5e5   :  { %7725 = vmatmul.mubr.bf16.vlgmr.msra.gmra.mrb[44].mxu1 %v7114_v6  ;;  %v7066_v6 = vmul.f32 %v14980_v27, %v7022_v40 }
 0x5e6   :  { %7732 = vmatprep.mubr.bf16.mxu1 %v7117_v28 }
 0x5e7   :  { %v7106_v43 = vadd.f32 %v7090_v41, %v7066_v6 }
 0x5e9   :  { %v7118_v1 = vpack.c.bf16 %v7108_v11, %v7106_v43 }
 0x5ed   :  { %7733 = vmatmul.mubr.bf16.gmra.mrb[48].mxu1 %v7116_v47 }
 0x5ee   :  { %7740 = vmatprep.mubr.bf16.mxu1 %v7119_v2 }
 0x5f5   :  { %7741 = vmatmul.mubr.bf16.gmra.mrb[52].mxu1 %v7118_v1 }
 0x5f6   :  { %7748 = vmatprep.mubr.bf16.mxu1 %v7121_v12 }
 0x5f7   :  { %v7623_v55 = vpop.f32.mrb[24].mxu1 }
 0x5f8   :  { %v7625_v13 = vpop.f32.mrb[25].mxu1 }
 0x5f9   :  { %v7627_v63 = vpop.f32.mrb[26].mxu1 }
 0x5fa   :  { %v7682_v22 = vpack.c.bf16 %v7627_v63, %v7623_v55  ;;  %v7629_v56 = vpop.f32.mrb[27].mxu1 }
 0x5fb   :  { %v7683_v24 = vpack.c.bf16 %v7629_v56, %v7625_v13 }
 0x5fd   :  { %7871 = vmatprep.subr.bf16.mxu1 %v7683_v24  ;;  %7749 = vmatmul.mubr.bf16.gmra.mrb[56].mxu1 %v7120_v53 }
 0x5fe   :  { %7872 = vmatpush1.bf16.msra.mxu1 %v7682_v22  ;;  %7903 = vmatprep.mubr.bf16.mxu1 %v11500_v32 }
 0x5ff   :  { %v7633_v9 = vpop.f32.mrb[28].mxu1 }
 0x600   :  { %v7635_v46 = vpop.f32.mrb[29].mxu1 }
 0x601   :  { %v7637_v27 = vpop.f32.mrb[30].mxu1 }
 0x602   :  { %v7684_v36 = vpack.c.bf16 %v7637_v27, %v7633_v9  ;;  %v7639_v28 = vpop.f32.mrb[31].mxu1 }
 0x603   :  { %v7685_v60 = vpack.c.bf16 %v7639_v28, %v7635_v46 }
 0x605   :  { %7873 = vmatprep.subr.bf16.mxu1 %v7685_v60 }
 0x606   :  { %7874 = vmatpush1.bf16.msra.mxu1 %v7684_v36 }
 0x607   :  { %v7643_v30 = vpop.f32.mrb[32].mxu1 }
 0x608   :  { %v7645_v16 = vpop.f32.mrb[33].mxu1 }
 0x609   :  { %v7647_v37 = vpop.f32.mrb[34].mxu1 }
 0x60a   :  { %v7686_v7 = vpack.c.bf16 %v7647_v37, %v7643_v30  ;;  %v7649_v40 = vpop.f32.mrb[35].mxu1 }
 0x60b   :  { %v7687_v8 = vpack.c.bf16 %v7649_v40, %v7645_v16 }
 0x60d   :  { %7875 = vmatprep.subr.bf16.mxu1 %v7687_v8 }
 0x60e   :  { %7876 = vmatpush1.bf16.msra.mxu1 %v7686_v7 }
 0x60f   :  { %v7653_v44 = vpop.f32.mrb[36].mxu1 }
 0x610   :  { %v7655_v29 = vpop.f32.mrb[37].mxu1 }
 0x611   :  { %v7657_v20 = vpop.f32.mrb[38].mxu1 }
 0x612   :  { %v7688_v34 = vpack.c.bf16 %v7657_v20, %v7653_v44  ;;  %v7659_v26 = vpop.f32.mrb[39].mxu1 }
 0x613   :  { %v7689_v51 = vpack.c.bf16 %v7659_v26, %v7655_v29 }
 0x615   :  { %7877 = vmatprep.subr.bf16.mxu1 %v7689_v51 }
 0x616   :  { %7878 = vmatpush1.bf16.msra.mxu1 %v7688_v34 }
 0x617   :  { %v7663_v48 = vpop.f32.mrb[40].mxu1 }
 0x618   :  { %v7665_v10 = vpop.f32.mrb[41].mxu1 }
 0x619   :  { %v7667_v42 = vpop.f32.mrb[42].mxu1 }
 0x61a   :  { %v7690_v19 = vpack.c.bf16 %v7667_v42, %v7663_v48  ;;  %v7669_v18 = vpop.f32.mrb[43].mxu1 }
 0x61b   :  { %v7691_v14 = vpack.c.bf16 %v7669_v18, %v7665_v10 }
 0x61d   :  { %7879 = vmatprep.subr.bf16.mxu1 %v7691_v14 }
 0x61e   :  { %7880 = vmatpush1.bf16.msra.mxu1 %v7690_v19 }
 0x6b8   :  { %v7726_v61 = vpop.f32.mrb[44].mxu1 }
 0x6b9   :  { %v7757_v47 = vmul.f32 0.0625, %v7726_v61  ;;  %v7728_v41 = vpop.f32.mrb[45].mxu1 }
 0x6ba   :  { %v7729_v6 = vpop.f32.mrb[46].mxu1 }
 0x6bb   :  { %v7758_v38 = vmul.f32 0.0625, %v7729_v6  ;;  %v7731_v21 = vpop.f32.mrb[47].mxu1  ;;  %v7766_v45 = vsel %vm7765_vm1, %v7757_v47, -inf }
 0x6bc   :  { %7767 = vmax.xlane.f32.xlu0 %v7766_v45 }
 0x6bd   :  { %v7769_v0 = vsel %vm7765_vm1, %v7758_v38, -inf }
 0x6be   :  { %7770 = vmax.xlane.f32.xlu1 %v7769_v0 }
 0x6c0   :  { %v7734_v2 = vpop.f32.mrb[48].mxu1 }
 0x6c1   :  { %v7759_v11 = vmul.f32 0.0625, %v7734_v2  ;;  %v7736_v43 = vpop.f32.mrb[49].mxu1 }
 0x6c2   :  { %v7737_v4 = vpop.f32.mrb[50].mxu1 }
 0x6c3   :  { %v7760_v62 = vmul.f32 0.0625, %v7737_v4  ;;  %v7739_v57 = vpop.f32.mrb[51].mxu1  ;;  %v7772_v1 = vsel %vm7765_vm1, %v7759_v11, -inf }
 0x6c4   :  { %7773 = vmax.xlane.f32.xlu0 %v7772_v1 }
 0x6c5   :  { %v7775_v50 = vsel %vm7765_vm1, %v7760_v62, -inf }
 0x6c8   :  { %7776 = vmax.xlane.f32.xlu0 %v7775_v50  ;;  %v7742_v23 = vpop.f32.mrb[52].mxu1 }
 0x6c9   :  { %v7761_v35 = vmul.f32 0.0625, %v7742_v23  ;;  %v7744_v12 = vpop.f32.mrb[53].mxu1 }
 0x6ca   :  { %v7745_v49 = vpop.f32.mrb[54].mxu1 }
 0x6cb   :  { %v7762_v52 = vmul.f32 0.0625, %v7745_v49  ;;  %v7747_v55 = vpop.f32.mrb[55].mxu1  ;;  %v7778_v13 = vsel %vm7765_vm1, %v7761_v35, -inf }
 0x6cc   :  { %7779 = vmax.xlane.f32.xlu1 %v7778_v13 }
 0x6cd   :  { %v7781_v63 = vsel %vm7765_vm1, %v7762_v52, -inf }
 0x6ce   :  { %7782 = vmax.xlane.f32.xlu0 %v7781_v63 }
 0x6d0   :  { %v7750_v22 = vpop.f32.mrb[56].mxu1 }
 0x6d1   :  { %v7763_v56 = vmul.f32 0.0625, %v7750_v22  ;;  %v7752_v53 = vpop.f32.mrb[57].mxu1 }
 0x6d2   :  { %v7753_v24 = vpop.f32.mrb[58].mxu1 }
 0x6d3   :  { %v7764_v9 = vmul.f32 0.0625, %v7753_v24  ;;  %v7755_v46 = vpop.f32.mrb[59].mxu1  ;;  %v7784_v27 = vsel %vm7765_vm1, %v7763_v56, -inf }
 0x6d4   :  { %7785 = vmax.xlane.f32.xlu1 %v7784_v27  ;;  %v11366_v46 = vld [vmem:[%s15342_s11] sm:$0xff]  }
 0x6d5   :  { %v7788_v36 = vsel %vm7787_vm2, %v7764_v9, -inf }
 0x6d6   :  { %7789 = vmax.xlane.f32.xlu0 %v7788_v36 }
 0x749   :  { %v7768_v28 = vpop.xlane.xlu0 %7767 }
 0x74a   :  { %v7791_v60 = vsub.f32 %v7757_v47, %v7768_v28  ;;  %v11367_v28 = vld [vmem:[%s15342_s11 + $0x48] sm:$0xff]  }
 0x74b   :  { %v7771_v30 = vpop.xlane.xlu1 %7770 }
 0x74c   :  { %v7799_v16 = vmul.f32 1.442695, %v7791_v60  ;;  %v7792_v37 = vsub.f32 %v7758_v38, %v7771_v30  ;;  %v11368_v30 = vld [vmem:[%s15342_s11 + $0x8] sm:$0xff]  }
 0x74e   :  { %11397 = vpow2.f32 %v7799_v16  ;;  %v7801_v7 = vmul.f32 1.442695, %v7792_v37  ;;  %v11369_v16 = vld [vmem:[%s15342_s11 + $0x50] sm:$0xff]  }
 0x750   :  { %11399 = vpow2.f32 %v7801_v7 }
 0x751   :  { %v7774_v40 = vpop.xlane.xlu0 %7773 }
 0x752   :  { %v7793_v8 = vsub.f32 %v7759_v11, %v7774_v40  ;;  %v11370_v40 = vld [vmem:[%s15342_s11 + $0x10] sm:$0xff]  }
 0x754   :  { %v7803_v44 = vmul.f32 1.442695, %v7793_v8 }
 0x755   :  { %v7777_v29 = vpop.xlane.xlu0 %7776 }
 0x756   :  { %11401 = vpow2.f32 %v7803_v44  ;;  %v7794_v20 = vsub.f32 %v7760_v62, %v7777_v29 }
 0x758   :  { %v11398_v34 = vpop.eup %11397  ;;  %v7805_v26 = vmul.f32 1.442695, %v7794_v20  ;;  %v11371_v20 = vld [vmem:[%s15342_s11 + $0x58] sm:$0xff]  }
 0x759   :  { %v7780_v51 = vpop.xlane.xlu1 %7779  ;;  %v7815_v48 = vsel %vm7765_vm1, %v11398_v34, 0.0 }
 0x75a   :  { %v11400_v10 = vpop.eup %11399  ;;  %11403 = vpow2.f32 %v7805_v26  ;;  %v7795_v42 = vsub.f32 %v7761_v35, %v7780_v51  ;;  %7816 = vadd.xlane.f32.xlu1 %v7815_v48  ;;  %v11372_v51 = vld [vmem:[%s15342_s11 + $0x18] sm:$0xff]  }
 0x75b   :  { %v7783_v19 = vpop.xlane.xlu0 %7782  ;;  %v7818_v18 = vsel %vm7765_vm1, %v11400_v10, 0.0 }
 0x75c   :  { %v7807_v14 = vmul.f32 1.442695, %v7795_v42  ;;  %v7796_v61 = vsub.f32 %v7762_v52, %v7783_v19  ;;  %7819 = vadd.xlane.f32.xlu0 %v7818_v18  ;;  %v11365_v52 = vld [vmem:[%s15342_s11 + $0x40] sm:$0xff]  }
 0x75d   :  { %10067 = vmatprep.subr.bf16.mxu1 %v11365_v52  ;;  %v11374_v18 = vld [vmem:[%s15342_s11 + $0x20] sm:$0xff]  }
 0x75e   :  { %11405 = vpow2.f32 %v7807_v14  ;;  %v7809_v47 = vmul.f32 1.442695, %v7796_v61  ;;  %v11375_v61 = vld [vmem:[%s15342_s11 + $0x68] sm:$0xff]  }
 0x760   :  { %v11402_v41 = vpop.eup %11401  ;;  %11407 = vpow2.f32 %v7809_v47 }
 0x761   :  { %v7786_v6 = vpop.xlane.xlu1 %7785  ;;  %v7821_v38 = vsel %vm7765_vm1, %v11402_v41, 0.0 }
 0x762   :  { %v7797_v21 = vsub.f32 %v7763_v56, %v7786_v6  ;;  %7822 = vadd.xlane.f32.xlu1 %v7821_v38  ;;  %v11377_v38 = vld [vmem:[%s15342_s11 + $0x70] sm:$0xff]  }
 0x763   :  { %v7790_v45 = vpop.xlane.xlu0 %7789 }
 0x764   :  { %v11404_v0 = vpop.eup %11403  ;;  %v7811_v2 = vmul.f32 1.442695, %v7797_v21  ;;  %v7798_v11 = vsub.f32 %v7764_v9, %v7790_v45 }
 0x765   :  { %v7824_v43 = vsel %vm7765_vm1, %v11404_v0, 0.0 }
 0x766   :  { %11409 = vpow2.f32 %v7811_v2  ;;  %v7813_v4 = vmul.f32 1.442695, %v7798_v11  ;;  %7825 = vadd.xlane.f32.xlu0 %v7824_v43  ;;  %v11379_v11 = vld [vmem:[%s15342_s11 + $0x78] sm:$0xff]  }
 0x768   :  { %v15044_v62 = vpop.eup %11405  ;;  %11411 = vpow2.f32 %v7813_v4  ;;  %v11391_v4 = vld [vmem:[%s15340_s9 + $0x68] sm:$0xff]  }
 0x769   :  { %v7827_v57 = vsel %vm7765_vm1, %v15044_v62, 0.0 }
 0x76a   :  { %v11408_v1 = vpop.eup %11407  ;;  %7828 = vadd.xlane.f32.xlu1 %v7827_v57  ;;  %v11393_v57 = vld [vmem:[%s15340_s9 + $0x70] sm:$0xff]  }
 0x76b   :  { %v7830_v50 = vsel %vm7765_vm1, %v11408_v1, 0.0 }
 0x76c   :  { %7831 = vadd.xlane.f32.xlu0 %v7830_v50  ;;  %v11395_v50 = vld [vmem:[%s15340_s9 + $0x78] sm:$0xff]  }
 0x770   :  { %v15049_v23 = vpop.eup %11409 }
 0x771   :  { %v7833_v35 = vsel %vm7765_vm1, %v15049_v23, 0.0 }
 0x772   :  { %v15053_v12 = vpop.eup %11411  ;;  %7834 = vadd.xlane.f32.xlu1 %v7833_v35 }
 0x773   :  { %v7836_v49 = vsel %vm7787_vm2, %v15053_v12, 0.0 }
 0x774   :  { %7837 = vadd.xlane.f32.xlu0 %v7836_v49 }
 0x7e7   :  { %v7817_v55 = vpop.xlane.xlu1 %7816 }
 0x7e8   :  { %11413 = vrcp.f32 %v7817_v55 }
 0x7e9   :  { %v7820_v13 = vpop.xlane.xlu0 %7819 }
 0x7ea   :  { %11415 = vrcp.f32 %v7820_v13 }
 0x7ef   :  { %v7823_v63 = vpop.xlane.xlu1 %7822 }
 0x7f0   :  { %11417 = vrcp.f32 %v7823_v63 }
 0x7f2   :  { %v11414_v22 = vpop.eup %11413 }
 0x7f3   :  { %v7826_v56 = vpop.xlane.xlu0 %7825  ;;  %v7847_v24 = vmul.f32 %v11414_v22, %v11398_v34 }
 0x7f4   :  { %v11416_v53 = vpop.eup %11415  ;;  %11419 = vrcp.f32 %v7826_v56 }
 0x7f5   :  { %v7848_v9 = vmul.f32 %v11416_v53, %v11400_v10  ;;  %v11373_v10 = vld [vmem:[%s15342_s11 + $0x60] sm:$0xff]  }
 0x7f7   :  { %v7855_v27 = vpack.c.bf16 %v7848_v9, %v7847_v24  ;;  %v7829_v36 = vpop.xlane.xlu1 %7828 }
 0x7f8   :  { %11421 = vrcp.f32 %v7829_v36 }
 0x7f9   :  { %v7832_v60 = vpop.xlane.xlu0 %7831  ;;  %9455 = vmatmul.mubr.msk.bf16.vlgmr.msra.gmra.mrb[60].mxu1 %vm7765_vm1, %v7855_v27 }
 0x7fa   :  { %11423 = vrcp.f32 %v7832_v60  ;;  %10068 = vmatpush3.bf16.msra.mxu1 %v11366_v46  ;;  %7913 = vmatprep.mubr.bf16.mxu1 %v11500_v32  ;;  %v11418_v37 = vpop.eup %11417 }
 0x7fb   :  { %10069 = vmatprep.subr.bf16.mxu1 %v11367_v28  ;;  %v7849_v8 = vmul.f32 %v11418_v37, %v11402_v41  ;;  %v11376_v41 = vld [vmem:[%s15342_s11 + $0x28] sm:$0xff]  }
 0x7fe   :  { %v11420_v7 = vpop.eup %11419  ;;  %10070 = vmatpush3.bf16.msra.mxu1 %v11368_v30 }
 0x7ff   :  { %v7850_v44 = vmul.f32 %v11420_v7, %v11404_v0  ;;  %v7835_v29 = vpop.xlane.xlu1 %7834  ;;  %10071 = vmatprep.subr.bf16.mxu1 %v11369_v16  ;;  %v11378_v0 = vld [vmem:[%s15342_s11 + $0x30] sm:$0xff]  }
 0x800   :  { %11425 = vrcp.f32 %v7835_v29 }
 0x801   :  { %v7856_v34 = vpack.c.bf16 %v7850_v44, %v7849_v8  ;;  %v7838_v26 = vpop.xlane.xlu0 %7837 }
 0x802   :  { %11427 = vrcp.f32 %v7838_v26  ;;  %10072 = vmatpush3.bf16.msra.mxu1 %v11370_v40  ;;  %v11422_v48 = vpop.eup %11421 }
 0x803   :  { %9456 = vmatmul.mubr.msk.bf16.gmra.mrb[64].mxu1 %vm7765_vm1, %v7856_v34  ;;  %10073 = vmatprep.subr.bf16.mxu1 %v11371_v20  ;;  %v7851_v14 = vmul.f32 %v11422_v48, %v15044_v62  ;;  %v11392_v62 = vld [vmem:[%s15340_s9 + $0x28] sm:$0xff]  }
 0x804   :  { %v11424_v42 = vpop.eup %11423  ;;  %7923 = vmatprep.mubr.bf16.mxu1 %v11500_v32 }
 0x805   :  { %v7852_v19 = vmul.f32 %v11424_v42, %v11408_v1  ;;  %v11394_v1 = vld [vmem:[%s15340_s9 + $0x30] sm:$0xff]  }
 0x806   :  { %10074 = vmatpush3.bf16.msra.mxu1 %v11372_v51 }
 0x807   :  { %10075 = vmatprep.subr.bf16.mxu1 %v11373_v10  ;;  %v7857_v47 = vpack.c.bf16 %v7852_v19, %v7851_v14 }
 0x80a   :  { %10076 = vmatpush3.bf16.msra.mxu1 %v11374_v18  ;;  %v11426_v6 = vpop.eup %11425 }
 0x80b   :  { %9457 = vmatmul.mubr.msk.bf16.gmra.mrb[68].mxu1 %vm7765_vm1, %v7857_v47  ;;  %10077 = vmatprep.subr.bf16.mxu1 %v11375_v61  ;;  %v7853_v2 = vmul.f32 %v11426_v6, %v15049_v23  ;;  %v11396_v23 = vld [vmem:[%s15340_s9 + $0x38] sm:$0xff]   ;;  %v9475_v6 = vld [vmem:[%s15343_s12] ss:$0 sm:$0xff] }
 0x80c   :  { %v11428_v21 = vpop.eup %11427  ;;  %7933 = vmatprep.mubr.bf16.mxu1 %v11500_v32  ;;  %v11380_v32 = vld [vmem:[%s15342_s11 + $0x38] sm:$0xff]  }
 0x80d   :  { %v7854_v45 = vmul.f32 %v11428_v21, %v15053_v12 }
 0x80e   :  { %10078 = vmatpush3.bf16.msra.mxu1 %v11376_v41 }
 0x80f   :  { %10079 = vmatprep.subr.bf16.mxu1 %v11377_v38  ;;  %v7858_v43 = vpack.c.bf16 %v7854_v45, %v7853_v2 }
 0x812   :  { %10080 = vmatpush3.bf16.msra.mxu1 %v11378_v0 }
 0x813   :  { %9458 = vmatmul.mubr.msk.bf16.gmra.mrb[72].mxu1 %vm7765_vm1, %v7858_v43  ;;  %10081 = vmatprep.subr.bf16.mxu1 %v11379_v11 }
 0x814   :  { %8314 = vmatprep.mubr.bf16.mxu1 %v14823_v17  ;;  %v11382_v17 = vld [vmem:[%s15340_s9] sm:$0xff]  }
 0x816   :  { %10082 = vmatpush3.bf16.msra.mxu1 %v11380_v32 }
 0x81b   :  { %8315 = vmatmul.mubr.bf16.vlgmr.msra.gmra.mrb[76].mxu1 %v14821_v3  ;;  %v11381_v3 = vld [vmem:[%s15340_s9 + $0x40] sm:$0xff]  }
 0x81c   :  { %8322 = vmatprep.mubr.bf16.mxu1 %v14845_v5  ;;  %10045 = vmatprep.subr.bf16.mxu0 %v11381_v3  ;;  %v11384_v5 = vld [vmem:[%s15340_s9 + $0x8] sm:$0xff]  }
 0x81d   :  { %10046 = vmatpush3.bf16.msra.mxu0 %v11382_v17 }
 0x823   :  { %8323 = vmatmul.mubr.bf16.gmra.mrb[80].mxu1 %v14843_v39  ;;  %v11383_v39 = vld [vmem:[%s15340_s9 + $0x48] sm:$0xff]  }
 0x824   :  { %8330 = vmatprep.mubr.bf16.mxu1 %v14867_v25  ;;  %10047 = vmatprep.subr.bf16.mxu0 %v11383_v39  ;;  %v11386_v25 = vld [vmem:[%s15340_s9 + $0x10] sm:$0xff]  }
 0x825   :  { %10048 = vmatpush3.bf16.msra.mxu0 %v11384_v5 }
 0x82b   :  { %8331 = vmatmul.mubr.bf16.gmra.mrb[84].mxu1 %v14865_v58  ;;  %v11385_v58 = vld [vmem:[%s15340_s9 + $0x50] sm:$0xff]  }
 0x82c   :  { %8338 = vmatprep.mubr.bf16.mxu1 %v14889_v15  ;;  %10049 = vmatprep.subr.bf16.mxu0 %v11385_v58  ;;  %v11388_v15 = vld [vmem:[%s15340_s9 + $0x18] sm:$0xff]  }
 0x82d   :  { %10050 = vmatpush3.bf16.msra.mxu0 %v11386_v25 }
 0x833   :  { %8339 = vmatmul.mubr.bf16.gmra.mrb[88].mxu1 %v14887_v33  ;;  %v11387_v33 = vld [vmem:[%s15340_s9 + $0x58] sm:$0xff]  }
 0x834   :  { %8346 = vmatprep.mubr.bf16.mxu1 %v14911_v54  ;;  %10051 = vmatprep.subr.bf16.mxu0 %v11387_v33  ;;  %v11390_v54 = vld [vmem:[%s15340_s9 + $0x20] sm:$0xff]  }
 0x835   :  { %10052 = vmatpush3.bf16.msra.mxu0 %v11388_v15 }
 0x83b   :  { %8347 = vmatmul.mubr.bf16.gmra.mrb[92].mxu1 %v14909_v59  ;;  %v11389_v59 = vld [vmem:[%s15340_s9 + $0x60] sm:$0xff]  }
 0x83c   :  { %10053 = vmatprep.subr.bf16.mxu0 %v11389_v59 }
 0x83d   :  { %10054 = vmatpush3.bf16.msra.mxu0 %v11390_v54 }
 0x83e   :  { %10055 = vmatprep.subr.bf16.mxu0 %v11391_v4 }
 0x841   :  { %10056 = vmatpush3.bf16.msra.mxu0 %v11392_v62 }
 0x842   :  { %10057 = vmatprep.subr.bf16.mxu0 %v11393_v57 }
 0x845   :  { %10058 = vmatpush3.bf16.msra.mxu0 %v11394_v1 }
 0x846   :  { %10059 = vmatprep.subr.bf16.mxu0 %v11395_v50 }
 0x849   :  { %10060 = vmatpush3.bf16.msra.mxu0 %v11396_v23 }
 0x8cc   :  { %v7905_v35 = vpop.f32.mrb[60].mxu1 }
 0x8cd   :  { %v7907_v12 = vpop.f32.mrb[61].mxu1 }
 0x8ce   :  { %v7909_v49 = vpop.f32.mrb[62].mxu1 }
 0x8cf   :  { %v7944_v52 = vadd.f32 %v7909_v49, %v7905_v35  ;;  %v7911_v55 = vpop.f32.mrb[63].mxu1 }
 0x8d0   :  { %v7959_v13 = vadd.f32 %v7911_v55, %v7907_v12 }
 0x8d6   :  { %v7915_v63 = vpop.f32.mrb[64].mxu1 }
 0x8d7   :  { %v7945_v22 = vadd.f32 %v7944_v52, %v7915_v63  ;;  %v7917_v56 = vpop.f32.mrb[65].mxu1 }
 0x8d8   :  { %v7960_v53 = vadd.f32 %v7959_v13, %v7917_v56  ;;  %v7919_v24 = vpop.f32.mrb[66].mxu1 }
 0x8d9   :  { %v7946_v9 = vadd.f32 %v7945_v22, %v7919_v24  ;;  %v7921_v46 = vpop.f32.mrb[67].mxu1 }
 0x8da   :  { %v7961_v27 = vadd.f32 %v7960_v53, %v7921_v46 }
 0x8de   :  { %v7925_v36 = vpop.f32.mrb[68].mxu1 }
 0x8df   :  { %v7947_v28 = vadd.f32 %v7946_v9, %v7925_v36  ;;  %v7927_v60 = vpop.f32.mrb[69].mxu1 }
 0x8e0   :  { %v7962_v30 = vadd.f32 %v7961_v27, %v7927_v60  ;;  %v7929_v16 = vpop.f32.mrb[70].mxu1 }
 0x8e1   :  { %v7948_v37 = vadd.f32 %v7947_v28, %v7929_v16  ;;  %v7931_v7 = vpop.f32.mrb[71].mxu1 }
 0x8e2   :  { %v7963_v40 = vadd.f32 %v7962_v30, %v7931_v7 }
 0x8e6   :  { %v7935_v8 = vpop.f32.mrb[72].mxu1 }
 0x8e7   :  { %v7949_v44 = vadd.f32 %v7948_v37, %v7935_v8  ;;  %v7937_v29 = vpop.f32.mrb[73].mxu1 }
 0x8e8   :  { %v7964_v20 = vadd.f32 %v7963_v40, %v7937_v29  ;;  %v7939_v34 = vpop.f32.mrb[74].mxu1 }
 0x8e9   :  { %v7951_v26 = vsel %vm7950_vm3, %v7939_v34, 0.0  ;;  %v7941_v51 = vpop.f32.mrb[75].mxu1 }
 0x8ea   :  { %v7952_v48 = vadd.f32 %v7951_v26, %v7949_v44  ;;  %v7965_v10 = vsel %vm7950_vm3, %v7941_v51, 0.0 }
 0x8eb   :  { %v7966_v42 = vadd.f32 %v7965_v10, %v7964_v20 }
 0x8ec   :  { %v7953_v19 = vrot.slane %v7952_v48, 4 }
 0x8ed   :  { %v7967_v18 = vrot.slane %v7966_v42, 4 }
 0x8ee   :  { %v7954_v14 = vadd.f32 %v7953_v19, %v7952_v48  ;;  %v10083_v61 = vpop.f32.mrb[76].mxu1 }
 0x8ef   :  { %v7968_v47 = vadd.f32 %v7967_v18, %v7966_v42  ;;  %v10084_v41 = vpop.f32.mrb[77].mxu1 }
 0x8f0   :  { %v7955_v38 = vrot.slane %v7954_v14, 2  ;;  %v10085_v21 = vadd.f32 %v10084_v41, %v10083_v61  ;;  %v10086_v45 = vpop.f32.mrb[78].mxu1 }
 0x8f1   :  { %v7969_v0 = vrot.slane %v7968_v47, 2  ;;  %v10087_v2 = vpop.f32.mrb[79].mxu1 }
 0x8f2   :  { %v7956_v11 = vadd.f32 %v7955_v38, %v7954_v14  ;;  %v10088_v43 = vadd.f32 %v10087_v2, %v10086_v45  ;;  %v8317_v32 = vadd.f32 %v10085_v21, %v9475_v6 }
 0x8f3   :  { %v7970_v3 = vadd.f32 %v7969_v0, %v7968_v47 }
 0x8f4   :  { %v7957_v17 = vrot.slane %v7956_v11, 1  ;;  %v8468_v39 = vsel %vm6797_vm0, %v8317_v32, -inf  ;;  %v15177_v5 = vadd.f32 %v10088_v43, %v9475_v6 }
 0x8f5   :  { %8469 = vmax.xlane.f32.xlu0 %v8468_v39  ;;  %v7971_v58 = vrot.slane %v7970_v3, 1 }
 0x8f6   :  { %v7958_v25 = vadd.f32 %v7957_v17, %v7956_v11  ;;  %v10089_v33 = vpop.f32.mrb[80].mxu1 }
 0x8f7   :  { %v10090_v15 = vpop.f32.mrb[81].mxu1  ;;  %v7972_v59 = vadd.f32 %v7971_v58, %v7970_v3 }
 0x8f8   :  { %v7974_v54 = vmul.f32 0.016666668, %v7958_v25  ;;  %v10091_v4 = vadd.f32 %v10090_v15, %v10089_v33  ;;  %v10092_v62 = vpop.f32.mrb[82].mxu1 }
 0x8f9   :  { %v10093_v57 = vpop.f32.mrb[83].mxu1  ;;  %v7975_v1 = vmul.f32 0.016666668, %v7972_v59 }
 0x8fa   :  { %v10094_v50 = vadd.f32 %v10093_v57, %v10092_v62  ;;  %v8325_v23 = vadd.f32 %v10091_v4, %v9475_v6  ;;  %v7976_v12 = vpack.c.bf16 %v7974_v54, %v7974_v54  ;;  %v8377_v4 = vld [vmem:[%s15344_s13] sm:$0xff]  ;;  %v8378_v62 = vld [vmem:[%s15344_s13 + $0x8] sm:$0xff]  ;;  %v11501_v57 = vmov 0.0|0.0  }
 0x8fb   :  { %v7977_v35 = vpack.c.bf16 %v7975_v1, %v7975_v1  ;;  %10141 = vmatprep.subr.bf16.mxu0 %v11501_v57  ;;  %v10142_v1 = vpack.c.bf16 %v8378_v62, %v8377_v4 }
 0x8fc   :  { %v8474_v49 = vsel %vm6797_vm0, %v8325_v23, -inf  ;;  %v15180_v52 = vadd.f32 %v10094_v50, %v9475_v6 }
 0x8fd   :  { %8475 = vmax.xlane.f32.xlu0 %v8474_v49  ;;  %8139 = vmatprep.mubr.bf16.mxu0 %v7977_v35 }
 0x8fe   :  { %8140 = vmatmul.mubr.bf16.vlgmr.msra.gmra.mrb[20].mxu0 %v7976_v12  ;;  %v10095_v55 = vpop.f32.mrb[84].mxu1 }
 0x8ff   :  { %v10096_v13 = vpop.f32.mrb[85].mxu1  ;;  %10143 = vmatpush3.bf16.msra.mxu0 %v10142_v1 }
 0x900   :  { %v10097_v63 = vadd.f32 %v10096_v13, %v10095_v55  ;;  %v10098_v22 = vpop.f32.mrb[86].mxu1  ;;  %10144 = vmatprep.subr.bf16.mxu0 %v11501_v57 }
 0x901   :  { %v10099_v56 = vpop.f32.mrb[87].mxu1 }
 0x902   :  { %v10100_v53 = vadd.f32 %v10099_v56, %v10098_v22  ;;  %v8333_v24 = vadd.f32 %v10097_v63, %v9475_v6 }
 0x904   :  { %v8480_v9 = vsel %vm6797_vm0, %v8333_v24, -inf  ;;  %v15183_v46 = vadd.f32 %v10100_v53, %v9475_v6 }
 0x905   :  { %8481 = vmax.xlane.f32.xlu0 %v8480_v9 }
 0x906   :  { %v10101_v27 = vpop.f32.mrb[88].mxu1 }
 0x907   :  { %v10102_v36 = vpop.f32.mrb[89].mxu1 }
 0x908   :  { %v10103_v28 = vadd.f32 %v10102_v36, %v10101_v27  ;;  %v10104_v60 = vpop.f32.mrb[90].mxu1 }
 0x909   :  { %v10105_v30 = vpop.f32.mrb[91].mxu1 }
 0x90a   :  { %v10106_v16 = vadd.f32 %v10105_v30, %v10104_v60  ;;  %v8341_v37 = vadd.f32 %v10103_v28, %v9475_v6 }
 0x90c   :  { %v8486_v7 = vsel %vm6797_vm0, %v8341_v37, -inf  ;;  %v15186_v40 = vadd.f32 %v10106_v16, %v9475_v6 }
 0x90d   :  { %8487 = vmax.xlane.f32.xlu0 %v8486_v7 }
 0x90e   :  { %v10107_v8 = vpop.f32.mrb[92].mxu1 }
 0x90f   :  { %v10108_v44 = vpop.f32.mrb[93].mxu1 }
 0x910   :  { %v10109_v29 = vadd.f32 %v10108_v44, %v10107_v8  ;;  %v10110_v20 = vpop.f32.mrb[94].mxu1 }
 0x911   :  { %v10111_v34 = vpop.f32.mrb[95].mxu1 }
 0x912   :  { %v10112_v26 = vadd.f32 %v10111_v34, %v10110_v20  ;;  %v8349_v51 = vadd.f32 %v10109_v29, %v9475_v6  ;;  %v8471_v29 = vsel %vm6797_vm0, %v15177_v5, -inf  ;;  %v8477_v20 = vsel %vm6797_vm0, %v15180_v52, -inf }
 0x913   :  { %v8483_v34 = vsel %vm6797_vm0, %v15183_v46, -inf }
 0x914   :  { %v8492_v48 = vsel %vm6797_vm0, %v8349_v51, -inf  ;;  %v15189_v10 = vadd.f32 %v10112_v26, %v9475_v6  ;;  %v8379_v26 = vld [vmem:[%s15344_s13 + $0x10] sm:$0xff] }
 0x915   :  { %8493 = vmax.xlane.f32.xlu0 %v8492_v48  ;;  %v8489_v48 = vsel %vm6797_vm0, %v15186_v40, -inf }
 0x982   :  { %v8470_v42 = vpop.xlane.xlu0 %8469 }
 0x983   :  { %v8498_v19 = vsub.f32 %v8317_v32, %v8470_v42 }
 0x985   :  { %v8508_v18 = vmul.f32 1.442695, %v8498_v19  ;;  %v8381_v19 = vld [vmem:[%s15344_s13 + $0x20] sm:$0xff] }
 0x987   :  { %11429 = vpow2.f32 %v8508_v18  ;;  %v8382_v18 = vld [vmem:[%s15344_s13 + $0x28] sm:$0xff] }
 0x98a   :  { %v8476_v14 = vpop.xlane.xlu0 %8475 }
 0x98b   :  { %v8500_v61 = vsub.f32 %v8325_v23, %v8476_v14  ;;  %v8010_v23 = vld [vmem:[%s15341_s10] sm:$0x1]  ;;  %v8495_v14 = vsel %vm6797_vm0, %v15189_v10, -inf }
 0x98d   :  { %v8512_v47 = vmul.f32 1.442695, %v8500_v61  ;;  %v10148_v61 = vpack.c.bf16 %v8382_v18, %v8381_v19 }
 0x98f   :  { %11431 = vpow2.f32 %v8512_v47  ;;  %v8383_v47 = vld [vmem:[%s15344_s13 + $0x30] sm:$0xff] }
 0x991   :  { %v15191_v41 = vpop.eup %11429 }
 0x992   :  { %v8482_v38 = vpop.xlane.xlu0 %8481  ;;  %v8528_v21 = vsel %vm6797_vm0, %v15191_v41, 0.0 }
 0x993   :  { %v8502_v45 = vsub.f32 %v8333_v24, %v8482_v38  ;;  %8529 = vadd.xlane.f32.xlu0 %v8528_v21  ;;  %v8384_v38 = vld [vmem:[%s15344_s13 + $0x38] sm:$0xff] }
 0x994   :  { %v10151_v21 = vpack.c.bf16 %v8384_v38, %v8383_v47 }
 0x995   :  { %v8516_v0 = vmul.f32 1.442695, %v8502_v45  ;;  %v11503_v45 = vmov 0.0  }
 0x996   :  { %10138 = vmatprep.mubr.msk.f32.mxu0 %vm11502_vm6, %v11503_v45 }
 0x997   :  { %11433 = vpow2.f32 %v8516_v0 }
 0x999   :  { %v15195_v6 = vpop.eup %11431 }
 0x99a   :  { %v8488_v2 = vpop.xlane.xlu0 %8487  ;;  %v8534_v11 = vsel %vm6797_vm0, %v15195_v6, 0.0 }
 0x99b   :  { %v8504_v43 = vsub.f32 %v8341_v37, %v8488_v2  ;;  %8535 = vadd.xlane.f32.xlu0 %v8534_v11 }
 0x99d   :  { %v8520_v32 = vmul.f32 1.442695, %v8504_v43 }
 0x99f   :  { %11435 = vpow2.f32 %v8520_v32 }
 0x9a1   :  { %v15199_v3 = vpop.eup %11433 }
 0x9a2   :  { %v8494_v17 = vpop.xlane.xlu0 %8493  ;;  %v8540_v39 = vsel %vm6797_vm0, %v15199_v3, 0.0 }
 0x9a3   :  { %v8506_v58 = vsub.f32 %v8349_v51, %v8494_v17  ;;  %8541 = vadd.xlane.f32.xlu0 %v8540_v39  ;;  %v8380_v51 = vld [vmem:[%s15344_s13 + $0x18] sm:$0xff]  ;;  %s11504_s13 = smov 64  }
 0x9a4   :  { %v10145_v42 = vpack.c.bf16 %v8380_v51, %v8379_v26 }
 0x9a5   :  { %v8524_v25 = vmul.f32 1.442695, %v8506_v58 }
 0x9a6   :  { %10146 = vmatpush3.bf16.msra.mxu0 %v10145_v42 }
 0x9a7   :  { %11437 = vpow2.f32 %v8524_v25  ;;  %10147 = vmatprep.subr.bf16.mxu0 %v11501_v57 }
 0x9a9   :  { %v15203_v33 = vpop.eup %11435 }
 0x9aa   :  { %v8546_v15 = vsel %vm6797_vm0, %v15203_v33, 0.0  ;;  %10149 = vmatpush3.bf16.msra.mxu0 %v10148_v61 }
 0x9ab   :  { %8547 = vadd.xlane.f32.xlu0 %v8546_v15  ;;  %10150 = vmatprep.subr.bf16.mxu0 %v11501_v57 }
 0x9ae   :  { %10152 = vmatpush3.bf16.msra.mxu0 %v10151_v21 }
 0x9b1   :  { %v15207_v59 = vpop.eup %11437 }
 0x9b2   :  { %v8552_v54 = vsel %vm6797_vm0, %v15207_v59, 0.0 }
 0x9b3   :  { %8553 = vadd.xlane.f32.xlu0 %v8552_v54 }
 0x9d1   :  { %v10061_v50 = vpop.f32.mrb[20].mxu0 }
 0x9d2   :  { %v10062_v35 = vpop.f32.mrb[21].mxu0 }
 0x9d3   :  { %v10063_v12 = vadd.f32 %v10062_v35, %v10061_v50  ;;  %v10064_v49 = vpop.f32.mrb[22].mxu0 }
 0x9d4   :  { %v10065_v55 = vpop.f32.mrb[23].mxu0 }
 0x9d5   :  { %v8142_v13 = vadd.f32 %v10063_v12, %v8010_v23 }
 0x9d7   :  { %v8356_v63 = vand.u32 2147483647, %v8142_v13  ;;  %v8355_v16 = vmax.f32 %v8142_v13, 0.0 }
 0x9d9   :  { %v8357_v22 = vsub.f32 0.0, %v8356_v63 }
 0x9db   :  { %v8358_v56 = vmul.f32 1.442695, %v8357_v22 }
 0x9dd   :  { %11439 = vpow2.f32 %v8358_v56 }
 0x9e7   :  { %v11440_v53 = vpop.eup %11439 }
 0x9e8   :  { %v8360_v24 = vadd.f32 1.0, %v11440_v53  ;;  %v8363_v9 = vmul.f32 -0.5, %v11440_v53  ;;  %v8366_v36 = vand.u32 2147483647, %v11440_v53 }
 0x9ea   :  { %11441 = vlog2.f32 %v8360_v24  ;;  %v8364_v27 = vadd.f32 1.0, %v8363_v9  ;;  %vm8367_vm4 = vcmp.lt.f32.partialorder %v8366_v36, 0.0004427343 }
 0x9ec   :  { %v8365_v30 = vmul.f32 %v11440_v53, %v8364_v27 }
 0x9f4   :  { %v11442_v28 = vpop.eup %11441 }
 0x9f5   :  { %v8362_v60 = vmul.f32 0.6931472, %v11442_v28 }
 0x9f7   :  { %v8368_v37 = vsel %vm8367_vm4, %v8365_v30, %v8362_v60 }
 0x9f8   :  { %v8369_v7 = vadd.f32 %v8368_v37, %v8355_v16 }
 0x9fa   :  { %v8370_v8 = vadd.f32 0.0001, %v8369_v7 }
 0x9fc   :  { %v8372_v44 = vsel %vm8371_vm5, %v8370_v8, 0.0 }
 0x9fd   :  { %8373 = vadd.xlane.f32.xlu1 %v8372_v44 }
 0xa01   :  { %8472 = vmax.xlane.f32.xlu1 %v8471_v29 }
 0xa05   :  { %8478 = vmax.xlane.f32.xlu1 %v8477_v20 }
 0xa09   :  { %8484 = vmax.xlane.f32.xlu1 %v8483_v34 }
 0xa0d   :  { %8490 = vmax.xlane.f32.xlu1 %v8489_v48 }
 0xa11   :  { %8496 = vmax.xlane.f32.xlu1 %v8495_v14 }
 0xa20   :  { %v8530_v53 = vpop.xlane.xlu0 %8529 }
 0xa28   :  { %v8536_v24 = vpop.xlane.xlu0 %8535 }
 0xa30   :  { %v8542_v27 = vpop.xlane.xlu0 %8541 }
 0xa38   :  { %v8548_v60 = vpop.xlane.xlu0 %8547 }
 0xa40   :  { %v8554_v29 = vpop.xlane.xlu0 %8553 }
 0xa8a   :  { %v8374_v0 = vpop.xlane.xlu1 %8373 }
 0xa8b   :  { %11443 = vrcp.f32 %v8374_v0 }
 0xa8e   :  { %v8473_v2 = vpop.xlane.xlu1 %8472 }
 0xa8f   :  { %v8499_v11 = vsub.f32 %v15177_v5, %v8473_v2 }
 0xa91   :  { %v8510_v43 = vmul.f32 1.442695, %v8499_v11 }
 0xa92   :  { %v8479_v32 = vpop.xlane.xlu1 %8478 }
 0xa93   :  { %11445 = vpow2.f32 %v8510_v43  ;;  %v8501_v17 = vsub.f32 %v15180_v52, %v8479_v32 }
 0xa95   :  { %v11444_v39 = vpop.eup %11443  ;;  %v8514_v58 = vmul.f32 1.442695, %v8501_v17 }
 0xa96   :  { %v8376_v25 = vmul.f32 %v11444_v39, %v8370_v8  ;;  %v8485_v15 = vpop.xlane.xlu1 %8484 }
 0xa97   :  { %11447 = vpow2.f32 %v8514_v58  ;;  %v8503_v54 = vsub.f32 %v15183_v46, %v8485_v15 }
 0xa98   :  { %10139 = vmatmul.mubr.msk.f32.vlgmr.msra.gmra.mrb[24].mxu0 %vm6797_vm0, %v8376_v25  ;;  %v8458_v28 = vmul.f32 0.5, %v8376_v25 }
 0xa99   :  { %v8518_v4 = vmul.f32 1.442695, %v8503_v54 }
 0xa9a   :  { %v8491_v62 = vpop.xlane.xlu1 %8490 }
 0xa9b   :  { %11449 = vpow2.f32 %v8518_v4  ;;  %v8505_v57 = vsub.f32 %v15186_v40, %v8491_v62 }
 0xa9d   :  { %v11446_v5 = vpop.eup %11445  ;;  %v8522_v1 = vmul.f32 1.442695, %v8505_v57 }
 0xa9e   :  { %v8497_v50 = vpop.xlane.xlu1 %8496  ;;  %v8531_v23 = vsel %vm6797_vm0, %v11446_v5, 0.0 }
 0xa9f   :  { %11451 = vpow2.f32 %v8522_v1  ;;  %v8507_v52 = vsub.f32 %v15189_v10, %v8497_v50  ;;  %8532 = vadd.xlane.f32.xlu1 %v8531_v23 }
 0xaa1   :  { %v11448_v35 = vpop.eup %11447  ;;  %v8526_v12 = vmul.f32 1.442695, %v8507_v52 }
 0xaa2   :  { %v8537_v46 = vsel %vm6797_vm0, %v11448_v35, 0.0 }
 0xaa3   :  { %11453 = vpow2.f32 %v8526_v12  ;;  %8538 = vadd.xlane.f32.xlu1 %v8537_v46 }
 0xaa4   :  { %11455 = vrcp.f32 %v8530_v53 }
 0xaa5   :  { %v11450_v49 = vpop.eup %11449 }
 0xaa6   :  { %v8543_v55 = vsel %vm6797_vm0, %v11450_v49, 0.0 }
 0xaa7   :  { %8544 = vadd.xlane.f32.xlu1 %v8543_v55 }
 0xaa9   :  { %v15257_v40 = vpop.eup %11451 }
 0xaaa   :  { %v8549_v13 = vsel %vm6797_vm0, %v15257_v40, 0.0 }
 0xaab   :  { %8550 = vadd.xlane.f32.xlu1 %v8549_v13 }
 0xaad   :  { %v15261_v63 = vpop.eup %11453 }
 0xaae   :  { %v8555_v10 = vsel %vm6797_vm0, %v15261_v63, 0.0  ;;  %v11456_v7 = vpop.eup %11455 }
 0xaaf   :  { %8556 = vadd.xlane.f32.xlu1 %v8555_v10  ;;  %v8568_v42 = vmul.f32 %v11456_v7, %v15191_v41 }
 0xb2c   :  { %v8533_v22 = vpop.xlane.xlu1 %8532 }
 0xb2d   :  { %11457 = vrcp.f32 %v8533_v22 }
 0xb2e   :  { %11459 = vrcp.f32 %v8536_v24 }
 0xb30   :  { %v8539_v56 = vpop.xlane.xlu1 %8538 }
 0xb31   :  { %11461 = vrcp.f32 %v8539_v56 }
 0xb32   :  { %11463 = vrcp.f32 %v8542_v27 }
 0xb34   :  { %v8545_v9 = vpop.xlane.xlu1 %8544 }
 0xb35   :  { %11465 = vrcp.f32 %v8545_v9 }
 0xb36   :  { %11467 = vrcp.f32 %v8548_v60 }
 0xb37   :  { %v11458_v44 = vpop.eup %11457 }
 0xb38   :  { %v8551_v36 = vpop.xlane.xlu1 %8550  ;;  %v11460_v20 = vpop.eup %11459  ;;  %v8569_v19 = vmul.f32 %v11458_v44, %v11446_v5 }
 0xb39   :  { %11469 = vrcp.f32 %v8551_v36  ;;  %v8570_v47 = vmul.f32 %v11460_v20, %v15195_v6 }
 0xb3a   :  { %11471 = vrcp.f32 %v8554_v29 }
 0xb3b   :  { %v11462_v51 = vpop.eup %11461 }
 0xb3c   :  { %v8557_v34 = vpop.xlane.xlu1 %8556  ;;  %v11464_v18 = vpop.eup %11463  ;;  %v8571_v38 = vmul.f32 %v11462_v51, %v11448_v35 }
 0xb3d   :  { %11473 = vrcp.f32 %v8557_v34  ;;  %v8572_v41 = vmul.f32 %v11464_v18, %v15199_v3 }
 0xb3f   :  { %v11466_v21 = vpop.eup %11465 }
 0xb40   :  { %v8573_v43 = vmul.f32 %v11466_v21, %v11450_v49 }
 0xb6b   :  { %v8454_v30 = vpop.f32.mrb[24].mxu0 }
 0xb6c   :  { %v8459_v16 = vsub.f32 %v8454_v30, %v8458_v28  ;;  %v10140_v37 = vpop.f32.mrb[25].mxu0 }
 0xb6e   :  { %v8460_v8 = vmul.f32 9.9, %v8459_v16 }
 0xb70   :  { %v15265_v26 = vadd.f32 0.1, %v8460_v8 }
 0xb72   :  { %v8581_v48 = vrot.slane %v15265_v26, %v14615_v31  ;;  %v11468_v31 = vpop.eup %11467 }
 0xb73   :  { %v11470_v32 = vpop.eup %11469  ;;  %v8574_v15 = vmul.f32 %v11468_v31, %v15203_v33 }
 0xb74   :  { %v8582_v14 = vmul.f32 %v8581_v48, %v8568_v42  ;;  %v8583_v61 = vmul.f32 %v8581_v48, %v8569_v19  ;;  %v8584_v2 = vmul.f32 %v8581_v48, %v8570_v47  ;;  %v8585_v11 = vmul.f32 %v8581_v48, %v8571_v38  ;;  %v11472_v25 = vpop.eup %11471 }
 0xb75   :  { %v8586_v6 = vmul.f32 %v8581_v48, %v8572_v41  ;;  %v8587_v58 = vmul.f32 %v8581_v48, %v8573_v43  ;;  %v8575_v54 = vmul.f32 %v11470_v32, %v15257_v40  ;;  %v11474_v4 = vpop.eup %11473  ;;  %v8588_v57 = vmul.f32 %v8581_v48, %v8574_v15 }
 0xb76   :  { %v8592_v45 = vsel %vm6797_vm0, %v8582_v14, 0.0  ;;  %v8595_v0 = vsel %vm6797_vm0, %v8583_v61, 0.0  ;;  %v8598_v17 = vsel %vm6797_vm0, %v8584_v2, 0.0  ;;  %v8601_v39 = vsel %vm6797_vm0, %v8585_v11, 0.0 }
 0xb77   :  { %8593 = vadd.xlane.f32.xlu0 %v8592_v45  ;;  %8596 = vadd.xlane.f32.xlu1 %v8595_v0  ;;  %v8604_v62 = vsel %vm6797_vm0, %v8586_v6, 0.0  ;;  %v8607_v3 = vsel %vm6797_vm0, %v8587_v58, 0.0  ;;  %v8589_v5 = vmul.f32 %v8581_v48, %v8575_v54  ;;  %v8576_v1 = vmul.f32 %v11472_v25, %v15207_v59 }
 0xb78   :  { %v8577_v50 = vmul.f32 %v11474_v4, %v15261_v63  ;;  %v8610_v23 = vsel %vm6797_vm0, %v8588_v57, 0.0 }
 0xb79   :  { %v8613_v52 = vsel %vm6797_vm0, %v8589_v5, 0.0  ;;  %v8590_v33 = vmul.f32 %v8581_v48, %v8576_v1 }
 0xb7a   :  { %v8591_v35 = vmul.f32 %v8581_v48, %v8577_v50 }
 0xb7b   :  { %8599 = vadd.xlane.f32.xlu0 %v8598_v17  ;;  %8602 = vadd.xlane.f32.xlu1 %v8601_v39  ;;  %v8616_v12 = vsel %vm6797_vm0, %v8590_v33, 0.0 }
 0xb7c   :  { %v8619_v46 = vsel %vm6797_vm0, %v8591_v35, 0.0 }
 0xb7f   :  { %8605 = vadd.xlane.f32.xlu0 %v8604_v62  ;;  %8608 = vadd.xlane.f32.xlu1 %v8607_v3 }
 0xb83   :  { %8611 = vadd.xlane.f32.xlu0 %v8610_v23  ;;  %8614 = vadd.xlane.f32.xlu1 %v8613_v52 }
 0xb87   :  { %8617 = vadd.xlane.f32.xlu0 %v8616_v12  ;;  %8620 = vadd.xlane.f32.xlu1 %v8619_v46 }
 0xb9d   :  { %8463 = vrot.lane.b32.xlu0 %v15265_v26, %s11504_s13 }
 0xc04   :  { %v8594_v59 = vpop.xlane.xlu0 %8593  ;;  %v8597_v49 = vpop.xlane.xlu1 %8596 }
 0xc05   :  { %8622 = vst [vmem:[%s15345_s14] sm:$0xff] %v8594_v59  ;;  %8623 = vst [vmem:[%s15345_s14 + $0x8] sm:$0xff] %v8597_v49 }
 0xc08   :  { %v8600_v55 = vpop.xlane.xlu0 %8599  ;;  %v8603_v40 = vpop.xlane.xlu1 %8602 }
 0xc09   :  { %8624 = vst [vmem:[%s15345_s14 + $0x10] sm:$0xff] %v8600_v55  ;;  %8625 = vst [vmem:[%s15345_s14 + $0x18] sm:$0xff] %v8603_v40 }
 0xc0c   :  { %v8606_v13 = vpop.xlane.xlu0 %8605  ;;  %v8609_v63 = vpop.xlane.xlu1 %8608 }
 0xc0d   :  { %8626 = vst [vmem:[%s15345_s14 + $0x20] sm:$0xff] %v8606_v13  ;;  %8627 = vst [vmem:[%s15345_s14 + $0x28] sm:$0xff] %v8609_v63 }
 0xc10   :  { %v8612_v10 = vpop.xlane.xlu0 %8611  ;;  %v8615_v22 = vpop.xlane.xlu1 %8614 }
 0xc11   :  { %8628 = vst [vmem:[%s15345_s14 + $0x30] sm:$0xff] %v8612_v10  ;;  %8629 = vst [vmem:[%s15345_s14 + $0x38] sm:$0xff] %v8615_v22 }
 0xc14   :  { %v8618_v56 = vpop.xlane.xlu0 %8617  ;;  %v8621_v53 = vpop.xlane.xlu1 %8620 }
 0xc15   :  { %8630 = vst [vmem:[%s15345_s14 + $0x40] sm:$0xff] %v8618_v56  ;;  %8631 = vst [vmem:[%s15345_s14 + $0x48] sm:$0xff] %v8621_v53 }
 0xc18   :  { %v8464_v24 = vpop.permute.xlu0 %8463 }
 0xc19   :  { %v8466_v9 = vsel %vm6797_vm0, %v15265_v26, %v8464_v24 }
 0xc1a   :  { %8467 = vst [vmem:[#allocation2] sm:$0x1] %v8466_v9 }
 0xc1b   :  { %11487 = shalt.err (!%p11484_p4)
}
 0xc1c   :  { %s11488_s14 = scalar_lea.hbm %s15346_s15, 16 }
 0xc1d   :  { %p11489_p5 = scmp.ne.s32.totalorder %s15346_s15, %s11488_s14  ;;  %p11492_p6 = scmp.lt.u32.totalorder %s11488_s14, %s15346_s15 }
 0xc1f   :  { %p11494_p7 = pnand %p11492_p6, %p11489_p5 }
 0xc21   :  { %11497 = shalt.err (!%p11494_p7)
}
 0xc22   :  { %8643 = dma.vmem_to_hbm [thread:$0]  %s8641_s7, 16, %s15346_s15, [#allocation3]  }
 0xc23   :  { %11498 = dma.done.wait [#allocation3], 16  }
 0xc24   :  { %11499 = vsyncadd [#allocation3], 4294967280 }
 0xc25   :  { %8649 = vsyncpa [#allocation3], 1 }

</bundles_post_ra>
